<compile_context>
chip_gen: v7x
topology: tpu7x:2x2x1
jax: 0.10.0
libtpu: 0.0.40
codegen_flags: <defaults>
</compile_context>

<pallas_src>
import jax
import jax.numpy as jnp
from jax.experimental import pallas as pl
from jax.experimental.pallas import tpu as pltpu  # noqa: F401  (TPU backend)

LANE = 128


# ----------------------------- Pallas kernels ------------------------------

def _conv_relu_pool_kernel(cols_ref, w_ref, b_ref, o_ref):
    """relu(cols @ w + b) followed by 2x2 max-pool.

    Rows of `cols` are ordered (a, b, n, i, j) with (a, b) the four pool
    offsets outermost, so the pool is a max over 4 contiguous row blocks.
    Output rows are (n, i, j); lanes are the (128-padded) output channels.
    """
    y = jnp.dot(cols_ref[...], w_ref[...], preferred_element_type=jnp.float32)
    y = jnp.maximum(y + b_ref[...], 0.0)
    m = o_ref.shape[0]
    o_ref[...] = jnp.maximum(jnp.maximum(y[0 * m:1 * m], y[1 * m:2 * m]),
                             jnp.maximum(y[2 * m:3 * m], y[3 * m:4 * m]))


def _conv_pool_fc_kernel(cols_ref, w2_ref, b2_ref,
                         wfc1_ref, bfc1_ref, wfc2_ref, bfc2_ref,
                         wfc3_ref, bfc3_ref, o_ref):
    """conv2 + bias + ReLU + 2x2 maxpool + fc1 + ReLU + fc2 + ReLU + fc3.

    cols rows are ordered (a, b, i, j, n) so that:
      * pooling is a max over 4 contiguous (vreg-aligned) row blocks, and
      * the pooled rows of spatial position p form the contiguous aligned slab
        z[p*nb:(p+1)*nb], letting fc1 (K = 16*5*5 in NCHW-flatten order) be a
        sum of 25 small MXU matmuls against per-position weight slabs.
    Everything stays in VMEM; only the (nb, 128) logits are written back.
    """
    nb = o_ref.shape[0]                      # batch, padded to a multiple of 8
    npos = wfc1_ref.shape[0]                 # 5*5 pooled spatial positions

    y = jnp.dot(cols_ref[...], w2_ref[...], preferred_element_type=jnp.float32)
    y = jnp.maximum(y + b2_ref[...], 0.0)    # (4 * npos * nb, 128)
    m = npos * nb
    z = jnp.maximum(jnp.maximum(y[0 * m:1 * m], y[1 * m:2 * m]),
                    jnp.maximum(y[2 * m:3 * m], y[3 * m:4 * m]))  # (npos*nb,128)

    acc = jnp.zeros((nb, wfc1_ref.shape[2]), jnp.float32)
    for p in range(npos):                    # static unroll: 25 tiny matmuls
        acc = acc + jnp.dot(z[p * nb:(p + 1) * nb, :], wfc1_ref[p],
                            preferred_element_type=jnp.float32)
    h = jnp.maximum(acc + bfc1_ref[...], 0.0)
    h = jnp.maximum(
        jnp.dot(h, wfc2_ref[...], preferred_element_type=jnp.float32)
        + bfc2_ref[...], 0.0)
    out = (jnp.dot(h, wfc3_ref[...], preferred_element_type=jnp.float32)
           + bfc3_ref[...])
    o_ref[...] = out.astype(o_ref.dtype)


# ----------------------------- wrapper glue ---------------------------------

def _im2col_pool2x2(x_nhwc, k, k_pad, *, batch_innermost):
    """im2col for a valid kxk conv whose output is immediately 2x2 max-pooled.

    Returns cols of shape (4 * N * ph * pw, k_pad): rows ordered
    (a, b, n, i, j) (or (a, b, i, j, n) when batch_innermost) with (a, b) the
    pool offset and (i, j) the pooled output coords; columns ordered
    (c, di, dj) to match PyTorch's OIHW weight reshape, zero-padded to k_pad.
    """
    N, H, W, C = x_nhwc.shape
    oh, ow = H - k + 1, W - k + 1
    ph, pw = oh // 2, ow // 2
    taps = [x_nhwc[:, di:di + oh, dj:dj + ow, :]
            for di in range(k) for dj in range(k)]           # k*k x (N,oh,ow,C)
    p = jnp.stack(taps, axis=0).reshape(k, k, N, ph, 2, pw, 2, C)
    # axes: 0=di 1=dj 2=n 3=i 4=a 5=j 6=b 7=c
    if batch_innermost:
        p = p.transpose(4, 6, 3, 5, 2, 7, 0, 1)              # (a,b,i,j,n,c,di,dj)
    else:
        p = p.transpose(4, 6, 2, 3, 5, 7, 0, 1)              # (a,b,n,i,j,c,di,dj)
    cols = p.reshape(4 * N * ph * pw, C * k * k)
    if k_pad > C * k * k:
        cols = jnp.pad(cols, ((0, 0), (0, k_pad - C * k * k)))
    return cols, ph, pw


# ----------------------------- params ----------------------------------------

def init_params(key):
    ks = jax.random.split(key, 10)

    def u(k, shape, fan_in):
        bound = 1.0 / jnp.sqrt(fan_in)
        return jax.random.uniform(k, shape, jnp.float32, -bound, bound)

    return {
        "conv1_w": u(ks[0], (6, 3, 5, 5), 3 * 5 * 5),
        "conv1_b": u(ks[1], (6,), 3 * 5 * 5),
        "conv2_w": u(ks[2], (16, 6, 5, 5), 6 * 5 * 5),
        "conv2_b": u(ks[3], (16,), 6 * 5 * 5),
        "fc1_w": u(ks[4], (120, 400), 400),
        "fc1_b": u(ks[5], (120,), 400),
        "fc2_w": u(ks[6], (84, 120), 120),
        "fc2_b": u(ks[7], (84,), 120),
        "fc3_w": u(ks[8], (10, 84), 84),
        "fc3_b": u(ks[9], (10,), 84),
    }


def prepare_params(params):
    """One-time layout prep (NOT in the per-forward path):
    reshape conv/fc weights to (K, N) matmul form, zero-pad K and N to
    lane-friendly multiples of 128, and fold the PyTorch NCHW flatten order
    into per-spatial-position fc1 weight slabs."""
    def pad2(a, rows, cols):
        return jnp.pad(a, ((0, rows - a.shape[0]), (0, cols - a.shape[1])))

    def pad_bias(b):
        return jnp.pad(b, (0, LANE - b.shape[0])).reshape(1, LANE)

    w1 = pad2(params["conv1_w"].reshape(6, 75).T, LANE, LANE)          # (128,128)
    w2 = pad2(params["conv2_w"].reshape(16, 150).T, 2 * LANE, LANE)    # (256,128)
    # fc1: (120, 400) with flat k = c*25 + p  ->  (25, 16, 120) -> (25, 128, 128)
    w_fc1 = params["fc1_w"].reshape(120, 16, 25).transpose(2, 1, 0)
    w_fc1 = jnp.pad(w_fc1, ((0, 0), (0, LANE - 16), (0, LANE - 120)))
    w_fc2 = pad2(params["fc2_w"].T, LANE, LANE)                        # (128,128)
    w_fc3 = pad2(params["fc3_w"].T, LANE, LANE)                        # (128,128)
    return {
        "w1": w1, "b1": pad_bias(params["conv1_b"]),
        "w2": w2, "b2": pad_bias(params["conv2_b"]),
        "w_fc1": w_fc1, "b_fc1": pad_bias(params["fc1_b"]),
        "w_fc2": w_fc2, "b_fc2": pad_bias(params["fc2_b"]),
        "w_fc3": w_fc3, "b_fc3": pad_bias(params["fc3_b"]),
    }


# ----------------------------- forward ---------------------------------------

def convnet_forward(prepped, x):
    """x: (N, 3, 32, 32) NCHW float32 -> logits (N, 10)."""
    n = x.shape[0]

    # ---- stage 1: conv1 + ReLU + pool (one pallas_call) ---------------------
    x_nhwc = jnp.transpose(x, (0, 2, 3, 1))                       # (N,32,32,3)
    cols1, ph1, pw1 = _im2col_pool2x2(x_nhwc, 5, LANE, batch_innermost=False)
    m1 = n * ph1 * pw1
    h1 = pl.pallas_call(
        _conv_relu_pool_kernel,
        out_shape=jax.ShapeDtypeStruct((m1, LANE), jnp.float32),
        in_specs=[pl.BlockSpec(cols1.shape, lambda: (0, 0)),
                  pl.BlockSpec(prepped["w1"].shape, lambda: (0, 0)),
                  pl.BlockSpec((1, LANE), lambda: (0, 0))],
        out_specs=pl.BlockSpec((m1, LANE), lambda: (0, 0)),
    )(cols1, prepped["w1"], prepped["b1"])                        # (N*14*14,128)

    # ---- stage 2: conv2 + ReLU + pool + fc1/2/3 (one pallas_call) -----------
    # TODO(synk): the patch extraction (im2col) between the two conv stages is
    # XLA wrapper glue; the strided gather it needs has no clean single-kernel
    # Pallas expression at this tiny size.
    h1 = h1.reshape(n, ph1, pw1, LANE)[:, :, :, :6]               # real channels
    nb = -(-n // 8) * 8                                           # batch -> x8
    h1 = jnp.pad(h1, ((0, nb - n), (0, 0), (0, 0), (0, 0)))       # aligned rows
    cols2, _, _ = _im2col_pool2x2(h1, 5, 2 * LANE, batch_innermost=True)

    out = pl.pallas_call(
        _conv_pool_fc_kernel,
        out_shape=jax.ShapeDtypeStruct((nb, LANE), jnp.float32),
        in_specs=[pl.BlockSpec(cols2.shape, lambda: (0, 0)),
                  pl.BlockSpec(prepped["w2"].shape, lambda: (0, 0)),
                  pl.BlockSpec((1, LANE), lambda: (0, 0)),
                  pl.BlockSpec(prepped["w_fc1"].shape, lambda: (0, 0, 0)),
                  pl.BlockSpec((1, LANE), lambda: (0, 0)),
                  pl.BlockSpec((LANE, LANE), lambda: (0, 0)),
                  pl.BlockSpec((1, LANE), lambda: (0, 0)),
                  pl.BlockSpec((LANE, LANE), lambda: (0, 0)),
                  pl.BlockSpec((1, LANE), lambda: (0, 0))],
        out_specs=pl.BlockSpec((nb, LANE), lambda: (0, 0)),
    )(cols2, prepped["w2"], prepped["b2"],
      prepped["w_fc1"], prepped["b_fc1"],
      prepped["w_fc2"], prepped["b_fc2"],
      prepped["w_fc3"], prepped["b_fc3"])
    return out[:n, :10]


# ----------------------------- pure-JAX reference ----------------------------

def reference_forward(params, x):
    def conv(x, w, b):
        y = jax.lax.conv_general_dilated(
            x, w, window_strides=(1, 1), padding="VALID",
            dimension_numbers=("NCHW", "OIHW", "NCHW"))
        return y + b[None, :, None, None]

    def pool(x):
        return jax.lax.reduce_window(x, -jnp.inf, jax.lax.max,
                                     (1, 1, 2, 2), (1, 1, 2, 2), "VALID")

    y = pool(jnp.maximum(conv(x, params["conv1_w"], params["conv1_b"]), 0))
    y = pool(jnp.maximum(conv(y, params["conv2_w"], params["conv2_b"]), 0))
    y = y.reshape(-1, 16 * 5 * 5)
    y = jnp.maximum(y @ params["fc1_w"].T + params["fc1_b"], 0)
    y = jnp.maximum(y @ params["fc2_w"].T + params["fc2_b"], 0)
    y = y @ params["fc3_w"].T + params["fc3_b"]
    return y


# ----------------------------- main -------------------------------------------

if __name__ == "__main__":
    key = jax.random.PRNGKey(0)
    k_params, k_x = jax.random.split(key)
    params = init_params(k_params)
    prepped = prepare_params(params)          # one-time weight layout prep
    # fc1's 16*5*5 input implies 32x32 spatial input (CIFAR-10 sized).
    x = jax.random.normal(k_x, (2, 3, 32, 32), jnp.float32)

    fwd = jax.jit(convnet_forward)
    out = jax.block_until_ready(fwd(prepped, x))
    ref = jax.block_until_ready(reference_forward(params, x))

    assert out.shape == (2, 10), out.shape
    err = float(jnp.max(jnp.abs(out - ref)))
    assert jnp.allclose(out, ref, atol=1e-3, rtol=1e-3), f"max abs err {err}"
    print("KERNEL_OK")
</pallas_src>

<mosaic_0001>
module attributes {stable_mosaic.version = 11 : i64} {
  func.func @_conv_relu_pool_kernel(%arg0: memref<1568x128xf32, #tpu.memory_space<vmem>>, %arg1: memref<128x128xf32, #tpu.memory_space<vmem>>, %arg2: memref<1x128xf32, #tpu.memory_space<vmem>>, %arg3: memref<392x128xf32, #tpu.memory_space<vmem>>) attributes {dimension_semantics = [], scalar_prefetch = 0 : i64, scratch_operands = 0 : i64, tpu.core_type = #tpu.core_type<tc>} {
    %c0 = arith.constant 0 : index
    %c0_0 = arith.constant 0 : index
    %0 = vector.load %arg0[%c0, %c0_0] : memref<1568x128xf32, #tpu.memory_space<vmem>>, vector<1568x128xf32>
    %c0_1 = arith.constant 0 : index
    %c0_2 = arith.constant 0 : index
    %1 = vector.load %arg1[%c0_1, %c0_2] : memref<128x128xf32, #tpu.memory_space<vmem>>, vector<128x128xf32>
    %cst = arith.constant dense<0.000000e+00> : vector<1568x128xf32>
    %2 = tpu.matmul %0, %1, %cst {dimension_numbers = #tpu.dot_dimension_numbers<[1], [0], [0], [1], [0, 0, 1, 1], [], []>} : vector<1568x128xf32>, vector<128x128xf32>, vector<1568x128xf32> -> vector<1568x128xf32>
    %c0_3 = arith.constant 0 : index
    %c0_4 = arith.constant 0 : index
    %3 = vector.load %arg2[%c0_3, %c0_4] : memref<1x128xf32, #tpu.memory_space<vmem>>, vector<1x128xf32>
    %4 = vector.broadcast %3 : vector<1x128xf32> to vector<1568x128xf32>
    %5 = arith.addf %2, %4 : vector<1568x128xf32>
    %cst_5 = arith.constant 0.000000e+00 : f32
    %6 = vector.broadcast %cst_5 : f32 to vector<1568x128xf32>
    %7 = arith.maximumf %5, %6 : vector<1568x128xf32>
    %8 = vector.extract_strided_slice %7 {offsets = [0, 0], sizes = [392, 128], strides = [1, 1]} : vector<1568x128xf32> to vector<392x128xf32>
    %9 = vector.extract_strided_slice %7 {offsets = [392, 0], sizes = [392, 128], strides = [1, 1]} : vector<1568x128xf32> to vector<392x128xf32>
    %10 = arith.maximumf %8, %9 : vector<392x128xf32>
    %11 = vector.extract_strided_slice %7 {offsets = [784, 0], sizes = [392, 128], strides = [1, 1]} : vector<1568x128xf32> to vector<392x128xf32>
    %12 = vector.extract_strided_slice %7 {offsets = [1176, 0], sizes = [392, 128], strides = [1, 1]} : vector<1568x128xf32> to vector<392x128xf32>
    %13 = arith.maximumf %11, %12 : vector<392x128xf32>
    %14 = arith.maximumf %10, %13 : vector<392x128xf32>
    %c0_6 = arith.constant 0 : index
    %c0_7 = arith.constant 0 : index
    %15 = vector.load %arg3[%c0_6, %c0_7] : memref<392x128xf32, #tpu.memory_space<vmem>>, vector<392x128xf32>
    tpu.vector_store %arg3[%c0_6, %c0_7], %14 {strides = array<i32>} : memref<392x128xf32, #tpu.memory_space<vmem>>, vector<392x128xf32>,
    return
  }
}

module attributes {stable_mosaic.version = 11 : i64} {
  func.func @_conv_pool_fc_kernel(%arg0: memref<800x256xf32, #tpu.memory_space<vmem>>, %arg1: memref<256x128xf32, #tpu.memory_space<vmem>>, %arg2: memref<1x128xf32, #tpu.memory_space<vmem>>, %arg3: memref<25x128x128xf32, #tpu.memory_space<vmem>>, %arg4: memref<1x128xf32, #tpu.memory_space<vmem>>, %arg5: memref<128x128xf32, #tpu.memory_space<vmem>>, %arg6: memref<1x128xf32, #tpu.memory_space<vmem>>, %arg7: memref<128x128xf32, #tpu.memory_space<vmem>>, %arg8: memref<1x128xf32, #tpu.memory_space<vmem>>, %arg9: memref<8x128xf32, #tpu.memory_space<vmem>>) attributes {dimension_semantics = [], scalar_prefetch = 0 : i64, scratch_operands = 0 : i64, tpu.core_type = #tpu.core_type<tc>} {
    %c0 = arith.constant 0 : index
    %c0_0 = arith.constant 0 : index
    %0 = vector.load %arg0[%c0, %c0_0] : memref<800x256xf32, #tpu.memory_space<vmem>>, vector<800x256xf32>
    %c0_1 = arith.constant 0 : index
    %c0_2 = arith.constant 0 : index
    %1 = vector.load %arg1[%c0_1, %c0_2] : memref<256x128xf32, #tpu.memory_space<vmem>>, vector<256x128xf32>
    %cst = arith.constant dense<0.000000e+00> : vector<800x128xf32>
    %2 = tpu.matmul %0, %1, %cst {dimension_numbers = #tpu.dot_dimension_numbers<[1], [0], [0], [1], [0, 0, 1, 1], [], []>} : vector<800x256xf32>, vector<256x128xf32>, vector<800x128xf32> -> vector<800x128xf32>
    %c0_3 = arith.constant 0 : index
    %c0_4 = arith.constant 0 : index
    %3 = vector.load %arg2[%c0_3, %c0_4] : memref<1x128xf32, #tpu.memory_space<vmem>>, vector<1x128xf32>
    %4 = vector.broadcast %3 : vector<1x128xf32> to vector<800x128xf32>
    %5 = arith.addf %2, %4 : vector<800x128xf32>
    %cst_5 = arith.constant 0.000000e+00 : f32
    %6 = vector.broadcast %cst_5 : f32 to vector<800x128xf32>
    %7 = arith.maximumf %5, %6 : vector<800x128xf32>
    %8 = vector.extract_strided_slice %7 {offsets = [0, 0], sizes = [200, 128], strides = [1, 1]} : vector<800x128xf32> to vector<200x128xf32>
    %9 = vector.extract_strided_slice %7 {offsets = [200, 0], sizes = [200, 128], strides = [1, 1]} : vector<800x128xf32> to vector<200x128xf32>
    %10 = arith.maximumf %8, %9 : vector<200x128xf32>
    %11 = vector.extract_strided_slice %7 {offsets = [400, 0], sizes = [200, 128], strides = [1, 1]} : vector<800x128xf32> to vector<200x128xf32>
    %12 = vector.extract_strided_slice %7 {offsets = [600, 0], sizes = [200, 128], strides = [1, 1]} : vector<800x128xf32> to vector<200x128xf32>
    %13 = arith.maximumf %11, %12 : vector<200x128xf32>
    %14 = arith.maximumf %10, %13 : vector<200x128xf32>
    %cst_6 = arith.constant 0.000000e+00 : f32
    %15 = vector.broadcast %cst_6 : f32 to vector<8x128xf32>
    %16 = vector.extract_strided_slice %14 {offsets = [0, 0], sizes = [8, 128], strides = [1, 1]} : vector<200x128xf32> to vector<8x128xf32>
    %c0_7 = arith.constant 0 : index
    %c0_8 = arith.constant 0 : index
    %c0_9 = arith.constant 0 : index
    %17 = vector.load %arg3[%c0_7, %c0_8, %c0_9] : memref<25x128x128xf32, #tpu.memory_space<vmem>>, vector<1x128x128xf32>
    %18 = vector.shape_cast %17 : vector<1x128x128xf32> to vector<128x128xf32>
    %cst_10 = arith.constant dense<0.000000e+00> : vector<8x128xf32>
    %19 = tpu.matmul %16, %18, %cst_10 {dimension_numbers = #tpu.dot_dimension_numbers<[1], [0], [0], [1], [0, 0, 1, 1], [], []>} : vector<8x128xf32>, vector<128x128xf32>, vector<8x128xf32> -> vector<8x128xf32>
    %20 = arith.addf %15, %19 : vector<8x128xf32>
    %21 = vector.extract_strided_slice %14 {offsets = [8, 0], sizes = [8, 128], strides = [1, 1]} : vector<200x128xf32> to vector<8x128xf32>
    %c1 = arith.constant 1 : index
    %c0_11 = arith.constant 0 : index
    %c0_12 = arith.constant 0 : index
    %22 = vector.load %arg3[%c1, %c0_11, %c0_12] : memref<25x128x128xf32, #tpu.memory_space<vmem>>, vector<1x128x128xf32>
    %23 = vector.shape_cast %22 : vector<1x128x128xf32> to vector<128x128xf32>
    %cst_13 = arith.constant dense<0.000000e+00> : vector<8x128xf32>
    %24 = tpu.matmul %21, %23, %cst_13 {dimension_numbers = #tpu.dot_dimension_numbers<[1], [0], [0], [1], [0, 0, 1, 1], [], []>} : vector<8x128xf32>, vector<128x128xf32>, vector<8x128xf32> -> vector<8x128xf32>
    %25 = arith.addf %20, %24 : vector<8x128xf32>
    %26 = vector.extract_strided_slice %14 {offsets = [16, 0], sizes = [8, 128], strides = [1, 1]} : vector<200x128xf32> to vector<8x128xf32>
    %c2 = arith.constant 2 : index
    %c0_14 = arith.constant 0 : index
    %c0_15 = arith.constant 0 : index
    %27 = vector.load %arg3[%c2, %c0_14, %c0_15] : memref<25x128x128xf32, #tpu.memory_space<vmem>>, vector<1x128x128xf32>
    %28 = vector.shape_cast %27 : vector<1x128x128xf32> to vector<128x128xf32>
    %cst_16 = arith.constant dense<0.000000e+00> : vector<8x128xf32>
    %29 = tpu.matmul %26, %28, %cst_16 {dimension_numbers = #tpu.dot_dimension_numbers<[1], [0], [0], [1], [0, 0, 1, 1], [], []>} : vector<8x128xf32>, vector<128x128xf32>, vector<8x128xf32> -> vector<8x128xf32>
    %30 = arith.addf %25, %29 : vector<8x128xf32>
    %31 = vector.extract_strided_slice %14 {offsets = [24, 0], sizes = [8, 128], strides = [1, 1]} : vector<200x128xf32> to vector<8x128xf32>
    %c3 = arith.constant 3 : index
    %c0_17 = arith.constant 0 : index
    %c0_18 = arith.constant 0 : index
    %32 = vector.load %arg3[%c3, %c0_17, %c0_18] : memref<25x128x128xf32, #tpu.memory_space<vmem>>, vector<1x128x128xf32>
    %33 = vector.shape_cast %32 : vector<1x128x128xf32> to vector<128x128xf32>
    %cst_19 = arith.constant dense<0.000000e+00> : vector<8x128xf32>
    %34 = tpu.matmul %31, %33, %cst_19 {dimension_numbers = #tpu.dot_dimension_numbers<[1], [0], [0], [1], [0, 0, 1, 1], [], []>} : vector<8x128xf32>, vector<128x128xf32>, vector<8x128xf32> -> vector<8x128xf32>
    %35 = arith.addf %30, %34 : vector<8x128xf32>
    %36 = vector.extract_strided_slice %14 {offsets = [32, 0], sizes = [8, 128], strides = [1, 1]} : vector<200x128xf32> to vector<8x128xf32>
    %c4 = arith.constant 4 : index
    %c0_20 = arith.constant 0 : index
    %c0_21 = arith.constant 0 : index
    %37 = vector.load %arg3[%c4, %c0_20, %c0_21] : memref<25x128x128xf32, #tpu.memory_space<vmem>>, vector<1x128x128xf32>
    %38 = vector.shape_cast %37 : vector<1x128x128xf32> to vector<128x128xf32>
    %cst_22 = arith.constant dense<0.000000e+00> : vector<8x128xf32>
    %39 = tpu.matmul %36, %38, %cst_22 {dimension_numbers = #tpu.dot_dimension_numbers<[1], [0], [0], [1], [0, 0, 1, 1], [], []>} : vector<8x128xf32>, vector<128x128xf32>, vector<8x128xf32> -> vector<8x128xf32>
    %40 = arith.addf %35, %39 : vector<8x128xf32>
    %41 = vector.extract_strided_slice %14 {offsets = [40, 0], sizes = [8, 128], strides = [1, 1]} : vector<200x128xf32> to vector<8x128xf32>
    %c5 = arith.constant 5 : index
    %c0_23 = arith.constant 0 : index
    %c0_24 = arith.constant 0 : index
    %42 = vector.load %arg3[%c5, %c0_23, %c0_24] : memref<25x128x128xf32, #tpu.memory_space<vmem>>, vector<1x128x128xf32>
    %43 = vector.shape_cast %42 : vector<1x128x128xf32> to vector<128x128xf32>
    %cst_25 = arith.constant dense<0.000000e+00> : vector<8x128xf32>
    %44 = tpu.matmul %41, %43, %cst_25 {dimension_numbers = #tpu.dot_dimension_numbers<[1], [0], [0], [1], [0, 0, 1, 1], [], []>} : vector<8x128xf32>, vector<128x128xf32>, vector<8x128xf32> -> vector<8x128xf32>
    %45 = arith.addf %40, %44 : vector<8x128xf32>
    %46 = vector.extract_strided_slice %14 {offsets = [48, 0], sizes = [8, 128], strides = [1, 1]} : vector<200x128xf32> to vector<8x128xf32>
    %c6 = arith.constant 6 : index
    %c0_26 = arith.constant 0 : index
    %c0_27 = arith.constant 0 : index
    %47 = vector.load %arg3[%c6, %c0_26, %c0_27] : memref<25x128x128xf32, #tpu.memory_space<vmem>>, vector<1x128x128xf32>
    %48 = vector.shape_cast %47 : vector<1x128x128xf32> to vector<128x128xf32>
    %cst_28 = arith.constant dense<0.000000e+00> : vector<8x128xf32>
    %49 = tpu.matmul %46, %48, %cst_28 {dimension_numbers = #tpu.dot_dimension_numbers<[1], [0], [0], [1], [0, 0, 1, 1], [], []>} : vector<8x128xf32>, vector<128x128xf32>, vector<8x128xf32> -> vector<8x128xf32>
    %50 = arith.addf %45, %49 : vector<8x128xf32>
    %51 = vector.extract_strided_slice %14 {offsets = [56, 0], sizes = [8, 128], strides = [1, 1]} : vector<200x128xf32> to vector<8x128xf32>
    %c7 = arith.constant 7 : index
    %c0_29 = arith.constant 0 : index
    %c0_30 = arith.constant 0 : index
    %52 = vector.load %arg3[%c7, %c0_29, %c0_30] : memref<25x128x128xf32, #tpu.memory_space<vmem>>, vector<1x128x128xf32>
    %53 = vector.shape_cast %52 : vector<1x128x128xf32> to vector<128x128xf32>
    %cst_31 = arith.constant dense<0.000000e+00> : vector<8x128xf32>
    %54 = tpu.matmul %51, %53, %cst_31 {dimension_numbers = #tpu.dot_dimension_numbers<[1], [0], [0], [1], [0, 0, 1, 1], [], []>} : vector<8x128xf32>, vector<128x128xf32>, vector<8x128xf32> -> vector<8x128xf32>
    %55 = arith.addf %50, %54 : vector<8x128xf32>
    %56 = vector.extract_strided_slice %14 {offsets = [64, 0], sizes = [8, 128], strides = [1, 1]} : vector<200x128xf32> to vector<8x128xf32>
    %c8 = arith.constant 8 : index
    %c0_32 = arith.constant 0 : index
    %c0_33 = arith.constant 0 : index
    %57 = vector.load %arg3[%c8, %c0_32, %c0_33] : memref<25x128x128xf32, #tpu.memory_space<vmem>>, vector<1x128x128xf32>
    %58 = vector.shape_cast %57 : vector<1x128x128xf32> to vector<128x128xf32>
    %cst_34 = arith.constant dense<0.000000e+00> : vector<8x128xf32>
    %59 = tpu.matmul %56, %58, %cst_34 {dimension_numbers = #tpu.dot_dimension_numbers<[1], [0], [0], [1], [0, 0, 1, 1], [], []>} : vector<8x128xf32>, vector<128x128xf32>, vector<8x128xf32> -> vector<8x128xf32>
    %60 = arith.addf %55, %59 : vector<8x128xf32>
    %61 = vector.extract_strided_slice %14 {offsets = [72, 0], sizes = [8, 128], strides = [1, 1]} : vector<200x128xf32> to vector<8x128xf32>
    %c9 = arith.constant 9 : index
    %c0_35 = arith.constant 0 : index
    %c0_36 = arith.constant 0 : index
    %62 = vector.load %arg3[%c9, %c0_35, %c0_36] : memref<25x128x128xf32, #tpu.memory_space<vmem>>, vector<1x128x128xf32>
    %63 = vector.shape_cast %62 : vector<1x128x128xf32> to vector<128x128xf32>
    %cst_37 = arith.constant dense<0.000000e+00> : vector<8x128xf32>
    %64 = tpu.matmul %61, %63, %cst_37 {dimension_numbers = #tpu.dot_dimension_numbers<[1], [0], [0], [1], [0, 0, 1, 1], [], []>} : vector<8x128xf32>, vector<128x128xf32>, vector<8x128xf32> -> vector<8x128xf32>
    %65 = arith.addf %60, %64 : vector<8x128xf32>
    %66 = vector.extract_strided_slice %14 {offsets = [80, 0], sizes = [8, 128], strides = [1, 1]} : vector<200x128xf32> to vector<8x128xf32>
    %c10 = arith.constant 10 : index
    %c0_38 = arith.constant 0 : index
    %c0_39 = arith.constant 0 : index
    %67 = vector.load %arg3[%c10, %c0_38, %c0_39] : memref<25x128x128xf32, #tpu.memory_space<vmem>>, vector<1x128x128xf32>
    %68 = vector.shape_cast %67 : vector<1x128x128xf32> to vector<128x128xf32>
    %cst_40 = arith.constant dense<0.000000e+00> : vector<8x128xf32>
    %69 = tpu.matmul %66, %68, %cst_40 {dimension_numbers = #tpu.dot_dimension_numbers<[1], [0], [0], [1], [0, 0, 1, 1], [], []>} : vector<8x128xf32>, vector<128x128xf32>, vector<8x128xf32> -> vector<8x128xf32>
    %70 = arith.addf %65, %69 : vector<8x128xf32>
    %71 = vector.extract_strided_slice %14 {offsets = [88, 0], sizes = [8, 128], strides = [1, 1]} : vector<200x128xf32> to vector<8x128xf32>
    %c11 = arith.constant 11 : index
    %c0_41 = arith.constant 0 : index
    %c0_42 = arith.constant 0 : index
    %72 = vector.load %arg3[%c11, %c0_41, %c0_42] : memref<25x128x128xf32, #tpu.memory_space<vmem>>, vector<1x128x128xf32>
    %73 = vector.shape_cast %72 : vector<1x128x128xf32> to vector<128x128xf32>
    %cst_43 = arith.constant dense<0.000000e+00> : vector<8x128xf32>
    %74 = tpu.matmul %71, %73, %cst_43 {dimension_numbers = #tpu.dot_dimension_numbers<[1], [0], [0], [1], [0, 0, 1, 1], [], []>} : vector<8x128xf32>, vector<128x128xf32>, vector<8x128xf32> -> vector<8x128xf32>
    %75 = arith.addf %70, %74 : vector<8x128xf32>
    %76 = vector.extract_strided_slice %14 {offsets = [96, 0], sizes = [8, 128], strides = [1, 1]} : vector<200x128xf32> to vector<8x128xf32>
    %c12 = arith.constant 12 : index
    %c0_44 = arith.constant 0 : index
    %c0_45 = arith.constant 0 : index
    %77 = vector.load %arg3[%c12, %c0_44, %c0_45] : memref<25x128x128xf32, #tpu.memory_space<vmem>>, vector<1x128x128xf32>
    %78 = vector.shape_cast %77 : vector<1x128x128xf32> to vector<128x128xf32>
    %cst_46 = arith.constant dense<0.000000e+00> : vector<8x128xf32>
    %79 = tpu.matmul %76, %78, %cst_46 {dimension_numbers = #tpu.dot_dimension_numbers<[1], [0], [0], [1], [0, 0, 1, 1], [], []>} : vector<8x128xf32>, vector<128x128xf32>, vector<8x128xf32> -> vector<8x128xf32>
    %80 = arith.addf %75, %79 : vector<8x128xf32>
    %81 = vector.extract_strided_slice %14 {offsets = [104, 0], sizes = [8, 128], strides = [1, 1]} : vector<200x128xf32> to vector<8x128xf32>
    %c13 = arith.constant 13 : index
    %c0_47 = arith.constant 0 : index
    %c0_48 = arith.constant 0 : index
    %82 = vector.load %arg3[%c13, %c0_47, %c0_48] : memref<25x128x128xf32, #tpu.memory_space<vmem>>, vector<1x128x128xf32>
    %83 = vector.shape_cast %82 : vector<1x128x128xf32> to vector<128x128xf32>
    %cst_49 = arith.constant dense<0.000000e+00> : vector<8x128xf32>
    %84 = tpu.matmul %81, %83, %cst_49 {dimension_numbers = #tpu.dot_dimension_numbers<[1], [0], [0], [1], [0, 0, 1, 1], [], []>} : vector<8x128xf32>, vector<128x128xf32>, vector<8x128xf32> -> vector<8x128xf32>
    %85 = arith.addf %80, %84 : vector<8x128xf32>
    %86 = vector.extract_strided_slice %14 {offsets = [112, 0], sizes = [8, 128], strides = [1, 1]} : vector<200x128xf32> to vector<8x128xf32>
    %c14 = arith.constant 14 : index
    %c0_50 = arith.constant 0 : index
    %c0_51 = arith.constant 0 : index
    %87 = vector.load %arg3[%c14, %c0_50, %c0_51] : memref<25x128x128xf32, #tpu.memory_space<vmem>>, vector<1x128x128xf32>
    %88 = vector.shape_cast %87 : vector<1x128x128xf32> to vector<128x128xf32>
    %cst_52 = arith.constant dense<0.000000e+00> : vector<8x128xf32>
    %89 = tpu.matmul %86, %88, %cst_52 {dimension_numbers = #tpu.dot_dimension_numbers<[1], [0], [0], [1], [0, 0, 1, 1], [], []>} : vector<8x128xf32>, vector<128x128xf32>, vector<8x128xf32> -> vector<8x128xf32>
    %90 = arith.addf %85, %89 : vector<8x128xf32>
    %91 = vector.extract_strided_slice %14 {offsets = [120, 0], sizes = [8, 128], strides = [1, 1]} : vector<200x128xf32> to vector<8x128xf32>
    %c15 = arith.constant 15 : index
    %c0_53 = arith.constant 0 : index
    %c0_54 = arith.constant 0 : index
    %92 = vector.load %arg3[%c15, %c0_53, %c0_54] : memref<25x128x128xf32, #tpu.memory_space<vmem>>, vector<1x128x128xf32>
    %93 = vector.shape_cast %92 : vector<1x128x128xf32> to vector<128x128xf32>
    %cst_55 = arith.constant dense<0.000000e+00> : vector<8x128xf32>
    %94 = tpu.matmul %91, %93, %cst_55 {dimension_numbers = #tpu.dot_dimension_numbers<[1], [0], [0], [1], [0, 0, 1, 1], [], []>} : vector<8x128xf32>, vector<128x128xf32>, vector<8x128xf32> -> vector<8x128xf32>
    %95 = arith.addf %90, %94 : vector<8x128xf32>
    %96 = vector.extract_strided_slice %14 {offsets = [128, 0], sizes = [8, 128], strides = [1, 1]} : vector<200x128xf32> to vector<8x128xf32>
    %c16 = arith.constant 16 : index
    %c0_56 = arith.constant 0 : index
    %c0_57 = arith.constant 0 : index
    %97 = vector.load %arg3[%c16, %c0_56, %c0_57] : memref<25x128x128xf32, #tpu.memory_space<vmem>>, vector<1x128x128xf32>
    %98 = vector.shape_cast %97 : vector<1x128x128xf32> to vector<128x128xf32>
    %cst_58 = arith.constant dense<0.000000e+00> : vector<8x128xf32>
    %99 = tpu.matmul %96, %98, %cst_58 {dimension_numbers = #tpu.dot_dimension_numbers<[1], [0], [0], [1], [0, 0, 1, 1], [], []>} : vector<8x128xf32>, vector<128x128xf32>, vector<8x128xf32> -> vector<8x128xf32>
    %100 = arith.addf %95, %99 : vector<8x128xf32>
    %101 = vector.extract_strided_slice %14 {offsets = [136, 0], sizes = [8, 128], strides = [1, 1]} : vector<200x128xf32> to vector<8x128xf32>
    %c17 = arith.constant 17 : index
    %c0_59 = arith.constant 0 : index
    %c0_60 = arith.constant 0 : index
    %102 = vector.load %arg3[%c17, %c0_59, %c0_60] : memref<25x128x128xf32, #tpu.memory_space<vmem>>, vector<1x128x128xf32>
    %103 = vector.shape_cast %102 : vector<1x128x128xf32> to vector<128x128xf32>
    %cst_61 = arith.constant dense<0.000000e+00> : vector<8x128xf32>
    %104 = tpu.matmul %101, %103, %cst_61 {dimension_numbers = #tpu.dot_dimension_numbers<[1], [0], [0], [1], [0, 0, 1, 1], [], []>} : vector<8x128xf32>, vector<128x128xf32>, vector<8x128xf32> -> vector<8x128xf32>
    %105 = arith.addf %100, %104 : vector<8x128xf32>
    %106 = vector.extract_strided_slice %14 {offsets = [144, 0], sizes = [8, 128], strides = [1, 1]} : vector<200x128xf32> to vector<8x128xf32>
    %c18 = arith.constant 18 : index
    %c0_62 = arith.constant 0 : index
    %c0_63 = arith.constant 0 : index
    %107 = vector.load %arg3[%c18, %c0_62, %c0_63] : memref<25x128x128xf32, #tpu.memory_space<vmem>>, vector<1x128x128xf32>
    %108 = vector.shape_cast %107 : vector<1x128x128xf32> to vector<128x128xf32>
    %cst_64 = arith.constant dense<0.000000e+00> : vector<8x128xf32>
    %109 = tpu.matmul %106, %108, %cst_64 {dimension_numbers = #tpu.dot_dimension_numbers<[1], [0], [0], [1], [0, 0, 1, 1], [], []>} : vector<8x128xf32>, vector<128x128xf32>, vector<8x128xf32> -> vector<8x128xf32>
    %110 = arith.addf %105, %109 : vector<8x128xf32>
    %111 = vector.extract_strided_slice %14 {offsets = [152, 0], sizes = [8, 128], strides = [1, 1]} : vector<200x128xf32> to vector<8x128xf32>
    %c19 = arith.constant 19 : index
    %c0_65 = arith.constant 0 : index
    %c0_66 = arith.constant 0 : index
    %112 = vector.load %arg3[%c19, %c0_65, %c0_66] : memref<25x128x128xf32, #tpu.memory_space<vmem>>, vector<1x128x128xf32>
    %113 = vector.shape_cast %112 : vector<1x128x128xf32> to vector<128x128xf32>
    %cst_67 = arith.constant dense<0.000000e+00> : vector<8x128xf32>
    %114 = tpu.matmul %111, %113, %cst_67 {dimension_numbers = #tpu.dot_dimension_numbers<[1], [0], [0], [1], [0, 0, 1, 1], [], []>} : vector<8x128xf32>, vector<128x128xf32>, vector<8x128xf32> -> vector<8x128xf32>
    %115 = arith.addf %110, %114 : vector<8x128xf32>
    %116 = vector.extract_strided_slice %14 {offsets = [160, 0], sizes = [8, 128], strides = [1, 1]} : vector<200x128xf32> to vector<8x128xf32>
    %c20 = arith.constant 20 : index
    %c0_68 = arith.constant 0 : index
    %c0_69 = arith.constant 0 : index
    %117 = vector.load %arg3[%c20, %c0_68, %c0_69] : memref<25x128x128xf32, #tpu.memory_space<vmem>>, vector<1x128x128xf32>
    %118 = vector.shape_cast %117 : vector<1x128x128xf32> to vector<128x128xf32>
    %cst_70 = arith.constant dense<0.000000e+00> : vector<8x128xf32>
    %119 = tpu.matmul %116, %118, %cst_70 {dimension_numbers = #tpu.dot_dimension_numbers<[1], [0], [0], [1], [0, 0, 1, 1], [], []>} : vector<8x128xf32>, vector<128x128xf32>, vector<8x128xf32> -> vector<8x128xf32>
    %120 = arith.addf %115, %119 : vector<8x128xf32>
    %121 = vector.extract_strided_slice %14 {offsets = [168, 0], sizes = [8, 128], strides = [1, 1]} : vector<200x128xf32> to vector<8x128xf32>
    %c21 = arith.constant 21 : index
    %c0_71 = arith.constant 0 : index
    %c0_72 = arith.constant 0 : index
    %122 = vector.load %arg3[%c21, %c0_71, %c0_72] : memref<25x128x128xf32, #tpu.memory_space<vmem>>, vector<1x128x128xf32>
    %123 = vector.shape_cast %122 : vector<1x128x128xf32> to vector<128x128xf32>
    %cst_73 = arith.constant dense<0.000000e+00> : vector<8x128xf32>
    %124 = tpu.matmul %121, %123, %cst_73 {dimension_numbers = #tpu.dot_dimension_numbers<[1], [0], [0], [1], [0, 0, 1, 1], [], []>} : vector<8x128xf32>, vector<128x128xf32>, vector<8x128xf32> -> vector<8x128xf32>
    %125 = arith.addf %120, %124 : vector<8x128xf32>
    %126 = vector.extract_strided_slice %14 {offsets = [176, 0], sizes = [8, 128], strides = [1, 1]} : vector<200x128xf32> to vector<8x128xf32>
    %c22 = arith.constant 22 : index
    %c0_74 = arith.constant 0 : index
    %c0_75 = arith.constant 0 : index
    %127 = vector.load %arg3[%c22, %c0_74, %c0_75] : memref<25x128x128xf32, #tpu.memory_space<vmem>>, vector<1x128x128xf32>
    %128 = vector.shape_cast %127 : vector<1x128x128xf32> to vector<128x128xf32>
    %cst_76 = arith.constant dense<0.000000e+00> : vector<8x128xf32>
    %129 = tpu.matmul %126, %128, %cst_76 {dimension_numbers = #tpu.dot_dimension_numbers<[1], [0], [0], [1], [0, 0, 1, 1], [], []>} : vector<8x128xf32>, vector<128x128xf32>, vector<8x128xf32> -> vector<8x128xf32>
    %130 = arith.addf %125, %129 : vector<8x128xf32>
    %131 = vector.extract_strided_slice %14 {offsets = [184, 0], sizes = [8, 128], strides = [1, 1]} : vector<200x128xf32> to vector<8x128xf32>
    %c23 = arith.constant 23 : index
    %c0_77 = arith.constant 0 : index
    %c0_78 = arith.constant 0 : index
    %132 = vector.load %arg3[%c23, %c0_77, %c0_78] : memref<25x128x128xf32, #tpu.memory_space<vmem>>, vector<1x128x128xf32>
    %133 = vector.shape_cast %132 : vector<1x128x128xf32> to vector<128x128xf32>
    %cst_79 = arith.constant dense<0.000000e+00> : vector<8x128xf32>
    %134 = tpu.matmul %131, %133, %cst_79 {dimension_numbers = #tpu.dot_dimension_numbers<[1], [0], [0], [1], [0, 0, 1, 1], [], []>} : vector<8x128xf32>, vector<128x128xf32>, vector<8x128xf32> -> vector<8x128xf32>
    %135 = arith.addf %130, %134 : vector<8x128xf32>
    %136 = vector.extract_strided_slice %14 {offsets = [192, 0], sizes = [8, 128], strides = [1, 1]} : vector<200x128xf32> to vector<8x128xf32>
    %c24 = arith.constant 24 : index
    %c0_80 = arith.constant 0 : index
    %c0_81 = arith.constant 0 : index
    %137 = vector.load %arg3[%c24, %c0_80, %c0_81] : memref<25x128x128xf32, #tpu.memory_space<vmem>>, vector<1x128x128xf32>
    %138 = vector.shape_cast %137 : vector<1x128x128xf32> to vector<128x128xf32>
    %cst_82 = arith.constant dense<0.000000e+00> : vector<8x128xf32>
    %139 = tpu.matmul %136, %138, %cst_82 {dimension_numbers = #tpu.dot_dimension_numbers<[1], [0], [0], [1], [0, 0, 1, 1], [], []>} : vector<8x128xf32>, vector<128x128xf32>, vector<8x128xf32> -> vector<8x128xf32>
    %140 = arith.addf %135, %139 : vector<8x128xf32>
    %c0_83 = arith.constant 0 : index
    %c0_84 = arith.constant 0 : index
    %141 = vector.load %arg4[%c0_83, %c0_84] : memref<1x128xf32, #tpu.memory_space<vmem>>, vector<1x128xf32>
    %142 = vector.broadcast %141 : vector<1x128xf32> to vector<8x128xf32>
    %143 = arith.addf %140, %142 : vector<8x128xf32>
    %cst_85 = arith.constant 0.000000e+00 : f32
    %144 = vector.broadcast %cst_85 : f32 to vector<8x128xf32>
    %145 = arith.maximumf %143, %144 : vector<8x128xf32>
    %c0_86 = arith.constant 0 : index
    %c0_87 = arith.constant 0 : index
    %146 = vector.load %arg5[%c0_86, %c0_87] : memref<128x128xf32, #tpu.memory_space<vmem>>, vector<128x128xf32>
    %cst_88 = arith.constant dense<0.000000e+00> : vector<8x128xf32>
    %147 = tpu.matmul %145, %146, %cst_88 {dimension_numbers = #tpu.dot_dimension_numbers<[1], [0], [0], [1], [0, 0, 1, 1], [], []>} : vector<8x128xf32>, vector<128x128xf32>, vector<8x128xf32> -> vector<8x128xf32>
    %c0_89 = arith.constant 0 : index
    %c0_90 = arith.constant 0 : index
    %148 = vector.load %arg6[%c0_89, %c0_90] : memref<1x128xf32, #tpu.memory_space<vmem>>, vector<1x128xf32>
    %149 = vector.broadcast %148 : vector<1x128xf32> to vector<8x128xf32>
    %150 = arith.addf %147, %149 : vector<8x128xf32>
    %cst_91 = arith.constant 0.000000e+00 : f32
    %151 = vector.broadcast %cst_91 : f32 to vector<8x128xf32>
    %152 = arith.maximumf %150, %151 : vector<8x128xf32>
    %c0_92 = arith.constant 0 : index
    %c0_93 = arith.constant 0 : index
    %153 = vector.load %arg7[%c0_92, %c0_93] : memref<128x128xf32, #tpu.memory_space<vmem>>, vector<128x128xf32>
    %cst_94 = arith.constant dense<0.000000e+00> : vector<8x128xf32>
    %154 = tpu.matmul %152, %153, %cst_94 {dimension_numbers = #tpu.dot_dimension_numbers<[1], [0], [0], [1], [0, 0, 1, 1], [], []>} : vector<8x128xf32>, vector<128x128xf32>, vector<8x128xf32> -> vector<8x128xf32>
    %c0_95 = arith.constant 0 : index
    %c0_96 = arith.constant 0 : index
    %155 = vector.load %arg8[%c0_95, %c0_96] : memref<1x128xf32, #tpu.memory_space<vmem>>, vector<1x128xf32>
    %156 = vector.broadcast %155 : vector<1x128xf32> to vector<8x128xf32>
    %157 = arith.addf %154, %156 : vector<8x128xf32>
    %c0_97 = arith.constant 0 : index
    %c0_98 = arith.constant 0 : index
    %158 = vector.load %arg9[%c0_97, %c0_98] : memref<8x128xf32, #tpu.memory_space<vmem>>, vector<8x128xf32>
    tpu.vector_store %arg9[%c0_97, %c0_98], %157 {strides = array<i32>} : memref<8x128xf32, #tpu.memory_space<vmem>>, vector<8x128xf32>,
    return
  }
}

</mosaic_0001>

<bundles_post_ra>
// kernel: convnet_forward.2
= control target key start
LH: loop header
LB: loop body
LE: loop exit
PB: predicated region body
PF: predicated region fallthrough
CT: control target
= control target key end

     0   :  { %s4039_s1 = inlined_call_operand.vmem [shape: f32[128,128], index: 1, kind: input, shape index: {}]   ;;  %s4040_s0 = inlined_call_operand.vmem [shape: f32[1568,128], index: 0, kind: input, shape index: {}]   ;;  %s4041_s2 = inlined_call_operand.vmem [shape: f32[1,128], index: 2, kind: input, shape index: {}]   ;;  %s4042_s3 = inlined_call_operand.vmem [shape: f32[392,128], index: 3, kind: output, shape index: {}]  }
   0x1   :  { %v210_v0 = vld [vmem:[%s4039_s1] sm:$0xff]  ;;  %v211_v1 = vld [vmem:[%s4039_s1 + $0x8] sm:$0xff]  ;;  %v212_v2 = vld [vmem:[%s4039_s1 + $0x10] sm:$0xff] }
   0x2   :  { %v2213_v3 = vpack.c.bf16 %v211_v1, %v210_v0  ;;  %v213_v4 = vld [vmem:[%s4039_s1 + $0x18] sm:$0xff]  ;;  %v214_v6 = vld [vmem:[%s4039_s1 + $0x20] sm:$0xff]  ;;  %v215_v7 = vld [vmem:[%s4039_s1 + $0x28] sm:$0xff] }
   0x3   :  { %v2217_v5 = vpack.c.bf16 %v213_v4, %v212_v2  ;;  %v2221_v8 = vpack.c.bf16 %v215_v7, %v214_v6  ;;  %v14_v9 = vld [vmem:[%s4040_s0] sm:$0xff]  ;;  %v112_v10 = vld [vmem:[%s4040_s0 + $0x310] sm:$0xff]  ;;  %v217_v12 = vld [vmem:[%s4039_s1 + $0x38] sm:$0xff] }
   0x4   :  { %2214 = vmatprep.subr.bf16.mxu0 %v2213_v3  ;;  %2245 = vmatprep.subr.bf16.mxu1 %v2213_v3  ;;  %v216_v11 = vld [vmem:[%s4039_s1 + $0x30] sm:$0xff]  ;;  %v218_v14 = vld [vmem:[%s4039_s1 + $0x40] sm:$0xff]  ;;  %v219_v15 = vld [vmem:[%s4039_s1 + $0x48] sm:$0xff] }
   0x5   :  { %2216 = vmatpush3.bf16.msra.mxu0 %v2213_v3  ;;  %2253 = vmatpush3.bf16.msra.mxu1 %v2213_v3  ;;  %v2225_v13 = vpack.c.bf16 %v217_v12, %v216_v11  ;;  %v2229_v16 = vpack.c.bf16 %v219_v15, %v218_v14  ;;  %v220_v17 = vld [vmem:[%s4039_s1 + $0x50] sm:$0xff]  ;;  %v221_v18 = vld [vmem:[%s4039_s1 + $0x58] sm:$0xff]  ;;  %v222_v20 = vld [vmem:[%s4039_s1 + $0x60] sm:$0xff] }
   0x6   :  { %2218 = vmatprep.subr.bf16.mxu0 %v2217_v5  ;;  %2246 = vmatprep.subr.bf16.mxu1 %v2217_v5  ;;  %v2233_v19 = vpack.c.bf16 %v221_v18, %v220_v17  ;;  %v223_v21 = vld [vmem:[%s4039_s1 + $0x68] sm:$0xff]  ;;  %v224_v23 = vld [vmem:[%s4039_s1 + $0x70] sm:$0xff]  ;;  %v225_v24 = vld [vmem:[%s4039_s1 + $0x78] sm:$0xff] }
   0x7   :  { %1919 = vmatprep.mubr.f32.mxu0 %v14_v9  ;;  %2066 = vmatprep.mubr.f32.mxu1 %v112_v10  ;;  %v2237_v22 = vpack.c.bf16 %v223_v21, %v222_v20  ;;  %v2241_v25 = vpack.c.bf16 %v225_v24, %v224_v23  ;;  %v15_v26 = vld [vmem:[%s4040_s0 + $0x8] sm:$0xff]  ;;  %v113_v27 = vld [vmem:[%s4040_s0 + $0x318] sm:$0xff]  ;;  %v16_v28 = vld [vmem:[%s4040_s0 + $0x10] sm:$0xff] }
   0x8   :  { %v114_v29 = vld [vmem:[%s4040_s0 + $0x320] sm:$0xff]  ;;  %v17_v30 = vld [vmem:[%s4040_s0 + $0x18] sm:$0xff]  ;;  %v115_v31 = vld [vmem:[%s4040_s0 + $0x328] sm:$0xff] }
   0x9   :  { %2220 = vmatpush3.bf16.msra.mxu0 %v2217_v5  ;;  %2254 = vmatpush3.bf16.msra.mxu1 %v2217_v5  ;;  %v18_v32 = vld [vmem:[%s4040_s0 + $0x20] sm:$0xff]  ;;  %v116_v33 = vld [vmem:[%s4040_s0 + $0x330] sm:$0xff]  ;;  %v19_v34 = vld [vmem:[%s4040_s0 + $0x28] sm:$0xff] }
   0xa   :  { %2222 = vmatprep.subr.bf16.mxu0 %v2221_v8  ;;  %2247 = vmatprep.subr.bf16.mxu1 %v2221_v8  ;;  %v117_v35 = vld [vmem:[%s4040_s0 + $0x338] sm:$0xff]  ;;  %v20_v36 = vld [vmem:[%s4040_s0 + $0x30] sm:$0xff]  ;;  %v118_v37 = vld [vmem:[%s4040_s0 + $0x340] sm:$0xff] }
   0xb   :  { %v21_v38 = vld [vmem:[%s4040_s0 + $0x38] sm:$0xff]  ;;  %v119_v39 = vld [vmem:[%s4040_s0 + $0x348] sm:$0xff]  ;;  %v22_v40 = vld [vmem:[%s4040_s0 + $0x40] sm:$0xff] }
   0xc   :  { %v120_v41 = vld [vmem:[%s4040_s0 + $0x350] sm:$0xff]  ;;  %v23_v42 = vld [vmem:[%s4040_s0 + $0x48] sm:$0xff]  ;;  %v121_v43 = vld [vmem:[%s4040_s0 + $0x358] sm:$0xff] }
   0xd   :  { %2224 = vmatpush3.bf16.msra.mxu0 %v2221_v8  ;;  %2255 = vmatpush3.bf16.msra.mxu1 %v2221_v8  ;;  %v24_v44 = vld [vmem:[%s4040_s0 + $0x50] sm:$0xff]  ;;  %v122_v45 = vld [vmem:[%s4040_s0 + $0x360] sm:$0xff]  ;;  %v25_v46 = vld [vmem:[%s4040_s0 + $0x58] sm:$0xff] }
   0xe   :  { %2226 = vmatprep.subr.bf16.mxu0 %v2225_v13  ;;  %2248 = vmatprep.subr.bf16.mxu1 %v2225_v13  ;;  %v123_v47 = vld [vmem:[%s4040_s0 + $0x368] sm:$0xff]  ;;  %v26_v48 = vld [vmem:[%s4040_s0 + $0x60] sm:$0xff]  ;;  %v124_v49 = vld [vmem:[%s4040_s0 + $0x370] sm:$0xff] }
   0xf   :  { %v27_v50 = vld [vmem:[%s4040_s0 + $0x68] sm:$0xff]  ;;  %v125_v51 = vld [vmem:[%s4040_s0 + $0x378] sm:$0xff]  ;;  %v28_v52 = vld [vmem:[%s4040_s0 + $0x70] sm:$0xff] }
  0x10   :  { %v126_v53 = vld [vmem:[%s4040_s0 + $0x380] sm:$0xff]  ;;  %v29_v54 = vld [vmem:[%s4040_s0 + $0x78] sm:$0xff]  ;;  %v127_v55 = vld [vmem:[%s4040_s0 + $0x388] sm:$0xff] }
  0x11   :  { %2228 = vmatpush3.bf16.msra.mxu0 %v2225_v13  ;;  %2256 = vmatpush3.bf16.msra.mxu1 %v2225_v13  ;;  %v30_v56 = vld [vmem:[%s4040_s0 + $0x80] sm:$0xff]  ;;  %v128_v57 = vld [vmem:[%s4040_s0 + $0x390] sm:$0xff]  ;;  %v31_v58 = vld [vmem:[%s4040_s0 + $0x88] sm:$0xff] }
  0x12   :  { %2230 = vmatprep.subr.bf16.mxu0 %v2229_v16  ;;  %2249 = vmatprep.subr.bf16.mxu1 %v2229_v16  ;;  %v129_v59 = vld [vmem:[%s4040_s0 + $0x398] sm:$0xff]  ;;  %v32_v60 = vld [vmem:[%s4040_s0 + $0x90] sm:$0xff]  ;;  %v130_v61 = vld [vmem:[%s4040_s0 + $0x3a0] sm:$0xff] }
  0x13   :  { %v33_v62 = vld [vmem:[%s4040_s0 + $0x98] sm:$0xff]  ;;  %v131_v63 = vld [vmem:[%s4040_s0 + $0x3a8] sm:$0xff]  ;;  %v34_v0 = vld [vmem:[%s4040_s0 + $0xa0] sm:$0xff] }
  0x14   :  { %v132_v1 = vld [vmem:[%s4040_s0 + $0x3b0] sm:$0xff]  ;;  %v35_v2 = vld [vmem:[%s4040_s0 + $0xa8] sm:$0xff]  ;;  %v133_v3 = vld [vmem:[%s4040_s0 + $0x3b8] sm:$0xff] }
  0x15   :  { %2232 = vmatpush3.bf16.msra.mxu0 %v2229_v16  ;;  %2257 = vmatpush3.bf16.msra.mxu1 %v2229_v16  ;;  %v36_v4 = vld [vmem:[%s4040_s0 + $0xb0] sm:$0xff]  ;;  %v134_v5 = vld [vmem:[%s4040_s0 + $0x3c0] sm:$0xff]  ;;  %v37_v6 = vld [vmem:[%s4040_s0 + $0xb8] sm:$0xff] }
  0x16   :  { %2234 = vmatprep.subr.bf16.mxu0 %v2233_v19  ;;  %2250 = vmatprep.subr.bf16.mxu1 %v2233_v19  ;;  %v135_v7 = vld [vmem:[%s4040_s0 + $0x3c8] sm:$0xff]  ;;  %v38_v8 = vld [vmem:[%s4040_s0 + $0xc0] sm:$0xff]  ;;  %v136_v9 = vld [vmem:[%s4040_s0 + $0x3d0] sm:$0xff] }
  0x17   :  { %v39_v10 = vld [vmem:[%s4040_s0 + $0xc8] sm:$0xff]  ;;  %v137_v11 = vld [vmem:[%s4040_s0 + $0x3d8] sm:$0xff]  ;;  %v40_v12 = vld [vmem:[%s4040_s0 + $0xd0] sm:$0xff] }
  0x18   :  { %v138_v13 = vld [vmem:[%s4040_s0 + $0x3e0] sm:$0xff]  ;;  %v41_v14 = vld [vmem:[%s4040_s0 + $0xd8] sm:$0xff]  ;;  %v139_v15 = vld [vmem:[%s4040_s0 + $0x3e8] sm:$0xff] }
  0x19   :  { %2236 = vmatpush3.bf16.msra.mxu0 %v2233_v19  ;;  %2258 = vmatpush3.bf16.msra.mxu1 %v2233_v19  ;;  %v42_v16 = vld [vmem:[%s4040_s0 + $0xe0] sm:$0xff]  ;;  %v140_v17 = vld [vmem:[%s4040_s0 + $0x3f0] sm:$0xff]  ;;  %v43_v18 = vld [vmem:[%s4040_s0 + $0xe8] sm:$0xff] }
  0x1a   :  { %2238 = vmatprep.subr.bf16.mxu0 %v2237_v22  ;;  %2251 = vmatprep.subr.bf16.mxu1 %v2237_v22  ;;  %v141_v19 = vld [vmem:[%s4040_s0 + $0x3f8] sm:$0xff]  ;;  %v44_v20 = vld [vmem:[%s4040_s0 + $0xf0] sm:$0xff]  ;;  %v142_v21 = vld [vmem:[%s4040_s0 + $0x400] sm:$0xff] }
  0x1b   :  { %v143_v23 = vld [vmem:[%s4040_s0 + $0x408] sm:$0xff]  ;;  %v46_v24 = vld [vmem:[%s4040_s0 + $0x100] sm:$0xff] }
  0x1d   :  { %2240 = vmatpush3.bf16.msra.mxu0 %v2237_v22  ;;  %2259 = vmatpush3.bf16.msra.mxu1 %v2237_v22  ;;  %v45_v22 = vld [vmem:[%s4040_s0 + $0xf8] sm:$0xff] }
  0x1e   :  { %2242 = vmatprep.subr.bf16.mxu0 %v2241_v25  ;;  %2252 = vmatprep.subr.bf16.mxu1 %v2241_v25 }
  0x21   :  { %2244 = vmatpush3.bf16.msra.mxu0 %v2241_v25  ;;  %2260 = vmatpush3.bf16.msra.mxu1 %v2241_v25  ;;  %v144_v25 = vld [vmem:[%s4040_s0 + $0x410] sm:$0xff] }
  0x24   :  { %1920 = vmatmul.mubr.f32.vlgmr.msra.gmra.mrb[0].mxu0 %v15_v26  ;;  %2067 = vmatmul.mubr.f32.vlgmr.msra.gmra.mrb[0].mxu1 %v113_v27  ;;  %v47_v26 = vld [vmem:[%s4040_s0 + $0x108] sm:$0xff]  ;;  %v145_v27 = vld [vmem:[%s4040_s0 + $0x418] sm:$0xff] }
  0x25   :  { %1922 = vmatprep.mubr.f32.mxu0 %v16_v28  ;;  %2069 = vmatprep.mubr.f32.mxu1 %v114_v29  ;;  %v48_v28 = vld [vmem:[%s4040_s0 + $0x110] sm:$0xff]  ;;  %v146_v29 = vld [vmem:[%s4040_s0 + $0x420] sm:$0xff] }
  0x28   :  { %1923 = vmatmul.mubr.f32.gmra.mrb[2].mxu0 %v17_v30  ;;  %2070 = vmatmul.mubr.f32.gmra.mrb[2].mxu1 %v115_v31  ;;  %v49_v30 = vld [vmem:[%s4040_s0 + $0x118] sm:$0xff]  ;;  %v147_v31 = vld [vmem:[%s4040_s0 + $0x428] sm:$0xff] }
  0x29   :  { %1925 = vmatprep.mubr.f32.mxu0 %v18_v32  ;;  %2072 = vmatprep.mubr.f32.mxu1 %v116_v33  ;;  %v50_v32 = vld [vmem:[%s4040_s0 + $0x120] sm:$0xff]  ;;  %v148_v33 = vld [vmem:[%s4040_s0 + $0x430] sm:$0xff] }
  0x2c   :  { %1926 = vmatmul.mubr.f32.gmra.mrb[4].mxu0 %v19_v34  ;;  %2073 = vmatmul.mubr.f32.gmra.mrb[4].mxu1 %v117_v35  ;;  %v51_v34 = vld [vmem:[%s4040_s0 + $0x128] sm:$0xff]  ;;  %v149_v35 = vld [vmem:[%s4040_s0 + $0x438] sm:$0xff] }
  0x2d   :  { %1928 = vmatprep.mubr.f32.mxu0 %v20_v36  ;;  %2075 = vmatprep.mubr.f32.mxu1 %v118_v37  ;;  %v52_v36 = vld [vmem:[%s4040_s0 + $0x130] sm:$0xff]  ;;  %v150_v37 = vld [vmem:[%s4040_s0 + $0x440] sm:$0xff] }
  0x30   :  { %1929 = vmatmul.mubr.f32.gmra.mrb[6].mxu0 %v21_v38  ;;  %2076 = vmatmul.mubr.f32.gmra.mrb[6].mxu1 %v119_v39  ;;  %v53_v38 = vld [vmem:[%s4040_s0 + $0x138] sm:$0xff]  ;;  %v151_v39 = vld [vmem:[%s4040_s0 + $0x448] sm:$0xff] }
  0x31   :  { %1931 = vmatprep.mubr.f32.mxu0 %v22_v40  ;;  %2078 = vmatprep.mubr.f32.mxu1 %v120_v41  ;;  %v54_v40 = vld [vmem:[%s4040_s0 + $0x140] sm:$0xff]  ;;  %v152_v41 = vld [vmem:[%s4040_s0 + $0x450] sm:$0xff] }
  0x34   :  { %1932 = vmatmul.mubr.f32.gmra.mrb[8].mxu0 %v23_v42  ;;  %2079 = vmatmul.mubr.f32.gmra.mrb[8].mxu1 %v121_v43  ;;  %v55_v42 = vld [vmem:[%s4040_s0 + $0x148] sm:$0xff]  ;;  %v153_v43 = vld [vmem:[%s4040_s0 + $0x458] sm:$0xff] }
  0x35   :  { %1934 = vmatprep.mubr.f32.mxu0 %v24_v44  ;;  %2081 = vmatprep.mubr.f32.mxu1 %v122_v45  ;;  %v56_v44 = vld [vmem:[%s4040_s0 + $0x150] sm:$0xff]  ;;  %v154_v45 = vld [vmem:[%s4040_s0 + $0x460] sm:$0xff] }
  0x38   :  { %1935 = vmatmul.mubr.f32.gmra.mrb[10].mxu0 %v25_v46  ;;  %2082 = vmatmul.mubr.f32.gmra.mrb[10].mxu1 %v123_v47  ;;  %v57_v46 = vld [vmem:[%s4040_s0 + $0x158] sm:$0xff]  ;;  %v155_v47 = vld [vmem:[%s4040_s0 + $0x468] sm:$0xff] }
  0x39   :  { %1937 = vmatprep.mubr.f32.mxu0 %v26_v48  ;;  %2084 = vmatprep.mubr.f32.mxu1 %v124_v49  ;;  %v58_v48 = vld [vmem:[%s4040_s0 + $0x160] sm:$0xff]  ;;  %v156_v49 = vld [vmem:[%s4040_s0 + $0x470] sm:$0xff] }
  0x3c   :  { %1938 = vmatmul.mubr.f32.gmra.mrb[12].mxu0 %v27_v50  ;;  %2085 = vmatmul.mubr.f32.gmra.mrb[12].mxu1 %v125_v51  ;;  %v59_v50 = vld [vmem:[%s4040_s0 + $0x168] sm:$0xff]  ;;  %v157_v51 = vld [vmem:[%s4040_s0 + $0x478] sm:$0xff] }
  0x3d   :  { %1940 = vmatprep.mubr.f32.mxu0 %v28_v52  ;;  %2087 = vmatprep.mubr.f32.mxu1 %v126_v53  ;;  %v60_v52 = vld [vmem:[%s4040_s0 + $0x170] sm:$0xff]  ;;  %v158_v53 = vld [vmem:[%s4040_s0 + $0x480] sm:$0xff] }
  0x40   :  { %1941 = vmatmul.mubr.f32.gmra.mrb[14].mxu0 %v29_v54  ;;  %2088 = vmatmul.mubr.f32.gmra.mrb[14].mxu1 %v127_v55  ;;  %v61_v54 = vld [vmem:[%s4040_s0 + $0x178] sm:$0xff]  ;;  %v159_v55 = vld [vmem:[%s4040_s0 + $0x488] sm:$0xff] }
  0x41   :  { %1943 = vmatprep.mubr.f32.mxu0 %v30_v56  ;;  %2090 = vmatprep.mubr.f32.mxu1 %v128_v57  ;;  %v62_v56 = vld [vmem:[%s4040_s0 + $0x180] sm:$0xff]  ;;  %v160_v57 = vld [vmem:[%s4040_s0 + $0x490] sm:$0xff] }
  0x44   :  { %1944 = vmatmul.mubr.f32.gmra.mrb[16].mxu0 %v31_v58  ;;  %2091 = vmatmul.mubr.f32.gmra.mrb[16].mxu1 %v129_v59  ;;  %v63_v58 = vld [vmem:[%s4040_s0 + $0x188] sm:$0xff]  ;;  %v161_v59 = vld [vmem:[%s4040_s0 + $0x498] sm:$0xff] }
  0x45   :  { %1946 = vmatprep.mubr.f32.mxu0 %v32_v60  ;;  %2093 = vmatprep.mubr.f32.mxu1 %v130_v61  ;;  %v64_v60 = vld [vmem:[%s4040_s0 + $0x190] sm:$0xff]  ;;  %v162_v61 = vld [vmem:[%s4040_s0 + $0x4a0] sm:$0xff] }
  0x48   :  { %1947 = vmatmul.mubr.f32.gmra.mrb[18].mxu0 %v33_v62  ;;  %2094 = vmatmul.mubr.f32.gmra.mrb[18].mxu1 %v131_v63  ;;  %v65_v62 = vld [vmem:[%s4040_s0 + $0x198] sm:$0xff]  ;;  %v163_v63 = vld [vmem:[%s4040_s0 + $0x4a8] sm:$0xff] }
  0x49   :  { %1949 = vmatprep.mubr.f32.mxu0 %v34_v0  ;;  %2096 = vmatprep.mubr.f32.mxu1 %v132_v1  ;;  %v66_v0 = vld [vmem:[%s4040_s0 + $0x1a0] sm:$0xff]  ;;  %v164_v1 = vld [vmem:[%s4040_s0 + $0x4b0] sm:$0xff] }
  0x4c   :  { %1950 = vmatmul.mubr.f32.gmra.mrb[20].mxu0 %v35_v2  ;;  %2097 = vmatmul.mubr.f32.gmra.mrb[20].mxu1 %v133_v3  ;;  %v67_v2 = vld [vmem:[%s4040_s0 + $0x1a8] sm:$0xff]  ;;  %v165_v3 = vld [vmem:[%s4040_s0 + $0x4b8] sm:$0xff] }
  0x4d   :  { %1952 = vmatprep.mubr.f32.mxu0 %v36_v4  ;;  %2099 = vmatprep.mubr.f32.mxu1 %v134_v5  ;;  %v68_v4 = vld [vmem:[%s4040_s0 + $0x1b0] sm:$0xff]  ;;  %v166_v5 = vld [vmem:[%s4040_s0 + $0x4c0] sm:$0xff] }
  0x50   :  { %1953 = vmatmul.mubr.f32.gmra.mrb[22].mxu0 %v37_v6  ;;  %2100 = vmatmul.mubr.f32.gmra.mrb[22].mxu1 %v135_v7  ;;  %v69_v6 = vld [vmem:[%s4040_s0 + $0x1b8] sm:$0xff]  ;;  %v167_v7 = vld [vmem:[%s4040_s0 + $0x4c8] sm:$0xff] }
  0x51   :  { %1955 = vmatprep.mubr.f32.mxu0 %v38_v8  ;;  %2102 = vmatprep.mubr.f32.mxu1 %v136_v9  ;;  %v70_v8 = vld [vmem:[%s4040_s0 + $0x1c0] sm:$0xff]  ;;  %v168_v9 = vld [vmem:[%s4040_s0 + $0x4d0] sm:$0xff] }
  0x54   :  { %1956 = vmatmul.mubr.f32.gmra.mrb[24].mxu0 %v39_v10  ;;  %2103 = vmatmul.mubr.f32.gmra.mrb[24].mxu1 %v137_v11  ;;  %v71_v10 = vld [vmem:[%s4040_s0 + $0x1c8] sm:$0xff]  ;;  %v169_v11 = vld [vmem:[%s4040_s0 + $0x4d8] sm:$0xff] }
  0x55   :  { %1958 = vmatprep.mubr.f32.mxu0 %v40_v12  ;;  %2105 = vmatprep.mubr.f32.mxu1 %v138_v13  ;;  %v72_v12 = vld [vmem:[%s4040_s0 + $0x1d0] sm:$0xff]  ;;  %v170_v13 = vld [vmem:[%s4040_s0 + $0x4e0] sm:$0xff] }
  0x58   :  { %1959 = vmatmul.mubr.f32.gmra.mrb[26].mxu0 %v41_v14  ;;  %2106 = vmatmul.mubr.f32.gmra.mrb[26].mxu1 %v139_v15  ;;  %v73_v14 = vld [vmem:[%s4040_s0 + $0x1d8] sm:$0xff]  ;;  %v171_v15 = vld [vmem:[%s4040_s0 + $0x4e8] sm:$0xff] }
  0x59   :  { %1961 = vmatprep.mubr.f32.mxu0 %v42_v16  ;;  %2108 = vmatprep.mubr.f32.mxu1 %v140_v17  ;;  %v74_v16 = vld [vmem:[%s4040_s0 + $0x1e0] sm:$0xff]  ;;  %v172_v17 = vld [vmem:[%s4040_s0 + $0x4f0] sm:$0xff] }
  0x5c   :  { %1962 = vmatmul.mubr.f32.gmra.mrb[28].mxu0 %v43_v18  ;;  %2109 = vmatmul.mubr.f32.gmra.mrb[28].mxu1 %v141_v19  ;;  %v75_v18 = vld [vmem:[%s4040_s0 + $0x1e8] sm:$0xff]  ;;  %v173_v19 = vld [vmem:[%s4040_s0 + $0x4f8] sm:$0xff] }
  0x5d   :  { %1964 = vmatprep.mubr.f32.mxu0 %v44_v20  ;;  %2111 = vmatprep.mubr.f32.mxu1 %v142_v21  ;;  %v76_v20 = vld [vmem:[%s4040_s0 + $0x1f0] sm:$0xff]  ;;  %v174_v21 = vld [vmem:[%s4040_s0 + $0x500] sm:$0xff] }
  0x60   :  { %1965 = vmatmul.mubr.f32.gmra.mrb[30].mxu0 %v45_v22  ;;  %2112 = vmatmul.mubr.f32.gmra.mrb[30].mxu1 %v143_v23  ;;  %v77_v22 = vld [vmem:[%s4040_s0 + $0x1f8] sm:$0xff]  ;;  %v175_v23 = vld [vmem:[%s4040_s0 + $0x508] sm:$0xff] }
  0x61   :  { %1967 = vmatprep.mubr.f32.mxu0 %v46_v24  ;;  %2114 = vmatprep.mubr.f32.mxu1 %v144_v25  ;;  %v78_v24 = vld [vmem:[%s4040_s0 + $0x200] sm:$0xff]  ;;  %v176_v25 = vld [vmem:[%s4040_s0 + $0x510] sm:$0xff] }
  0x64   :  { %1968 = vmatmul.mubr.f32.gmra.mrb[32].mxu0 %v47_v26  ;;  %2115 = vmatmul.mubr.f32.gmra.mrb[32].mxu1 %v145_v27  ;;  %v79_v26 = vld [vmem:[%s4040_s0 + $0x208] sm:$0xff]  ;;  %v177_v27 = vld [vmem:[%s4040_s0 + $0x518] sm:$0xff] }
  0x65   :  { %1970 = vmatprep.mubr.f32.mxu0 %v48_v28  ;;  %2117 = vmatprep.mubr.f32.mxu1 %v146_v29  ;;  %v80_v28 = vld [vmem:[%s4040_s0 + $0x210] sm:$0xff]  ;;  %v178_v29 = vld [vmem:[%s4040_s0 + $0x520] sm:$0xff] }
  0x68   :  { %1971 = vmatmul.mubr.f32.gmra.mrb[34].mxu0 %v49_v30  ;;  %2118 = vmatmul.mubr.f32.gmra.mrb[34].mxu1 %v147_v31  ;;  %v81_v30 = vld [vmem:[%s4040_s0 + $0x218] sm:$0xff]  ;;  %v179_v31 = vld [vmem:[%s4040_s0 + $0x528] sm:$0xff] }
  0x69   :  { %1973 = vmatprep.mubr.f32.mxu0 %v50_v32  ;;  %2120 = vmatprep.mubr.f32.mxu1 %v148_v33  ;;  %v82_v32 = vld [vmem:[%s4040_s0 + $0x220] sm:$0xff]  ;;  %v180_v33 = vld [vmem:[%s4040_s0 + $0x530] sm:$0xff] }
  0x6c   :  { %1974 = vmatmul.mubr.f32.gmra.mrb[36].mxu0 %v51_v34  ;;  %2121 = vmatmul.mubr.f32.gmra.mrb[36].mxu1 %v149_v35  ;;  %v83_v34 = vld [vmem:[%s4040_s0 + $0x228] sm:$0xff]  ;;  %v181_v35 = vld [vmem:[%s4040_s0 + $0x538] sm:$0xff] }
  0x6d   :  { %1976 = vmatprep.mubr.f32.mxu0 %v52_v36  ;;  %2123 = vmatprep.mubr.f32.mxu1 %v150_v37  ;;  %v84_v36 = vld [vmem:[%s4040_s0 + $0x230] sm:$0xff]  ;;  %v182_v37 = vld [vmem:[%s4040_s0 + $0x540] sm:$0xff] }
  0x70   :  { %1977 = vmatmul.mubr.f32.gmra.mrb[38].mxu0 %v53_v38  ;;  %2124 = vmatmul.mubr.f32.gmra.mrb[38].mxu1 %v151_v39  ;;  %v85_v38 = vld [vmem:[%s4040_s0 + $0x238] sm:$0xff]  ;;  %v183_v39 = vld [vmem:[%s4040_s0 + $0x548] sm:$0xff] }
  0x71   :  { %1979 = vmatprep.mubr.f32.mxu0 %v54_v40  ;;  %2126 = vmatprep.mubr.f32.mxu1 %v152_v41  ;;  %v86_v40 = vld [vmem:[%s4040_s0 + $0x240] sm:$0xff]  ;;  %v184_v41 = vld [vmem:[%s4040_s0 + $0x550] sm:$0xff] }
  0x74   :  { %1980 = vmatmul.mubr.f32.gmra.mrb[40].mxu0 %v55_v42  ;;  %2127 = vmatmul.mubr.f32.gmra.mrb[40].mxu1 %v153_v43  ;;  %v87_v42 = vld [vmem:[%s4040_s0 + $0x248] sm:$0xff]  ;;  %v185_v43 = vld [vmem:[%s4040_s0 + $0x558] sm:$0xff] }
  0x75   :  { %1982 = vmatprep.mubr.f32.mxu0 %v56_v44  ;;  %2129 = vmatprep.mubr.f32.mxu1 %v154_v45  ;;  %v88_v44 = vld [vmem:[%s4040_s0 + $0x250] sm:$0xff]  ;;  %v186_v45 = vld [vmem:[%s4040_s0 + $0x560] sm:$0xff] }
  0x78   :  { %1983 = vmatmul.mubr.f32.gmra.mrb[42].mxu0 %v57_v46  ;;  %2130 = vmatmul.mubr.f32.gmra.mrb[42].mxu1 %v155_v47  ;;  %v89_v46 = vld [vmem:[%s4040_s0 + $0x258] sm:$0xff]  ;;  %v187_v47 = vld [vmem:[%s4040_s0 + $0x568] sm:$0xff] }
  0x79   :  { %1985 = vmatprep.mubr.f32.mxu0 %v58_v48  ;;  %2132 = vmatprep.mubr.f32.mxu1 %v156_v49  ;;  %v90_v48 = vld [vmem:[%s4040_s0 + $0x260] sm:$0xff]  ;;  %v188_v49 = vld [vmem:[%s4040_s0 + $0x570] sm:$0xff] }
  0x7c   :  { %1986 = vmatmul.mubr.f32.gmra.mrb[44].mxu0 %v59_v50  ;;  %2133 = vmatmul.mubr.f32.gmra.mrb[44].mxu1 %v157_v51  ;;  %v91_v50 = vld [vmem:[%s4040_s0 + $0x268] sm:$0xff]  ;;  %v189_v51 = vld [vmem:[%s4040_s0 + $0x578] sm:$0xff] }
  0x7d   :  { %1988 = vmatprep.mubr.f32.mxu0 %v60_v52  ;;  %2135 = vmatprep.mubr.f32.mxu1 %v158_v53  ;;  %v92_v52 = vld [vmem:[%s4040_s0 + $0x270] sm:$0xff]  ;;  %v190_v53 = vld [vmem:[%s4040_s0 + $0x580] sm:$0xff] }
  0x80   :  { %1989 = vmatmul.mubr.f32.gmra.mrb[46].mxu0 %v61_v54  ;;  %2136 = vmatmul.mubr.f32.gmra.mrb[46].mxu1 %v159_v55  ;;  %v93_v54 = vld [vmem:[%s4040_s0 + $0x278] sm:$0xff]  ;;  %v191_v55 = vld [vmem:[%s4040_s0 + $0x588] sm:$0xff] }
  0x81   :  { %1991 = vmatprep.mubr.f32.mxu0 %v62_v56  ;;  %2138 = vmatprep.mubr.f32.mxu1 %v160_v57  ;;  %v94_v56 = vld [vmem:[%s4040_s0 + $0x280] sm:$0xff]  ;;  %v192_v57 = vld [vmem:[%s4040_s0 + $0x590] sm:$0xff] }
  0x84   :  { %1992 = vmatmul.mubr.f32.gmra.mrb[48].mxu0 %v63_v58  ;;  %2139 = vmatmul.mubr.f32.gmra.mrb[48].mxu1 %v161_v59  ;;  %v95_v58 = vld [vmem:[%s4040_s0 + $0x288] sm:$0xff]  ;;  %v193_v59 = vld [vmem:[%s4040_s0 + $0x598] sm:$0xff] }
  0x85   :  { %1994 = vmatprep.mubr.f32.mxu0 %v64_v60  ;;  %2141 = vmatprep.mubr.f32.mxu1 %v162_v61  ;;  %v96_v60 = vld [vmem:[%s4040_s0 + $0x290] sm:$0xff]  ;;  %v194_v61 = vld [vmem:[%s4040_s0 + $0x5a0] sm:$0xff] }
  0x88   :  { %1995 = vmatmul.mubr.f32.gmra.mrb[50].mxu0 %v65_v62  ;;  %2142 = vmatmul.mubr.f32.gmra.mrb[50].mxu1 %v163_v63  ;;  %v97_v62 = vld [vmem:[%s4040_s0 + $0x298] sm:$0xff]  ;;  %v195_v63 = vld [vmem:[%s4040_s0 + $0x5a8] sm:$0xff] }
  0x89   :  { %1997 = vmatprep.mubr.f32.mxu0 %v66_v0  ;;  %2144 = vmatprep.mubr.f32.mxu1 %v164_v1  ;;  %v98_v0 = vld [vmem:[%s4040_s0 + $0x2a0] sm:$0xff]  ;;  %v196_v1 = vld [vmem:[%s4040_s0 + $0x5b0] sm:$0xff] }
  0x8c   :  { %1998 = vmatmul.mubr.f32.gmra.mrb[52].mxu0 %v67_v2  ;;  %2145 = vmatmul.mubr.f32.gmra.mrb[52].mxu1 %v165_v3  ;;  %v99_v2 = vld [vmem:[%s4040_s0 + $0x2a8] sm:$0xff]  ;;  %v197_v3 = vld [vmem:[%s4040_s0 + $0x5b8] sm:$0xff] }
  0x8d   :  { %2000 = vmatprep.mubr.f32.mxu0 %v68_v4  ;;  %2147 = vmatprep.mubr.f32.mxu1 %v166_v5  ;;  %v100_v4 = vld [vmem:[%s4040_s0 + $0x2b0] sm:$0xff]  ;;  %v198_v5 = vld [vmem:[%s4040_s0 + $0x5c0] sm:$0xff] }
  0x90   :  { %2001 = vmatmul.mubr.f32.gmra.mrb[54].mxu0 %v69_v6  ;;  %2148 = vmatmul.mubr.f32.gmra.mrb[54].mxu1 %v167_v7  ;;  %v101_v6 = vld [vmem:[%s4040_s0 + $0x2b8] sm:$0xff]  ;;  %v199_v7 = vld [vmem:[%s4040_s0 + $0x5c8] sm:$0xff] }
  0x91   :  { %2003 = vmatprep.mubr.f32.mxu0 %v70_v8  ;;  %2150 = vmatprep.mubr.f32.mxu1 %v168_v9  ;;  %v102_v8 = vld [vmem:[%s4040_s0 + $0x2c0] sm:$0xff]  ;;  %v200_v9 = vld [vmem:[%s4040_s0 + $0x5d0] sm:$0xff] }
  0x94   :  { %2004 = vmatmul.mubr.f32.gmra.mrb[56].mxu0 %v71_v10  ;;  %2151 = vmatmul.mubr.f32.gmra.mrb[56].mxu1 %v169_v11  ;;  %v103_v10 = vld [vmem:[%s4040_s0 + $0x2c8] sm:$0xff]  ;;  %v201_v11 = vld [vmem:[%s4040_s0 + $0x5d8] sm:$0xff] }
  0x95   :  { %2006 = vmatprep.mubr.f32.mxu0 %v72_v12  ;;  %2153 = vmatprep.mubr.f32.mxu1 %v170_v13  ;;  %v104_v12 = vld [vmem:[%s4040_s0 + $0x2d0] sm:$0xff]  ;;  %v202_v13 = vld [vmem:[%s4040_s0 + $0x5e0] sm:$0xff] }
  0x98   :  { %2007 = vmatmul.mubr.f32.gmra.mrb[58].mxu0 %v73_v14  ;;  %2154 = vmatmul.mubr.f32.gmra.mrb[58].mxu1 %v171_v15  ;;  %v105_v14 = vld [vmem:[%s4040_s0 + $0x2d8] sm:$0xff]  ;;  %v203_v15 = vld [vmem:[%s4040_s0 + $0x5e8] sm:$0xff] }
  0x99   :  { %2009 = vmatprep.mubr.f32.mxu0 %v74_v16  ;;  %2156 = vmatprep.mubr.f32.mxu1 %v172_v17  ;;  %v106_v16 = vld [vmem:[%s4040_s0 + $0x2e0] sm:$0xff]  ;;  %v204_v17 = vld [vmem:[%s4040_s0 + $0x5f0] sm:$0xff] }
  0x9c   :  { %2010 = vmatmul.mubr.f32.gmra.mrb[60].mxu0 %v75_v18  ;;  %2157 = vmatmul.mubr.f32.gmra.mrb[60].mxu1 %v173_v19  ;;  %v107_v18 = vld [vmem:[%s4040_s0 + $0x2e8] sm:$0xff]  ;;  %v205_v19 = vld [vmem:[%s4040_s0 + $0x5f8] sm:$0xff] }
  0x9d   :  { %2012 = vmatprep.mubr.f32.mxu0 %v76_v20  ;;  %2159 = vmatprep.mubr.f32.mxu1 %v174_v21  ;;  %v108_v20 = vld [vmem:[%s4040_s0 + $0x2f0] sm:$0xff]  ;;  %v206_v21 = vld [vmem:[%s4040_s0 + $0x600] sm:$0xff] }
  0xa0   :  { %2013 = vmatmul.mubr.f32.gmra.mrb[62].mxu0 %v77_v22  ;;  %2160 = vmatmul.mubr.f32.gmra.mrb[62].mxu1 %v175_v23  ;;  %v109_v22 = vld [vmem:[%s4040_s0 + $0x2f8] sm:$0xff]  ;;  %v207_v23 = vld [vmem:[%s4040_s0 + $0x608] sm:$0xff] }
  0xa1   :  { %2015 = vmatprep.mubr.f32.mxu0 %v78_v24  ;;  %2162 = vmatprep.mubr.f32.mxu1 %v176_v25  ;;  %v110_v24 = vld [vmem:[%s4040_s0 + $0x300] sm:$0xff]  ;;  %v208_v25 = vld [vmem:[%s4040_s0 + $0x610] sm:$0xff] }
  0xa4   :  { %2016 = vmatmul.mubr.f32.gmra.mrb[64].mxu0 %v79_v26  ;;  %2163 = vmatmul.mubr.f32.gmra.mrb[64].mxu1 %v177_v27  ;;  %v111_v26 = vld [vmem:[%s4040_s0 + $0x308] sm:$0xff]  ;;  %v209_v27 = vld [vmem:[%s4040_s0 + $0x618] sm:$0xff] }
  0xa5   :  { %2018 = vmatprep.mubr.f32.mxu0 %v80_v28  ;;  %2165 = vmatprep.mubr.f32.mxu1 %v178_v29 }
  0xa8   :  { %2019 = vmatmul.mubr.f32.gmra.mrb[66].mxu0 %v81_v30  ;;  %2166 = vmatmul.mubr.f32.gmra.mrb[66].mxu1 %v179_v31 }
  0xa9   :  { %2021 = vmatprep.mubr.f32.mxu0 %v82_v32  ;;  %2168 = vmatprep.mubr.f32.mxu1 %v180_v33 }
  0xac   :  { %2022 = vmatmul.mubr.f32.gmra.mrb[68].mxu0 %v83_v34  ;;  %2169 = vmatmul.mubr.f32.gmra.mrb[68].mxu1 %v181_v35 }
  0xad   :  { %2024 = vmatprep.mubr.f32.mxu0 %v84_v36  ;;  %2171 = vmatprep.mubr.f32.mxu1 %v182_v37 }
  0xb0   :  { %2025 = vmatmul.mubr.f32.gmra.mrb[70].mxu0 %v85_v38  ;;  %2172 = vmatmul.mubr.f32.gmra.mrb[70].mxu1 %v183_v39 }
  0xb1   :  { %2027 = vmatprep.mubr.f32.mxu0 %v86_v40  ;;  %2174 = vmatprep.mubr.f32.mxu1 %v184_v41 }
  0xb4   :  { %2028 = vmatmul.mubr.f32.gmra.mrb[72].mxu0 %v87_v42  ;;  %2175 = vmatmul.mubr.f32.gmra.mrb[72].mxu1 %v185_v43 }
  0xb5   :  { %2030 = vmatprep.mubr.f32.mxu0 %v88_v44  ;;  %2177 = vmatprep.mubr.f32.mxu1 %v186_v45 }
  0xb8   :  { %2031 = vmatmul.mubr.f32.gmra.mrb[74].mxu0 %v89_v46  ;;  %2178 = vmatmul.mubr.f32.gmra.mrb[74].mxu1 %v187_v47 }
  0xb9   :  { %2033 = vmatprep.mubr.f32.mxu0 %v90_v48  ;;  %2180 = vmatprep.mubr.f32.mxu1 %v188_v49 }
  0xbc   :  { %2034 = vmatmul.mubr.f32.gmra.mrb[76].mxu0 %v91_v50  ;;  %2181 = vmatmul.mubr.f32.gmra.mrb[76].mxu1 %v189_v51 }
  0xbd   :  { %2036 = vmatprep.mubr.f32.mxu0 %v92_v52  ;;  %2183 = vmatprep.mubr.f32.mxu1 %v190_v53 }
  0xc0   :  { %2037 = vmatmul.mubr.f32.gmra.mrb[78].mxu0 %v93_v54  ;;  %2184 = vmatmul.mubr.f32.gmra.mrb[78].mxu1 %v191_v55 }
  0xc1   :  { %2039 = vmatprep.mubr.f32.mxu0 %v94_v56  ;;  %2186 = vmatprep.mubr.f32.mxu1 %v192_v57 }
  0xc4   :  { %2040 = vmatmul.mubr.f32.gmra.mrb[80].mxu0 %v95_v58  ;;  %2187 = vmatmul.mubr.f32.gmra.mrb[80].mxu1 %v193_v59 }
  0xc5   :  { %2042 = vmatprep.mubr.f32.mxu0 %v96_v60  ;;  %2189 = vmatprep.mubr.f32.mxu1 %v194_v61 }
  0xc8   :  { %2043 = vmatmul.mubr.f32.gmra.mrb[82].mxu0 %v97_v62  ;;  %2190 = vmatmul.mubr.f32.gmra.mrb[82].mxu1 %v195_v63 }
  0xc9   :  { %2045 = vmatprep.mubr.f32.mxu0 %v98_v0  ;;  %2192 = vmatprep.mubr.f32.mxu1 %v196_v1 }
  0xcc   :  { %2046 = vmatmul.mubr.f32.gmra.mrb[84].mxu0 %v99_v2  ;;  %2193 = vmatmul.mubr.f32.gmra.mrb[84].mxu1 %v197_v3 }
  0xcd   :  { %2048 = vmatprep.mubr.f32.mxu0 %v100_v4  ;;  %2195 = vmatprep.mubr.f32.mxu1 %v198_v5 }
  0xd0   :  { %2049 = vmatmul.mubr.f32.gmra.mrb[86].mxu0 %v101_v6  ;;  %2196 = vmatmul.mubr.f32.gmra.mrb[86].mxu1 %v199_v7 }
  0xd1   :  { %2051 = vmatprep.mubr.f32.mxu0 %v102_v8  ;;  %2198 = vmatprep.mubr.f32.mxu1 %v200_v9 }
  0xd4   :  { %2052 = vmatmul.mubr.f32.gmra.mrb[88].mxu0 %v103_v10  ;;  %2199 = vmatmul.mubr.f32.gmra.mrb[88].mxu1 %v201_v11 }
  0xd5   :  { %2054 = vmatprep.mubr.f32.mxu0 %v104_v12  ;;  %2201 = vmatprep.mubr.f32.mxu1 %v202_v13 }
  0xd8   :  { %2055 = vmatmul.mubr.f32.gmra.mrb[90].mxu0 %v105_v14  ;;  %2202 = vmatmul.mubr.f32.gmra.mrb[90].mxu1 %v203_v15 }
  0xd9   :  { %2057 = vmatprep.mubr.f32.mxu0 %v106_v16  ;;  %2204 = vmatprep.mubr.f32.mxu1 %v204_v17 }
  0xdc   :  { %2058 = vmatmul.mubr.f32.gmra.mrb[92].mxu0 %v107_v18  ;;  %2205 = vmatmul.mubr.f32.gmra.mrb[92].mxu1 %v205_v19 }
  0xdd   :  { %2060 = vmatprep.mubr.f32.mxu0 %v108_v20  ;;  %2207 = vmatprep.mubr.f32.mxu1 %v206_v21 }
  0xe0   :  { %2061 = vmatmul.mubr.f32.gmra.mrb[94].mxu0 %v109_v22  ;;  %2208 = vmatmul.mubr.f32.gmra.mrb[94].mxu1 %v207_v23 }
  0xe1   :  { %2063 = vmatprep.mubr.f32.mxu0 %v110_v24  ;;  %2210 = vmatprep.mubr.f32.mxu1 %v208_v25  ;;  %v3041_v24 = vld [vmem:[%s4041_s2] ss:$0 sm:$0xff] }
  0xe4   :  { %2064 = vmatmul.mubr.f32.gmra.mrb[96].mxu0 %v111_v26  ;;  %2211 = vmatmul.mubr.f32.gmra.mrb[96].mxu1 %v209_v27 }
  0xf7   :  { %v2918_v28 = vpop.f32.mrb[0].mxu0  ;;  %v2920_v29 = vpop.f32.mrb[0].mxu1 }
  0xf8   :  { %v2922_v30 = vpop.f32.mrb[1].mxu0  ;;  %v2924_v31 = vpop.f32.mrb[1].mxu1 }
  0xfb   :  { %v2926_v32 = vpop.f32.mrb[2].mxu0  ;;  %v2928_v33 = vpop.f32.mrb[2].mxu1 }
  0xfc   :  { %v2930_v34 = vpop.f32.mrb[3].mxu0  ;;  %v2932_v35 = vpop.f32.mrb[3].mxu1 }
  0xff   :  { %v2934_v36 = vpop.f32.mrb[4].mxu0  ;;  %v2936_v37 = vpop.f32.mrb[4].mxu1 }
 0x100   :  { %v2938_v38 = vpop.f32.mrb[5].mxu0  ;;  %v2940_v39 = vpop.f32.mrb[5].mxu1 }
 0x103   :  { %v2942_v40 = vpop.f32.mrb[6].mxu0  ;;  %v2944_v41 = vpop.f32.mrb[6].mxu1 }
 0x104   :  { %v2946_v42 = vpop.f32.mrb[7].mxu0  ;;  %v2948_v43 = vpop.f32.mrb[7].mxu1 }
 0x107   :  { %v2950_v44 = vpop.f32.mrb[8].mxu0  ;;  %v2952_v45 = vpop.f32.mrb[8].mxu1 }
 0x108   :  { %v2954_v46 = vpop.f32.mrb[9].mxu0  ;;  %v2956_v47 = vpop.f32.mrb[9].mxu1 }
 0x10b   :  { %v2958_v48 = vpop.f32.mrb[10].mxu0  ;;  %v2960_v49 = vpop.f32.mrb[10].mxu1 }
 0x10c   :  { %v2962_v50 = vpop.f32.mrb[11].mxu0  ;;  %v2964_v51 = vpop.f32.mrb[11].mxu1 }
 0x10f   :  { %v2966_v52 = vpop.f32.mrb[12].mxu0  ;;  %v2968_v53 = vpop.f32.mrb[12].mxu1 }
 0x110   :  { %v2970_v54 = vpop.f32.mrb[13].mxu0  ;;  %v2972_v55 = vpop.f32.mrb[13].mxu1 }
 0x113   :  { %v2974_v56 = vpop.f32.mrb[14].mxu0  ;;  %v2976_v57 = vpop.f32.mrb[14].mxu1 }
 0x114   :  { %v2978_v58 = vpop.f32.mrb[15].mxu0  ;;  %v2980_v59 = vpop.f32.mrb[15].mxu1 }
 0x117   :  { %v2982_v60 = vpop.f32.mrb[16].mxu0  ;;  %v2984_v61 = vpop.f32.mrb[16].mxu1 }
 0x118   :  { %v2986_v62 = vpop.f32.mrb[17].mxu0  ;;  %v2988_v63 = vpop.f32.mrb[17].mxu1 }
 0x11b   :  { %v2990_v0 = vpop.f32.mrb[18].mxu0  ;;  %v2992_v1 = vpop.f32.mrb[18].mxu1 }
 0x11c   :  { %v2994_v2 = vpop.f32.mrb[19].mxu0  ;;  %v2996_v3 = vpop.f32.mrb[19].mxu1 }
 0x11f   :  { %v2998_v4 = vpop.f32.mrb[20].mxu0  ;;  %v3000_v5 = vpop.f32.mrb[20].mxu1 }
 0x120   :  { %v3002_v6 = vpop.f32.mrb[21].mxu0  ;;  %v3004_v7 = vpop.f32.mrb[21].mxu1 }
 0x123   :  { %v3006_v8 = vpop.f32.mrb[22].mxu0  ;;  %v3008_v9 = vpop.f32.mrb[22].mxu1 }
 0x124   :  { %v3010_v10 = vpop.f32.mrb[23].mxu0  ;;  %v3012_v11 = vpop.f32.mrb[23].mxu1 }
 0x127   :  { %v3014_v12 = vpop.f32.mrb[24].mxu0  ;;  %v3016_v13 = vpop.f32.mrb[24].mxu1 }
 0x128   :  { %v3018_v14 = vpop.f32.mrb[25].mxu0  ;;  %v3020_v15 = vpop.f32.mrb[25].mxu1 }
 0x12b   :  { %v3022_v16 = vpop.f32.mrb[26].mxu0  ;;  %v3024_v17 = vpop.f32.mrb[26].mxu1 }
 0x12c   :  { %v3026_v18 = vpop.f32.mrb[27].mxu0  ;;  %v3028_v19 = vpop.f32.mrb[27].mxu1 }
 0x12d   :  { %4082 = vst [vmem:[#allocation2_spill] sm:$0xff] %v3026_v18  ;;  %4083 = vst [vmem:[#allocation3_spill] sm:$0xff] %v3028_v19 }
 0x12f   :  { %v3030_v20 = vpop.f32.mrb[28].mxu0  ;;  %v3032_v21 = vpop.f32.mrb[28].mxu1 }
 0x130   :  { %4084 = vst [vmem:[#allocation4_spill] sm:$0xff] %v3030_v20  ;;  %4085 = vst [vmem:[#allocation5_spill] sm:$0xff] %v3032_v21  ;;  %v3034_v22 = vpop.f32.mrb[29].mxu0  ;;  %v3036_v23 = vpop.f32.mrb[29].mxu1  ;;  %v3053_v21 = vadd.f32 %v2918_v28, %v3041_v24  ;;  %v3073_v28 = vadd.f32 %v2928_v33, %v3041_v24 }
 0x131   :  { %4086 = vst [vmem:[#allocation6_spill] sm:$0xff] %v3034_v22  ;;  %4087 = vst [vmem:[#allocation7_spill] sm:$0xff] %v3036_v23  ;;  %v3057_v23 = vadd.f32 %v2920_v29, %v3041_v24  ;;  %v3061_v22 = vadd.f32 %v3041_v24, %v2922_v30  ;;  %v3077_v29 = vadd.f32 %v3041_v24, %v2930_v34 }
 0x132   :  { %4093 = vst [vmem:[#allocation13_spill] sm:$0xff] %v3073_v28  ;;  %v3130_v34 = vadd.f32 %v3041_v24, %v2946_v42  ;;  %v3151_v42 = vadd.f32 %v3041_v24, %v2954_v46  ;;  %v3167_v46 = vadd.f32 %v2960_v49, %v3041_v24  ;;  %v3181_v28 = vadd.f32 %v3041_v24, %v2964_v51 }
 0x133   :  { %v3043_v25 = vpop.f32.mrb[30].mxu0  ;;  %v3045_v26 = vpop.f32.mrb[30].mxu1  ;;  %v3185_v49 = vadd.f32 %v2966_v52, %v3041_v24  ;;  %v3202_v52 = vadd.f32 %v3041_v24, %v2970_v54  ;;  %v3216_v51 = vadd.f32 %v2976_v57, %v3041_v24 }
 0x134   :  { %4088 = vst [vmem:[#allocation8_spill] sm:$0xff] %v3043_v25  ;;  %4089 = vst [vmem:[#allocation9_spill] sm:$0xff] %v3045_v26  ;;  %v3047_v27 = vpop.f32.mrb[31].mxu0  ;;  %v3049_v19 = vpop.f32.mrb[31].mxu1  ;;  %v3065_v25 = vadd.f32 %v3041_v24, %v2924_v31  ;;  %v3085_v31 = vadd.f32 %v3041_v24, %v2932_v35  ;;  %v3120_v35 = vadd.f32 %v2944_v41, %v3041_v24 }
 0x135   :  { %4090 = vst [vmem:[#allocation10_spill] sm:$0xff] %v3047_v27  ;;  %4091 = vst [vmem:[#allocation11_spill] sm:$0xff] %v3049_v19  ;;  %v3069_v27 = vadd.f32 %v2926_v32, %v3041_v24  ;;  %v3089_v32 = vadd.f32 %v2934_v36, %v3041_v24  ;;  %v3106_v36 = vadd.f32 %v3041_v24, %v2938_v38 }
 0x136   :  { %4100 = vst [vmem:[#allocation20_spill] sm:$0xff] %v3120_v35  ;;  %4101 = vst [vmem:[#allocation21_spill] sm:$0xff] %v3130_v34  ;;  %v3206_v34 = vadd.f32 %v3041_v24, %v2972_v55  ;;  %v3243_v55 = vadd.f32 %v2984_v61, %v3041_v24 }
 0x137   :  { %4092 = vst [vmem:[#allocation12_spill] sm:$0xff] %v3069_v27  ;;  %v3079_v19 = vpop.f32.mrb[32].mxu0  ;;  %v3081_v30 = vpop.f32.mrb[32].mxu1  ;;  %4096 = vst [vmem:[#allocation16_spill] sm:$0xff] %v3089_v32  ;;  %v3143_v27 = vadd.f32 %v2950_v44, %v3041_v24  ;;  %v3157_v32 = vadd.f32 %v3041_v24, %v2956_v47  ;;  %v3161_v44 = vadd.f32 %v2958_v48, %v3041_v24 }
 0x138   :  { %4094 = vst [vmem:[#allocation14_spill] sm:$0xff] %v3079_v19  ;;  %4095 = vst [vmem:[#allocation15_spill] sm:$0xff] %v3081_v30  ;;  %v3091_v26 = vpop.f32.mrb[33].mxu0  ;;  %v3093_v33 = vpop.f32.mrb[33].mxu1  ;;  %v3100_v30 = vadd.f32 %v2936_v37, %v3041_v24  ;;  %v3116_v37 = vadd.f32 %v2942_v40, %v3041_v24  ;;  %v3134_v40 = vadd.f32 %v3041_v24, %v2948_v43 }
 0x139   :  { %4097 = vst [vmem:[#allocation17_spill] sm:$0xff] %v3093_v33  ;;  %v3110_v33 = vadd.f32 %v3041_v24, %v2940_v39  ;;  %v3147_v39 = vadd.f32 %v2952_v45, %v3041_v24  ;;  %4103 = vst [vmem:[#allocation23_spill] sm:$0xff] %v3161_v44  ;;  %v3171_v43 = vadd.f32 %v3041_v24, %v2962_v50 }
 0x13a   :  { %4098 = vst [vmem:[#allocation18_spill] sm:$0xff] %v3100_v30  ;;  %4099 = vst [vmem:[#allocation19_spill] sm:$0xff] %v3116_v37  ;;  %v3196_v48 = vadd.f32 %v2968_v53, %v3041_v24  ;;  %v3212_v53 = vadd.f32 %v2974_v56, %v3041_v24  ;;  %v3226_v37 = vadd.f32 %v3041_v24, %v2978_v58 }
 0x13b   :  { %v3122_v18 = vpop.f32.mrb[34].mxu0  ;;  %v3124_v38 = vpop.f32.mrb[34].mxu1  ;;  %4102 = vst [vmem:[#allocation22_spill] sm:$0xff] %v3134_v40  ;;  %4104 = vst [vmem:[#allocation24_spill] sm:$0xff] %v3167_v46  ;;  %v3230_v56 = vadd.f32 %v3041_v24, %v2980_v59  ;;  %v3239_v44 = vadd.f32 %v2982_v60, %v3041_v24  ;;  %v3247_v58 = vadd.f32 %v3041_v24, %v2986_v62 }
 0x13c   :  { %v3136_v20 = vpop.f32.mrb[35].mxu0  ;;  %v3138_v41 = vpop.f32.mrb[35].mxu1  ;;  %4105 = vst [vmem:[#allocation25_spill] sm:$0xff] %v3185_v49  ;;  %4106 = vst [vmem:[#allocation26_spill] sm:$0xff] %v3196_v48  ;;  %v3253_v49 = vadd.f32 %v3041_v24, %v2988_v63  ;;  %v3257_v60 = vadd.f32 %v2990_v0, %v3041_v24  ;;  %v3263_v62 = vadd.f32 %v2992_v1, %v3041_v24 }
 0x13d   :  { %4107 = vst [vmem:[#allocation27_spill] sm:$0xff] %v3212_v53  ;;  %4108 = vst [vmem:[#allocation28_spill] sm:$0xff] %v3216_v51  ;;  %v3267_v59 = vadd.f32 %v3041_v24, %v2994_v2  ;;  %v3277_v46 = vadd.f32 %v3041_v24, %v2996_v3  ;;  %v3281_v1 = vadd.f32 %v2998_v4, %v3041_v24 }
 0x13e   :  { %4109 = vst [vmem:[#allocation29_spill] sm:$0xff] %v3230_v56  ;;  %v3292_v0 = vadd.f32 %v3000_v5, %v3041_v24  ;;  %v3298_v4 = vadd.f32 %v3041_v24, %v3002_v6  ;;  %v3308_v5 = vadd.f32 %v3006_v8, %v3041_v24  ;;  %v3312_v3 = vadd.f32 %v3008_v9, %v3041_v24 }
 0x13f   :  { %v3173_v19 = vpop.f32.mrb[36].mxu0  ;;  %v3175_v47 = vpop.f32.mrb[36].mxu1  ;;  %4110 = vst [vmem:[#allocation30_spill] sm:$0xff] %v3281_v1  ;;  %v3322_v53 = vadd.f32 %v3041_v24, %v3010_v10  ;;  %v3326_v8 = vadd.f32 %v3041_v24, %v3012_v11  ;;  %v3343_v10 = vadd.f32 %v3041_v24, %v3018_v14  ;;  %v3359_v14 = vadd.f32 %v3024_v17, %v3041_v24  ;;  %v4129_v1 = vld [vmem:[#allocation3_spill] sm:$0xff] }
 0x140   :  { %v3187_v45 = vpop.f32.mrb[37].mxu0  ;;  %v3189_v50 = vpop.f32.mrb[37].mxu1  ;;  %4112 = vst [vmem:[#allocation32_spill] sm:$0xff] %v3292_v0  ;;  %4113 = vst [vmem:[#allocation33_spill] sm:$0xff] %v3308_v5  ;;  %v4140_v0 = vld [vmem:[#allocation8_spill] sm:$0xff] }
 0x141   :  { %4114 = vst [vmem:[#allocation34_spill] sm:$0xff] %v3312_v3  ;;  %4117 = vst [vmem:[#allocation37_spill] sm:$0xff] %v3322_v53 }
 0x142   :  { %4118 = vst [vmem:[#allocation38_spill] sm:$0xff] %v3326_v8  ;;  %4124 = vst [vmem:[#allocation44_spill] sm:$0xff] %v3359_v14 }
 0x143   :  { %v3218_v40 = vpop.f32.mrb[38].mxu0  ;;  %v3220_v54 = vpop.f32.mrb[38].mxu1 }
 0x144   :  { %v3232_v35 = vpop.f32.mrb[39].mxu0  ;;  %v3234_v57 = vpop.f32.mrb[39].mxu1 }
 0x147   :  { %v3269_v30 = vpop.f32.mrb[40].mxu0  ;;  %v3271_v63 = vpop.f32.mrb[40].mxu1 }
 0x148   :  { %v3283_v61 = vpop.f32.mrb[41].mxu0  ;;  %v3285_v2 = vpop.f32.mrb[41].mxu1 }
 0x149   :  { %4111 = vst [vmem:[#allocation31_spill] sm:$0xff] %v3285_v2  ;;  %v3302_v2 = vadd.f32 %v3041_v24, %v3004_v7  ;;  %v3339_v7 = vadd.f32 %v3016_v13, %v3041_v24  ;;  %v4130_v13 = vld [vmem:[#allocation4_spill] sm:$0xff] }
 0x14a   :  { %v3377_v17 = vadd.f32 %v4130_v13, %v3041_v24  ;;  %v4136_v13 = vld [vmem:[#allocation6_spill] sm:$0xff] }
 0x14b   :  { %v3314_v56 = vpop.f32.mrb[42].mxu0  ;;  %v3316_v6 = vpop.f32.mrb[42].mxu1  ;;  %4122 = vst [vmem:[#allocation42_spill] sm:$0xff] %v3339_v7  ;;  %v3394_v53 = vadd.f32 %v3041_v24, %v4136_v13 }
 0x14c   :  { %4115 = vst [vmem:[#allocation35_spill] sm:$0xff] %v3314_v56  ;;  %4116 = vst [vmem:[#allocation36_spill] sm:$0xff] %v3316_v6  ;;  %v3328_v51 = vpop.f32.mrb[43].mxu0  ;;  %v3330_v9 = vpop.f32.mrb[43].mxu1  ;;  %v3335_v6 = vadd.f32 %v3014_v12, %v3041_v24  ;;  %v3353_v12 = vadd.f32 %v3022_v16, %v3041_v24  ;;  %v3373_v56 = vadd.f32 %v3041_v24, %v4129_v1  ;;  %v4134_v16 = vld [vmem:[#allocation5_spill] sm:$0xff] }
 0x14d   :  { %4119 = vst [vmem:[#allocation39_spill] sm:$0xff] %v3328_v51  ;;  %4120 = vst [vmem:[#allocation40_spill] sm:$0xff] %v3330_v9  ;;  %v3349_v9 = vadd.f32 %v3041_v24, %v3020_v15  ;;  %v4125_v51 = vld [vmem:[#allocation2_spill] sm:$0xff]  ;;  %v3388_v5 = vadd.f32 %v4134_v16, %v3041_v24  ;;  %v3404_v16 = vadd.f32 %v4140_v0, %v3041_v24  ;;  %v4142_v1 = vld [vmem:[#allocation9_spill] sm:$0xff] }
 0x14e   :  { %4121 = vst [vmem:[#allocation41_spill] sm:$0xff] %v3335_v6  ;;  %4123 = vst [vmem:[#allocation43_spill] sm:$0xff] %v3353_v12  ;;  %v3363_v11 = vadd.f32 %v3041_v24, %v4125_v51  ;;  %v3408_v7 = vadd.f32 %v4142_v1, %v3041_v24  ;;  %v4146_v6 = vld [vmem:[#allocation10_spill] sm:$0xff] }
 0x14f   :  { %v3365_v48 = vpop.f32.mrb[44].mxu0  ;;  %v3367_v15 = vpop.f32.mrb[44].mxu1  ;;  %4131 = vst [vmem:[#allocation3_spill] sm:$0xff] %v3377_v17  ;;  %4135 = vst [vmem:[#allocation5_spill] sm:$0xff] %v3388_v5  ;;  %v4154_v17 = vld [vmem:[#allocation17_spill] sm:$0xff] }
 0x150   :  { %4126 = vst [vmem:[#allocation2_spill] sm:$0xff] %v3363_v11  ;;  %4127 = vst [vmem:[#allocation45_spill] sm:$0xff] %v3365_v48  ;;  %v3379_v3 = vpop.f32.mrb[45].mxu0  ;;  %v3381_v51 = vpop.f32.mrb[45].mxu1  ;;  %v4147_v48 = vld [vmem:[#allocation11_spill] sm:$0xff] }
 0x151   :  { %4128 = vst [vmem:[#allocation46_spill] sm:$0xff] %v3367_v15  ;;  %4132 = vst [vmem:[#allocation4_spill] sm:$0xff] %v3379_v3  ;;  %v4138_v3 = vld [vmem:[#allocation7_spill] sm:$0xff]  ;;  %v3418_v15 = vadd.f32 %v3041_v24, %v4146_v6  ;;  %v3422_v0 = vadd.f32 %v3041_v24, %v4147_v48  ;;  %v3439_v6 = vadd.f32 %v3041_v24, %v3091_v26 }
 0x152   :  { %4133 = vst [vmem:[#allocation47_spill] sm:$0xff] %v3381_v51  ;;  %4137 = vst [vmem:[#allocation6_spill] sm:$0xff] %v3394_v53  ;;  %v3398_v51 = vadd.f32 %v3041_v24, %v4138_v3  ;;  %v4152_v3 = vld [vmem:[#allocation15_spill] sm:$0xff]  ;;  %v3455_v26 = vadd.f32 %v3124_v38, %v3041_v24  ;;  %v3459_v48 = vadd.f32 %v3041_v24, %v3136_v20 }
 0x153   :  { %4141 = vst [vmem:[#allocation8_spill] sm:$0xff] %v3404_v16  ;;  %4143 = vst [vmem:[#allocation9_spill] sm:$0xff] %v3408_v7  ;;  %v3410_v8 = vpop.f32.mrb[46].mxu0  ;;  %v3412_v13 = vpop.f32.mrb[46].mxu1  ;;  %v3435_v12 = vadd.f32 %v4152_v3, %v3041_v24  ;;  %v3474_v53 = vadd.f32 %v3041_v24, %v3138_v41  ;;  %v3482_v38 = vadd.f32 %v3173_v19, %v3041_v24 }
 0x154   :  { %4139 = vst [vmem:[#allocation7_spill] sm:$0xff] %v3398_v51  ;;  %4144 = vst [vmem:[#allocation48_spill] sm:$0xff] %v3410_v8  ;;  %v3424_v14 = vpop.f32.mrb[47].mxu0  ;;  %v3426_v1 = vpop.f32.mrb[47].mxu1  ;;  %v3486_v7 = vadd.f32 %v3175_v47, %v3041_v24  ;;  %v4162_v51 = vmax.f32 %v3061_v22, 0.0  ;;  %v3497_v47 = vadd.f32 %v3041_v24, %v3187_v45 }
 0x155   :  { %4145 = vst [vmem:[#allocation49_spill] sm:$0xff] %v3412_v13  ;;  %4148 = vst [vmem:[#allocation10_spill] sm:$0xff] %v3424_v14  ;;  %v4150_v13 = vld [vmem:[#allocation14_spill] sm:$0xff] }
 0x156   :  { %4149 = vst [vmem:[#allocation11_spill] sm:$0xff] %v3426_v1  ;;  %v3431_v11 = vadd.f32 %v4150_v13, %v3041_v24  ;;  %4153 = vst [vmem:[#allocation15_spill] sm:$0xff] %v3435_v12  ;;  %v3445_v1 = vadd.f32 %v3041_v24, %v4154_v17  ;;  %v3449_v13 = vadd.f32 %v3122_v18, %v3041_v24 }
 0x157   :  { %4156 = vst [vmem:[#allocation50_spill] sm:$0xff] %v3455_v26  ;;  %v1993_v14 = vpop.f32.mrb[48].mxu0  ;;  %v2140_v5 = vpop.f32.mrb[48].mxu1  ;;  %4159 = vst [vmem:[#allocation53_spill] sm:$0xff] %v3474_v53 }
 0x158   :  { %4151 = vst [vmem:[#allocation14_spill] sm:$0xff] %v3431_v11  ;;  %4155 = vst [vmem:[#allocation17_spill] sm:$0xff] %v3449_v13  ;;  %v545_v18 = vadd.f32 %v1993_v14, %v3041_v24  ;;  %v1035_v8 = vadd.f32 %v2140_v5, %v3041_v24  ;;  %v3465_v16 = vpop.f32.mrb[49].mxu0  ;;  %v3467_v3 = vpop.f32.mrb[49].mxu1 }
 0x159   :  { %4157 = vst [vmem:[#allocation51_spill] sm:$0xff] %v3465_v16  ;;  %4158 = vst [vmem:[#allocation52_spill] sm:$0xff] %v3467_v3 }
 0x15a   :  { %v1327_v17 = vmax.f32 %v545_v18, 0.0  ;;  %v1425_v5 = vmax.f32 %v1035_v8, 0.0  ;;  %4160 = vst [vmem:[#allocation54_spill] sm:$0xff] %v3482_v38  ;;  %4161 = vst [vmem:[#allocation55_spill] sm:$0xff] %v3486_v7  ;;  %v4163_v18 = vmax.f32 %v3065_v25, 0.0  ;;  %v3503_v25 = vadd.f32 %v3041_v24, %v3189_v50 }
 0x15b   :  { %v1996_v41 = vpop.f32.mrb[50].mxu0  ;;  %v2143_v20 = vpop.f32.mrb[50].mxu1  ;;  %v4165_v50 = vmax.f32 %v3085_v31, 0.0 }
 0x15c   :  { %v1474_v12 = vmax.f32 %v4162_v51, %v1327_v17  ;;  %v1523_v8 = vmax.f32 %v4163_v18, %v1425_v5  ;;  %v555_v16 = vadd.f32 %v1996_v41, %v3041_v24  ;;  %v1045_v14 = vadd.f32 %v2143_v20, %v3041_v24  ;;  %v549_v3 = vpop.f32.mrb[51].mxu0  ;;  %v1039_v26 = vpop.f32.mrb[51].mxu1 }
 0x15d   :  { %v550_v13 = vadd.f32 %v3041_v24, %v549_v3  ;;  %v1040_v22 = vadd.f32 %v3041_v24, %v1039_v26  ;;  %v4164_v3 = vmax.f32 %v3077_v29, 0.0  ;;  %v4167_v20 = vmax.f32 %v3057_v23, 0.0 }
 0x15e   :  { %v1572_v51 = vmax.f32 %v1474_v12, %v1523_v8  ;;  %v1329_v17 = vmax.f32 %v555_v16, 0.0  ;;  %v1427_v5 = vmax.f32 %v1045_v14, 0.0  ;;  %v4168_v23 = vmax.f32 %v3106_v36, 0.0 }
 0x15f   :  { %v1328_v18 = vmax.f32 %v550_v13, 0.0  ;;  %v1426_v19 = vmax.f32 %v1040_v22, 0.0  ;;  %v1999_v11 = vpop.f32.mrb[52].mxu0  ;;  %v2146_v45 = vpop.f32.mrb[52].mxu1  ;;  %v4166_v13 = vmax.f32 %v3053_v21, 0.0 }
 0x160   :  { %1621 = vst [vmem:[%s4042_s3] sm:$0xff] %v1572_v51  ;;  %v1476_v26 = vmax.f32 %v4164_v3, %v1329_v17  ;;  %v1525_v12 = vmax.f32 %v4165_v50, %v1427_v5  ;;  %v565_v16 = vadd.f32 %v1999_v11, %v3041_v24  ;;  %v1055_v14 = vadd.f32 %v2146_v45, %v3041_v24  ;;  %v559_v8 = vpop.f32.mrb[53].mxu0  ;;  %v1049_v41 = vpop.f32.mrb[53].mxu1 }
 0x161   :  { %v1475_v22 = vmax.f32 %v4166_v13, %v1328_v18  ;;  %v1524_v7 = vmax.f32 %v4167_v20, %v1426_v19  ;;  %v560_v51 = vadd.f32 %v3041_v24, %v559_v8  ;;  %v1050_v29 = vadd.f32 %v3041_v24, %v1049_v41  ;;  %v4172_v13 = vld [vmem:[#allocation13_spill] sm:$0xff] }
 0x162   :  { %v1314_v17 = vmax.f32 %v3497_v47, 0.0  ;;  %v1574_v31 = vmax.f32 %v1476_v26, %v1525_v12  ;;  %v1331_v5 = vmax.f32 %v565_v16, 0.0  ;;  %v1429_v3 = vmax.f32 %v1055_v14, 0.0  ;;  %v4170_v16 = vld [vmem:[#allocation12_spill] sm:$0xff] }
 0x163   :  { %v1412_v11 = vmax.f32 %v3503_v25, 0.0  ;;  %v1573_v45 = vmax.f32 %v1475_v22, %v1524_v7  ;;  %v1330_v50 = vmax.f32 %v560_v51, 0.0  ;;  %v1428_v38 = vmax.f32 %v1050_v29, 0.0  ;;  %v2002_v53 = vpop.f32.mrb[54].mxu0  ;;  %v2149_v21 = vpop.f32.mrb[54].mxu1 }
 0x164   :  { %1623 = vst [vmem:[%s4042_s3 + $0x10] sm:$0xff] %v1574_v31  ;;  %v1478_v19 = vmax.f32 %v4168_v23, %v1331_v5  ;;  %v4169_v20 = vmax.f32 %v3110_v33, 0.0  ;;  %v575_v18 = vadd.f32 %v2002_v53, %v3041_v24  ;;  %v1065_v26 = vadd.f32 %v2149_v21, %v3041_v24  ;;  %v569_v12 = vpop.f32.mrb[55].mxu0  ;;  %v1059_v7 = vpop.f32.mrb[55].mxu1 }
 0x165   :  { %1622 = vst [vmem:[%s4042_s3 + $0x8] sm:$0xff] %v1573_v45  ;;  %v4171_v14 = vmax.f32 %v4170_v16, 0.0  ;;  %v4173_v22 = vmax.f32 %v4172_v13, 0.0  ;;  %v570_v51 = vadd.f32 %v3041_v24, %v569_v12  ;;  %v1060_v33 = vadd.f32 %v3041_v24, %v1059_v7  ;;  %v4176_v7 = vld [vmem:[#allocation22_spill] sm:$0xff] }
 0x166   :  { %v1527_v41 = vmax.f32 %v4169_v20, %v1429_v3  ;;  %v3544_v53 = vadd.f32 %v3218_v40, %v3041_v24  ;;  %v1333_v31 = vmax.f32 %v575_v18, 0.0  ;;  %v1431_v5 = vmax.f32 %v1065_v26, 0.0  ;;  %v4174_v20 = vld [vmem:[#allocation21_spill] sm:$0xff] }
 0x167   :  { %v1477_v8 = vmax.f32 %v4171_v14, %v1330_v50  ;;  %v1526_v36 = vmax.f32 %v4173_v22, %v1428_v38  ;;  %v3548_v3 = vadd.f32 %v3220_v54, %v3041_v24  ;;  %v1332_v50 = vmax.f32 %v570_v51, 0.0  ;;  %v2005_v23 = vpop.f32.mrb[56].mxu0  ;;  %v2152_v38 = vpop.f32.mrb[56].mxu1  ;;  %v4178_v14 = vld [vmem:[#allocation16_spill] sm:$0xff]  ;;  %v4180_v22 = vld [vmem:[#allocation18_spill] sm:$0xff] }
 0x168   :  { %v1576_v29 = vmax.f32 %v1478_v19, %v1527_v41  ;;  %v1430_v21 = vmax.f32 %v1060_v33, 0.0  ;;  %v4175_v12 = vmax.f32 %v4174_v20, 0.0  ;;  %v4177_v19 = vmax.f32 %v4176_v7, 0.0  ;;  %v579_v26 = vpop.f32.mrb[57].mxu0  ;;  %v1069_v16 = vpop.f32.mrb[57].mxu1 }
 0x169   :  { %v1575_v45 = vmax.f32 %v1477_v8, %v1526_v36  ;;  %v585_v18 = vadd.f32 %v2005_v23, %v3041_v24  ;;  %v1075_v54 = vadd.f32 %v2152_v38, %v3041_v24  ;;  %v4179_v8 = vmax.f32 %v4178_v14, 0.0 }
 0x16a   :  { %1625 = vst [vmem:[%s4042_s3 + $0x20] sm:$0xff] %v1576_v29  ;;  %v1480_v40 = vmax.f32 %v4175_v12, %v1333_v31  ;;  %v1529_v41 = vmax.f32 %v4177_v19, %v1431_v5  ;;  %v4181_v36 = vmax.f32 %v4180_v22, 0.0  ;;  %v580_v33 = vadd.f32 %v3041_v24, %v579_v26 }
 0x16b   :  { %1624 = vst [vmem:[%s4042_s3 + $0x18] sm:$0xff] %v1575_v45  ;;  %v1479_v13 = vmax.f32 %v4179_v8, %v1332_v50  ;;  %v1070_v29 = vadd.f32 %v3041_v24, %v1069_v16  ;;  %v3570_v31 = vadd.f32 %v3041_v24, %v3232_v35  ;;  %v1335_v23 = vmax.f32 %v585_v18, 0.0  ;;  %v2008_v7 = vpop.f32.mrb[58].mxu0  ;;  %v4184_v16 = vld [vmem:[#allocation19_spill] sm:$0xff] }
 0x16c   :  { %v1528_v51 = vmax.f32 %v4181_v36, %v1430_v21  ;;  %v1578_v5 = vmax.f32 %v1480_v40, %v1529_v41  ;;  %v1433_v38 = vmax.f32 %v1075_v54, 0.0  ;;  %v3574_v45 = vadd.f32 %v3041_v24, %v3234_v57  ;;  %v2155_v21 = vpop.f32.mrb[58].mxu1  ;;  %v589_v54 = vpop.f32.mrb[59].mxu0 }
 0x16d   :  { %v1334_v50 = vmax.f32 %v580_v33, 0.0  ;;  %v1432_v12 = vmax.f32 %v1070_v29, 0.0  ;;  %v4182_v19 = vmax.f32 %v3151_v42, 0.0  ;;  %v4183_v40 = vmax.f32 %v3157_v32, 0.0  ;;  %v1079_v26 = vpop.f32.mrb[59].mxu1 }
 0x16e   :  { %v1577_v20 = vmax.f32 %v1479_v13, %v1528_v51  ;;  %1627 = vst [vmem:[%s4042_s3 + $0x30] sm:$0xff] %v1578_v5  ;;  %v595_v18 = vadd.f32 %v2008_v7, %v3041_v24  ;;  %v1085_v57 = vadd.f32 %v2155_v21, %v3041_v24  ;;  %v4185_v14 = vmax.f32 %v4184_v16, 0.0  ;;  %v4186_v13 = vld [vmem:[#allocation20_spill] sm:$0xff] }
 0x16f   :  { %v1482_v35 = vmax.f32 %v4182_v19, %v1335_v23  ;;  %v1531_v41 = vmax.f32 %v4183_v40, %v1433_v38  ;;  %v4187_v22 = vmax.f32 %v4186_v13, 0.0  ;;  %v590_v36 = vadd.f32 %v3041_v24, %v589_v54  ;;  %v2011_v21 = vpop.f32.mrb[60].mxu0  ;;  %v2158_v19 = vpop.f32.mrb[60].mxu1 }
 0x170   :  { %1626 = vst [vmem:[%s4042_s3 + $0x28] sm:$0xff] %v1577_v20  ;;  %v1481_v8 = vmax.f32 %v4185_v14, %v1334_v50  ;;  %v1080_v32 = vadd.f32 %v3041_v24, %v1079_v26  ;;  %v1317_v51 = vmax.f32 %v3544_v53, 0.0  ;;  %v1337_v29 = vmax.f32 %v595_v18, 0.0  ;;  %v599_v18 = vpop.f32.mrb[61].mxu0 }
 0x171   :  { %v1530_v42 = vmax.f32 %v4187_v22, %v1432_v12  ;;  %v1580_v33 = vmax.f32 %v1482_v35, %v1531_v41  ;;  %v1435_v5 = vmax.f32 %v1085_v57, 0.0  ;;  %v1415_v23 = vmax.f32 %v3548_v3, 0.0  ;;  %v1089_v57 = vpop.f32.mrb[61].mxu1 }
 0x172   :  { %v1336_v7 = vmax.f32 %v590_v36, 0.0  ;;  %v1434_v20 = vmax.f32 %v1080_v32, 0.0  ;;  %v4188_v50 = vmax.f32 %v3171_v43, 0.0  ;;  %v4189_v40 = vmax.f32 %v3181_v28, 0.0 }
 0x173   :  { %v1579_v38 = vmax.f32 %v1481_v8, %v1530_v42  ;;  %1629 = vst [vmem:[%s4042_s3 + $0x40] sm:$0xff] %v1580_v33  ;;  %v605_v35 = vadd.f32 %v2011_v21, %v3041_v24  ;;  %v1095_v41 = vadd.f32 %v2158_v19, %v3041_v24  ;;  %v4190_v26 = vmax.f32 %v3143_v27, 0.0  ;;  %v2161_v27 = vpop.f32.mrb[62].mxu1 }
 0x174   :  { %v1484_v12 = vmax.f32 %v4188_v50, %v1337_v29  ;;  %v1533_v54 = vmax.f32 %v4189_v40, %v1435_v5  ;;  %v4191_v14 = vmax.f32 %v3147_v39, 0.0  ;;  %v600_v8 = vadd.f32 %v3041_v24, %v599_v18  ;;  %v1099_v40 = vpop.f32.mrb[63].mxu1  ;;  %v4196_v18 = vld [vmem:[#allocation24_spill] sm:$0xff] }
 0x175   :  { %1628 = vst [vmem:[%s4042_s3 + $0x38] sm:$0xff] %v1579_v38  ;;  %v1483_v16 = vmax.f32 %v4190_v26, %v1336_v7  ;;  %v1090_v28 = vadd.f32 %v3041_v24, %v1089_v57  ;;  %v1316_v13 = vmax.f32 %v3570_v31, 0.0  ;;  %v1339_v42 = vmax.f32 %v605_v35, 0.0  ;;  %v2014_v38 = vpop.f32.mrb[62].mxu0 }
 0x176   :  { %v1532_v43 = vmax.f32 %v4191_v14, %v1434_v20  ;;  %v1582_v22 = vmax.f32 %v1484_v12, %v1533_v54  ;;  %v1437_v36 = vmax.f32 %v1095_v41, 0.0  ;;  %v1414_v32 = vmax.f32 %v3574_v45, 0.0  ;;  %v609_v12 = vpop.f32.mrb[63].mxu0  ;;  %v4194_v54 = vld [vmem:[#allocation23_spill] sm:$0xff] }
 0x177   :  { %v1338_v29 = vmax.f32 %v600_v8, 0.0  ;;  %v1436_v5 = vmax.f32 %v1090_v28, 0.0  ;;  %v4192_v39 = vmax.f32 %v3202_v52, 0.0  ;;  %v4193_v20 = vmax.f32 %v3206_v34, 0.0 }
 0x178   :  { %v1581_v33 = vmax.f32 %v1483_v16, %v1532_v43  ;;  %1631 = vst [vmem:[%s4042_s3 + $0x50] sm:$0xff] %v1582_v22  ;;  %v615_v19 = vadd.f32 %v2014_v38, %v3041_v24  ;;  %v1105_v50 = vadd.f32 %v2161_v27, %v3041_v24  ;;  %v4195_v35 = vmax.f32 %v4194_v54, 0.0  ;;  %v4199_v38 = vld [vmem:[#allocation29_spill] sm:$0xff] }
 0x179   :  { %v1486_v7 = vmax.f32 %v4192_v39, %v1339_v42  ;;  %v1535_v21 = vmax.f32 %v4193_v20, %v1437_v36  ;;  %v4197_v57 = vmax.f32 %v4196_v18, 0.0  ;;  %v610_v26 = vadd.f32 %v3041_v24, %v609_v12 }
 0x17a   :  { %1630 = vst [vmem:[%s4042_s3 + $0x48] sm:$0xff] %v1581_v33  ;;  %v1485_v41 = vmax.f32 %v4195_v35, %v1338_v29  ;;  %v1100_v34 = vadd.f32 %v3041_v24, %v1099_v40  ;;  %v3636_v16 = vadd.f32 %v3269_v30, %v3041_v24  ;;  %v1341_v43 = vmax.f32 %v615_v19, 0.0  ;;  %v2017_v33 = vpop.f32.mrb[64].mxu0  ;;  %v2164_v29 = vpop.f32.mrb[64].mxu1  ;;  %v4201_v19 = vld [vmem:[#allocation25_spill] sm:$0xff]  ;;  %v4203_v40 = vld [vmem:[#allocation26_spill] sm:$0xff] }
 0x17b   :  { %v1534_v52 = vmax.f32 %v4197_v57, %v1436_v5  ;;  %v1584_v14 = vmax.f32 %v1486_v7, %v1535_v21  ;;  %v1439_v8 = vmax.f32 %v1105_v50, 0.0  ;;  %v3640_v28 = vadd.f32 %v3271_v63, %v3041_v24  ;;  %v619_v20 = vpop.f32.mrb[65].mxu0  ;;  %v1109_v21 = vpop.f32.mrb[65].mxu1 }
 0x17c   :  { %v1340_v42 = vmax.f32 %v610_v26, 0.0  ;;  %v1438_v36 = vmax.f32 %v1100_v34, 0.0  ;;  %v4198_v5 = vmax.f32 %v3226_v37, 0.0  ;;  %v4200_v27 = vmax.f32 %v4199_v38, 0.0  ;;  %v4205_v34 = vld [vmem:[#allocation31_spill] sm:$0xff] }
 0x17d   :  { %v1583_v22 = vmax.f32 %v1485_v41, %v1534_v52  ;;  %1633 = vst [vmem:[%s4042_s3 + $0x60] sm:$0xff] %v1584_v14  ;;  %v625_v7 = vadd.f32 %v2017_v33, %v3041_v24  ;;  %v1115_v63 = vadd.f32 %v2164_v29, %v3041_v24  ;;  %v4202_v50 = vmax.f32 %v4201_v19, 0.0 }
 0x17e   :  { %v1488_v30 = vmax.f32 %v4198_v5, %v1341_v43  ;;  %v1537_v39 = vmax.f32 %v4200_v27, %v1439_v8  ;;  %v4204_v54 = vmax.f32 %v4203_v40, 0.0  ;;  %v620_v35 = vadd.f32 %v3041_v24, %v619_v20 }
 0x17f   :  { %1632 = vst [vmem:[%s4042_s3 + $0x58] sm:$0xff] %v1583_v22  ;;  %v1487_v12 = vmax.f32 %v4202_v50, %v1340_v42  ;;  %v1110_v41 = vadd.f32 %v3041_v24, %v1109_v21  ;;  %v3662_v18 = vadd.f32 %v3041_v24, %v3283_v61  ;;  %v1343_v52 = vmax.f32 %v625_v7, 0.0  ;;  %v2020_v42 = vpop.f32.mrb[66].mxu0  ;;  %v4208_v7 = vld [vmem:[#allocation27_spill] sm:$0xff]  ;;  %v4210_v21 = vld [vmem:[#allocation28_spill] sm:$0xff] }
 0x180   :  { %v1536_v37 = vmax.f32 %v4204_v54, %v1438_v36  ;;  %v1586_v57 = vmax.f32 %v1488_v30, %v1537_v39  ;;  %v1441_v26 = vmax.f32 %v1115_v63, 0.0  ;;  %v3666_v14 = vadd.f32 %v3041_v24, %v4205_v34  ;;  %v2167_v36 = vpop.f32.mrb[66].mxu1  ;;  %v629_v27 = vpop.f32.mrb[67].mxu0 }
 0x181   :  { %v1342_v8 = vmax.f32 %v620_v35, 0.0  ;;  %v1440_v22 = vmax.f32 %v1110_v41, 0.0  ;;  %v4206_v33 = vmax.f32 %v3247_v58, 0.0  ;;  %v4207_v29 = vmax.f32 %v3253_v49, 0.0  ;;  %v1119_v39 = vpop.f32.mrb[67].mxu1 }
 0x182   :  { %v1585_v43 = vmax.f32 %v1487_v12, %v1536_v37  ;;  %1635 = vst [vmem:[%s4042_s3 + $0x70] sm:$0xff] %v1586_v57  ;;  %v635_v30 = vadd.f32 %v2020_v42, %v3041_v24  ;;  %v1125_v38 = vadd.f32 %v2167_v36, %v3041_v24  ;;  %v4209_v63 = vmax.f32 %v4208_v7, 0.0  ;;  %v2170_v34 = vpop.f32.mrb[68].mxu1 }
 0x183   :  { %v1490_v61 = vmax.f32 %v4206_v33, %v1343_v52  ;;  %v1539_v5 = vmax.f32 %v4207_v29, %v1441_v26  ;;  %v4211_v19 = vmax.f32 %v4210_v21, 0.0  ;;  %v630_v50 = vadd.f32 %v3041_v24, %v629_v27  ;;  %v2023_v26 = vpop.f32.mrb[68].mxu0  ;;  %v1129_v29 = vpop.f32.mrb[69].mxu1 }
 0x184   :  { %1634 = vst [vmem:[%s4042_s3 + $0x68] sm:$0xff] %v1585_v43  ;;  %v1489_v20 = vmax.f32 %v4209_v63, %v1342_v8  ;;  %v1120_v49 = vadd.f32 %v3041_v24, %v1119_v39  ;;  %v1319_v12 = vmax.f32 %v3636_v16, 0.0  ;;  %v1345_v54 = vmax.f32 %v635_v30, 0.0 }
 0x185   :  { %v1538_v58 = vmax.f32 %v4211_v19, %v1440_v22  ;;  %v1588_v40 = vmax.f32 %v1490_v61, %v1539_v5  ;;  %v1443_v37 = vmax.f32 %v1125_v38, 0.0  ;;  %v1417_v35 = vmax.f32 %v3640_v28, 0.0  ;;  %v639_v61 = vpop.f32.mrb[69].mxu0 }
 0x186   :  { %v1344_v57 = vmax.f32 %v630_v50, 0.0  ;;  %v1442_v52 = vmax.f32 %v1120_v49, 0.0  ;;  %v4212_v43 = vmax.f32 %v3267_v59, 0.0  ;;  %v4213_v22 = vmax.f32 %v3277_v46, 0.0  ;;  %v2026_v49 = vpop.f32.mrb[70].mxu0 }
 0x187   :  { %v1587_v41 = vmax.f32 %v1489_v20, %v1538_v58  ;;  %1637 = vst [vmem:[%s4042_s3 + $0x80] sm:$0xff] %v1588_v40  ;;  %v645_v36 = vadd.f32 %v2023_v26, %v3041_v24  ;;  %v1135_v33 = vadd.f32 %v2170_v34, %v3041_v24  ;;  %v4214_v5 = vmax.f32 %v3239_v44, 0.0  ;;  %v2173_v44 = vpop.f32.mrb[70].mxu1 }
 0x188   :  { %v1492_v8 = vmax.f32 %v4212_v43, %v1345_v54  ;;  %v1541_v42 = vmax.f32 %v4213_v22, %v1443_v37  ;;  %v4215_v38 = vmax.f32 %v3243_v55, 0.0  ;;  %v640_v27 = vadd.f32 %v3041_v24, %v639_v61  ;;  %v1139_v26 = vpop.f32.mrb[71].mxu1 }
 0x189   :  { %1636 = vst [vmem:[%s4042_s3 + $0x78] sm:$0xff] %v1587_v41  ;;  %v1491_v30 = vmax.f32 %v4214_v5, %v1344_v57  ;;  %v1130_v46 = vadd.f32 %v3041_v24, %v1129_v29  ;;  %v1318_v39 = vmax.f32 %v3662_v18, 0.0  ;;  %v1347_v63 = vmax.f32 %v645_v36, 0.0  ;;  %v4221_v5 = vld [vmem:[#allocation36_spill] sm:$0xff] }
 0x18a   :  { %v1540_v59 = vmax.f32 %v4215_v38, %v1442_v52  ;;  %v1590_v7 = vmax.f32 %v1492_v8, %v1541_v42  ;;  %v1445_v20 = vmax.f32 %v1135_v33, 0.0  ;;  %v1416_v21 = vmax.f32 %v3666_v14, 0.0  ;;  %v649_v52 = vpop.f32.mrb[71].mxu0  ;;  %v4220_v42 = vld [vmem:[#allocation35_spill] sm:$0xff] }
 0x18b   :  { %v1346_v58 = vmax.f32 %v640_v27, 0.0  ;;  %v1444_v50 = vmax.f32 %v1130_v46, 0.0  ;;  %v4216_v55 = vmax.f32 %v3298_v4, 0.0  ;;  %v4217_v54 = vmax.f32 %v3302_v2, 0.0  ;;  %v2176_v27 = vpop.f32.mrb[72].mxu1  ;;  %v4222_v46 = vld [vmem:[#allocation37_spill] sm:$0xff] }
 0x18c   :  { %v1589_v19 = vmax.f32 %v1491_v30, %v1540_v59  ;;  %1639 = vst [vmem:[%s4042_s3 + $0x90] sm:$0xff] %v1590_v7  ;;  %v655_v41 = vadd.f32 %v2026_v49, %v3041_v24  ;;  %v1145_v57 = vadd.f32 %v2173_v44, %v3041_v24  ;;  %v4218_v34 = vmax.f32 %v3257_v60, 0.0 }
 0x18d   :  { %v1494_v40 = vmax.f32 %v4216_v55, %v1347_v63  ;;  %v1543_v37 = vmax.f32 %v4217_v54, %v1445_v20  ;;  %v4219_v8 = vmax.f32 %v3263_v62, 0.0  ;;  %v650_v22 = vadd.f32 %v3041_v24, %v649_v52  ;;  %v2029_v62 = vpop.f32.mrb[72].mxu0  ;;  %v4224_v20 = vld [vmem:[#allocation38_spill] sm:$0xff]  ;;  %v1149_v55 = vpop.f32.mrb[73].mxu1 }
 0x18e   :  { %1638 = vst [vmem:[%s4042_s3 + $0x88] sm:$0xff] %v1589_v19  ;;  %v1493_v43 = vmax.f32 %v4218_v34, %v1346_v58  ;;  %v1140_v2 = vadd.f32 %v3041_v24, %v1139_v26  ;;  %v3728_v36 = vadd.f32 %v4220_v42, %v3041_v24  ;;  %v1349_v61 = vmax.f32 %v655_v41, 0.0  ;;  %v659_v44 = vpop.f32.mrb[73].mxu0  ;;  %v4228_v41 = vld [vmem:[#allocation32_spill] sm:$0xff] }
 0x18f   :  { %v1542_v4 = vmax.f32 %v4219_v8, %v1444_v50  ;;  %v1592_v33 = vmax.f32 %v1494_v40, %v1543_v37  ;;  %v1447_v29 = vmax.f32 %v1145_v57, 0.0  ;;  %v3732_v30 = vadd.f32 %v4221_v5, %v3041_v24  ;;  %v4226_v40 = vld [vmem:[#allocation30_spill] sm:$0xff]  ;;  %v4231_v42 = vld [vmem:[#allocation40_spill] sm:$0xff] }
 0x190   :  { %v1348_v38 = vmax.f32 %v650_v22, 0.0  ;;  %v1446_v59 = vmax.f32 %v1140_v2, 0.0  ;;  %v4223_v7 = vmax.f32 %v4222_v46, 0.0  ;;  %v4225_v19 = vmax.f32 %v4224_v20, 0.0 }
 0x191   :  { %v1591_v60 = vmax.f32 %v1493_v43, %v1542_v4  ;;  %1641 = vst [vmem:[%s4042_s3 + $0xa0] sm:$0xff] %v1592_v33  ;;  %v665_v50 = vadd.f32 %v2029_v62, %v3041_v24  ;;  %v1155_v49 = vadd.f32 %v2176_v27, %v3041_v24  ;;  %v4227_v54 = vmax.f32 %v4226_v40, 0.0  ;;  %v4230_v43 = vld [vmem:[#allocation39_spill] sm:$0xff] }
 0x192   :  { %v1496_v63 = vmax.f32 %v4223_v7, %v1349_v61  ;;  %v1545_v58 = vmax.f32 %v4225_v19, %v1447_v29  ;;  %v4229_v57 = vmax.f32 %v4228_v41, 0.0  ;;  %v660_v26 = vadd.f32 %v3041_v24, %v659_v44  ;;  %v4236_v44 = vld [vmem:[#allocation34_spill] sm:$0xff] }
 0x193   :  { %1640 = vst [vmem:[%s4042_s3 + $0x98] sm:$0xff] %v1591_v60  ;;  %v1495_v37 = vmax.f32 %v4227_v54, %v1348_v38  ;;  %v1150_v34 = vadd.f32 %v3041_v24, %v1149_v55  ;;  %v3754_v8 = vadd.f32 %v3041_v24, %v4230_v43  ;;  %v1351_v22 = vmax.f32 %v665_v50, 0.0  ;;  %v2032_v60 = vpop.f32.mrb[74].mxu0  ;;  %v2179_v38 = vpop.f32.mrb[74].mxu1 }
 0x194   :  { %v1544_v52 = vmax.f32 %v4229_v57, %v1446_v59  ;;  %v1594_v4 = vmax.f32 %v1496_v63, %v1545_v58  ;;  %v1449_v2 = vmax.f32 %v1155_v49, 0.0  ;;  %v3758_v33 = vadd.f32 %v3041_v24, %v4231_v42  ;;  %v669_v20 = vpop.f32.mrb[75].mxu0  ;;  %v1159_v19 = vpop.f32.mrb[75].mxu1  ;;  %v4234_v58 = vld [vmem:[#allocation33_spill] sm:$0xff] }
 0x195   :  { %v1350_v29 = vmax.f32 %v660_v26, 0.0  ;;  %v1448_v5 = vmax.f32 %v1150_v34, 0.0  ;;  %v4232_v59 = vmax.f32 %v3343_v10, 0.0  ;;  %v4233_v27 = vmax.f32 %v3349_v9, 0.0 }
 0x196   :  { %v1593_v61 = vmax.f32 %v1495_v37, %v1544_v52  ;;  %1643 = vst [vmem:[%s4042_s3 + $0xb0] sm:$0xff] %v1594_v4  ;;  %v675_v7 = vadd.f32 %v2032_v60, %v3041_v24  ;;  %v1165_v63 = vadd.f32 %v2179_v38, %v3041_v24  ;;  %v4235_v50 = vmax.f32 %v4234_v58, 0.0  ;;  %v2035_v4 = vpop.f32.mrb[76].mxu0 }
 0x197   :  { %v1498_v62 = vmax.f32 %v4232_v59, %v1351_v22  ;;  %v1547_v46 = vmax.f32 %v4233_v27, %v1449_v2  ;;  %v4237_v55 = vmax.f32 %v4236_v44, 0.0  ;;  %v670_v40 = vadd.f32 %v3041_v24, %v669_v20  ;;  %v2182_v22 = vpop.f32.mrb[76].mxu1  ;;  %v4238_v2 = vld [vmem:[#allocation2_spill] sm:$0xff]  ;;  %v679_v59 = vpop.f32.mrb[77].mxu0  ;;  %v4241_v27 = vld [vmem:[#allocation41_spill] sm:$0xff] }
 0x198   :  { %1642 = vst [vmem:[%s4042_s3 + $0xa8] sm:$0xff] %v1593_v61  ;;  %v1497_v49 = vmax.f32 %v4235_v50, %v1350_v29  ;;  %v1160_v9 = vadd.f32 %v3041_v24, %v1159_v19  ;;  %v1321_v54 = vmax.f32 %v3728_v36, 0.0  ;;  %v1353_v41 = vmax.f32 %v675_v7, 0.0 }
 0x199   :  { %v1546_v10 = vmax.f32 %v4237_v55, %v1448_v5  ;;  %v1596_v37 = vmax.f32 %v1498_v62, %v1547_v46  ;;  %v1451_v57 = vmax.f32 %v1165_v63, 0.0  ;;  %v1419_v52 = vmax.f32 %v3732_v30, 0.0  ;;  %v1169_v62 = vpop.f32.mrb[77].mxu1  ;;  %v4243_v63 = vld [vmem:[#allocation42_spill] sm:$0xff] }
 0x19a   :  { %v1352_v34 = vmax.f32 %v670_v40, 0.0  ;;  %v1450_v43 = vmax.f32 %v1160_v9, 0.0  ;;  %v4239_v42 = vmax.f32 %v4238_v2, 0.0  ;;  %v4240_v29 = vmax.f32 %v3373_v56, 0.0 }
 0x19b   :  { %v1595_v26 = vmax.f32 %v1497_v49, %v1546_v10  ;;  %1645 = vst [vmem:[%s4042_s3 + $0xc0] sm:$0xff] %v1596_v37  ;;  %v685_v60 = vadd.f32 %v2035_v4, %v3041_v24  ;;  %v1175_v38 = vadd.f32 %v2182_v22, %v3041_v24  ;;  %v4242_v46 = vmax.f32 %v4241_v27, 0.0  ;;  %v4247_v4 = vld [vmem:[#allocation7_spill] sm:$0xff] }
 0x19c   :  { %v1500_v61 = vmax.f32 %v4239_v42, %v1353_v41  ;;  %v1549_v5 = vmax.f32 %v4240_v29, %v1451_v57  ;;  %v4244_v20 = vmax.f32 %v4243_v63, 0.0  ;;  %v680_v58 = vadd.f32 %v3041_v24, %v679_v59  ;;  %v2038_v41 = vpop.f32.mrb[78].mxu0  ;;  %v2185_v57 = vpop.f32.mrb[78].mxu1 }
 0x19d   :  { %1644 = vst [vmem:[%s4042_s3 + $0xb8] sm:$0xff] %v1595_v26  ;;  %v1499_v7 = vmax.f32 %v4242_v46, %v1352_v34  ;;  %v1170_v56 = vadd.f32 %v3041_v24, %v1169_v62  ;;  %v1320_v50 = vmax.f32 %v3754_v8, 0.0  ;;  %v1355_v44 = vmax.f32 %v685_v60, 0.0  ;;  %v4245_v26 = vld [vmem:[#allocation6_spill] sm:$0xff]  ;;  %v689_v29 = vpop.f32.mrb[79].mxu0  ;;  %v4249_v60 = vld [vmem:[#allocation43_spill] sm:$0xff] }
 0x19e   :  { %v1548_v19 = vmax.f32 %v4244_v20, %v1450_v43  ;;  %v1598_v49 = vmax.f32 %v1500_v61, %v1549_v5  ;;  %v1453_v55 = vmax.f32 %v1175_v38, 0.0  ;;  %v1418_v10 = vmax.f32 %v3758_v33, 0.0  ;;  %v1179_v5 = vpop.f32.mrb[79].mxu1  ;;  %v4251_v62 = vld [vmem:[#allocation44_spill] sm:$0xff]  ;;  %v4253_v20 = vld [vmem:[#allocation45_spill] sm:$0xff] }
 0x19f   :  { %v1354_v9 = vmax.f32 %v680_v58, 0.0  ;;  %v1452_v37 = vmax.f32 %v1170_v56, 0.0  ;;  %v4246_v34 = vmax.f32 %v4245_v26, 0.0  ;;  %v4248_v22 = vmax.f32 %v4247_v4, 0.0  ;;  %v2188_v26 = vpop.f32.mrb[80].mxu1 }
 0x1a0   :  { %v1597_v40 = vmax.f32 %v1499_v7, %v1548_v19  ;;  %1647 = vst [vmem:[%s4042_s3 + $0xd0] sm:$0xff] %v1598_v49  ;;  %v695_v42 = vadd.f32 %v2038_v41, %v3041_v24  ;;  %v1185_v61 = vadd.f32 %v2185_v57, %v3041_v24  ;;  %v4250_v38 = vmax.f32 %v4249_v60, 0.0  ;;  %v2041_v57 = vpop.f32.mrb[80].mxu0 }
 0x1a1   :  { %v1502_v43 = vmax.f32 %v4246_v34, %v1355_v44  ;;  %v1551_v2 = vmax.f32 %v4248_v22, %v1453_v55  ;;  %v4252_v27 = vmax.f32 %v4251_v62, 0.0  ;;  %v690_v7 = vadd.f32 %v3041_v24, %v689_v29  ;;  %v3825_v44 = vld [vmem:[%s4041_s2] ss:$0 sm:$0xff]  ;;  %v4257_v29 = vld [vmem:[#allocation3_spill] sm:$0xff] }
 0x1a2   :  { %1646 = vst [vmem:[%s4042_s3 + $0xc8] sm:$0xff] %v1597_v40  ;;  %v1501_v59 = vmax.f32 %v4250_v38, %v1354_v9  ;;  %v1180_v63 = vadd.f32 %v3041_v24, %v1179_v5  ;;  %v3820_v19 = vadd.f32 %v4253_v20, %v3041_v24  ;;  %v1357_v56 = vmax.f32 %v695_v42, 0.0  ;;  %v4254_v55 = vld [vmem:[#allocation46_spill] sm:$0xff]  ;;  %v699_v42 = vpop.f32.mrb[81].mxu0  ;;  %v4259_v38 = vld [vmem:[#allocation5_spill] sm:$0xff] }
 0x1a3   :  { %v1550_v46 = vmax.f32 %v4252_v27, %v1452_v37  ;;  %v1600_v58 = vmax.f32 %v1502_v43, %v1551_v2  ;;  %v1455_v49 = vmax.f32 %v1185_v61, 0.0  ;;  %v3829_v40 = vadd.f32 %v3825_v44, %v4254_v55  ;;  %v1189_v61 = vpop.f32.mrb[81].mxu1  ;;  %v4261_v27 = vld [vmem:[#allocation4_spill] sm:$0xff] }
 0x1a4   :  { %v1356_v37 = vmax.f32 %v690_v7, 0.0  ;;  %v1454_v41 = vmax.f32 %v1180_v63, 0.0  ;;  %v4255_v24 = vmax.f32 %v3418_v15, 0.0  ;;  %v4256_v43 = vmax.f32 %v3422_v0, 0.0 }
 0x1a5   :  { %v1599_v9 = vmax.f32 %v1501_v59, %v1550_v46  ;;  %1649 = vst [vmem:[%s4042_s3 + $0xe0] sm:$0xff] %v1600_v58  ;;  %v705_v22 = vadd.f32 %v3825_v44, %v2041_v57  ;;  %v1195_v2 = vadd.f32 %v3825_v44, %v2188_v26  ;;  %v4258_v5 = vmax.f32 %v4257_v29, 0.0  ;;  %v4262_v58 = vld [vmem:[#allocation47_spill] sm:$0xff] }
 0x1a6   :  { %v1504_v34 = vmax.f32 %v4255_v24, %v1357_v56  ;;  %v1553_v4 = vmax.f32 %v4256_v43, %v1455_v49  ;;  %v4260_v59 = vmax.f32 %v4259_v38, 0.0  ;;  %v700_v62 = vadd.f32 %v3825_v44, %v699_v42  ;;  %v4265_v42 = vld [vmem:[#allocation8_spill] sm:$0xff] }
 0x1a7   :  { %1648 = vst [vmem:[%s4042_s3 + $0xd8] sm:$0xff] %v1599_v9  ;;  %v1503_v60 = vmax.f32 %v4258_v5, %v1356_v37  ;;  %v1190_v0 = vadd.f32 %v3825_v44, %v1189_v61  ;;  %v3851_v46 = vadd.f32 %v3825_v44, %v4261_v27  ;;  %v1359_v63 = vmax.f32 %v705_v22, 0.0  ;;  %v2044_v37 = vpop.f32.mrb[82].mxu0  ;;  %v4267_v5 = vld [vmem:[#allocation9_spill] sm:$0xff] }
 0x1a8   :  { %v1552_v15 = vmax.f32 %v4260_v59, %v1454_v41  ;;  %v1602_v7 = vmax.f32 %v1504_v34, %v1553_v4  ;;  %v1457_v20 = vmax.f32 %v1195_v2, 0.0  ;;  %v3855_v56 = vadd.f32 %v3825_v44, %v4262_v58  ;;  %v2191_v41 = vpop.f32.mrb[82].mxu1  ;;  %v709_v22 = vpop.f32.mrb[83].mxu0 }
 0x1a9   :  { %v1358_v55 = vmax.f32 %v700_v62, 0.0  ;;  %v1456_v9 = vmax.f32 %v1190_v0, 0.0  ;;  %v4263_v57 = vmax.f32 %v3439_v6, 0.0  ;;  %v4264_v24 = vmax.f32 %v3445_v1, 0.0  ;;  %v1199_v2 = vpop.f32.mrb[83].mxu1  ;;  %v2047_v58 = vpop.f32.mrb[84].mxu0 }
 0x1aa   :  { %v1601_v49 = vmax.f32 %v1503_v60, %v1552_v15  ;;  %1651 = vst [vmem:[%s4042_s3 + $0xf0] sm:$0xff] %v1602_v7  ;;  %v715_v43 = vadd.f32 %v3825_v44, %v2044_v37  ;;  %v1205_v4 = vadd.f32 %v3825_v44, %v2191_v41  ;;  %v4266_v61 = vmax.f32 %v4265_v42, 0.0  ;;  %v4270_v37 = vld [vmem:[#allocation53_spill] sm:$0xff]  ;;  %v4274_v42 = vld [vmem:[#allocation15_spill] sm:$0xff] }
 0x1ab   :  { %v1506_v26 = vmax.f32 %v4263_v57, %v1359_v63  ;;  %v1555_v34 = vmax.f32 %v4264_v24, %v1457_v20  ;;  %v4268_v60 = vmax.f32 %v4267_v5, 0.0  ;;  %v710_v38 = vadd.f32 %v3825_v44, %v709_v22 }
 0x1ac   :  { %1650 = vst [vmem:[%s4042_s3 + $0xe8] sm:$0xff] %v1601_v49  ;;  %v1505_v29 = vmax.f32 %v4266_v61, %v1358_v55  ;;  %v1200_v1 = vadd.f32 %v3825_v44, %v1199_v2  ;;  %v1323_v59 = vmax.f32 %v3820_v19, 0.0  ;;  %v1361_v62 = vmax.f32 %v715_v43, 0.0  ;;  %v2194_v49 = vpop.f32.mrb[84].mxu1 }
 0x1ad   :  { %v1554_v6 = vmax.f32 %v4268_v60, %v1456_v9  ;;  %v1604_v15 = vmax.f32 %v1506_v26, %v1555_v34  ;;  %v1459_v0 = vmax.f32 %v1205_v4, 0.0  ;;  %v1421_v27 = vmax.f32 %v3829_v40, 0.0  ;;  %v719_v34 = vpop.f32.mrb[85].mxu0  ;;  %v1209_v43 = vpop.f32.mrb[85].mxu1  ;;  %v4272_v4 = vld [vmem:[#allocation14_spill] sm:$0xff] }
 0x1ae   :  { %v1360_v63 = vmax.f32 %v710_v38, 0.0  ;;  %v1458_v20 = vmax.f32 %v1200_v1, 0.0  ;;  %v4269_v55 = vmax.f32 %v3459_v48, 0.0  ;;  %v4271_v41 = vmax.f32 %v4270_v37, 0.0 }
 0x1af   :  { %v1603_v7 = vmax.f32 %v1505_v29, %v1554_v6  ;;  %1653 = vst [vmem:[%s4042_s3 + $0x100] sm:$0xff] %v1604_v15  ;;  %v725_v26 = vadd.f32 %v3825_v44, %v2047_v58  ;;  %v1215_v24 = vadd.f32 %v3825_v44, %v2194_v49  ;;  %v4273_v22 = vmax.f32 %v4272_v4, 0.0  ;;  %v2050_v58 = vpop.f32.mrb[86].mxu0  ;;  %v2197_v49 = vpop.f32.mrb[86].mxu1 }
 0x1b0   :  { %v1508_v9 = vmax.f32 %v4269_v55, %v1361_v62  ;;  %v1557_v57 = vmax.f32 %v4271_v41, %v1459_v0  ;;  %v4275_v61 = vmax.f32 %v4274_v42, 0.0  ;;  %v720_v29 = vadd.f32 %v3825_v44, %v719_v34  ;;  %v729_v37 = vpop.f32.mrb[87].mxu0  ;;  %v1219_v41 = vpop.f32.mrb[87].mxu1  ;;  %v4278_v34 = vld [vmem:[#allocation50_spill] sm:$0xff] }
 0x1b1   :  { %1652 = vst [vmem:[%s4042_s3 + $0xf8] sm:$0xff] %v1603_v7  ;;  %v1507_v2 = vmax.f32 %v4273_v22, %v1360_v63  ;;  %v1210_v5 = vadd.f32 %v3825_v44, %v1209_v43  ;;  %v1322_v60 = vmax.f32 %v3851_v46, 0.0  ;;  %v1363_v38 = vmax.f32 %v725_v26, 0.0 }
 0x1b2   :  { %v1556_v48 = vmax.f32 %v4275_v61, %v1458_v20  ;;  %v1606_v6 = vmax.f32 %v1508_v9, %v1557_v57  ;;  %v1461_v1 = vmax.f32 %v1215_v24, 0.0  ;;  %v1420_v15 = vmax.f32 %v3855_v56, 0.0  ;;  %v4276_v57 = vld [vmem:[#allocation17_spill] sm:$0xff] }
 0x1b3   :  { %v1362_v0 = vmax.f32 %v720_v29, 0.0  ;;  %v1460_v7 = vmax.f32 %v1210_v5, 0.0  ;;  %v1510_v63 = vmax.f32 %v1314_v17, %v1363_v38  ;;  %v735_v55 = vadd.f32 %v3825_v44, %v2050_v58  ;;  %v4281_v61 = vld [vmem:[#allocation49_spill] sm:$0xff]  ;;  %v2053_v38 = vpop.f32.mrb[88].mxu0 }
 0x1b4   :  { %v1605_v62 = vmax.f32 %v1507_v2, %v1556_v48  ;;  %1655 = vst [vmem:[%s4042_s3 + $0x110] sm:$0xff] %v1606_v6  ;;  %v1559_v20 = vmax.f32 %v1412_v11, %v1461_v1  ;;  %v1225_v9 = vadd.f32 %v3825_v44, %v2197_v49  ;;  %v4277_v26 = vmax.f32 %v4276_v57, 0.0  ;;  %v4280_v11 = vld [vmem:[#allocation48_spill] sm:$0xff]  ;;  %v2200_v1 = vpop.f32.mrb[88].mxu1  ;;  %v739_v49 = vpop.f32.mrb[89].mxu0 }
 0x1b5   :  { %v4279_v43 = vmax.f32 %v4278_v34, 0.0  ;;  %v730_v17 = vadd.f32 %v3825_v44, %v729_v37  ;;  %v1220_v25 = vadd.f32 %v3825_v44, %v1219_v41  ;;  %v3917_v4 = vadd.f32 %v3825_v44, %v4280_v11  ;;  %v4284_v37 = vld [vmem:[#allocation55_spill] sm:$0xff] }
 0x1b6   :  { %1654 = vst [vmem:[%s4042_s3 + $0x108] sm:$0xff] %v1605_v62  ;;  %v1509_v24 = vmax.f32 %v4277_v26, %v1362_v0  ;;  %v1608_v22 = vmax.f32 %v1510_v63, %v1559_v20  ;;  %v1365_v2 = vmax.f32 %v735_v55, 0.0  ;;  %v1463_v42 = vmax.f32 %v1225_v9, 0.0  ;;  %v1229_v63 = vpop.f32.mrb[89].mxu1  ;;  %v4282_v20 = vld [vmem:[#allocation54_spill] sm:$0xff] }
 0x1b7   :  { %v1558_v47 = vmax.f32 %v4279_v43, %v1460_v7  ;;  %v3921_v48 = vadd.f32 %v3825_v44, %v4281_v61  ;;  %v1364_v5 = vmax.f32 %v730_v17, 0.0  ;;  %v1462_v6 = vmax.f32 %v1220_v25, 0.0  ;;  %v4287_v43 = vld [vmem:[#allocation11_spill] sm:$0xff] }
 0x1b8   :  { %1657 = vst [vmem:[%s4042_s3 + $0x120] sm:$0xff] %v1608_v22  ;;  %v1512_v62 = vmax.f32 %v1316_v13, %v1365_v2  ;;  %v1561_v0 = vmax.f32 %v1414_v32, %v1463_v42  ;;  %v745_v7 = vadd.f32 %v3825_v44, %v2053_v38  ;;  %v1235_v58 = vadd.f32 %v3825_v44, %v2200_v1  ;;  %v4286_v32 = vld [vmem:[#allocation10_spill] sm:$0xff]  ;;  %v2056_v22 = vpop.f32.mrb[90].mxu0  ;;  %v2203_v2 = vpop.f32.mrb[90].mxu1 }
 0x1b9   :  { %v1607_v29 = vmax.f32 %v1509_v24, %v1558_v47  ;;  %v4283_v55 = vmax.f32 %v4282_v20, 0.0  ;;  %v4285_v41 = vmax.f32 %v4284_v37, 0.0  ;;  %v740_v13 = vadd.f32 %v3825_v44, %v739_v49  ;;  %v1239_v38 = vpop.f32.mrb[91].mxu1 }
 0x1ba   :  { %v1230_v45 = vadd.f32 %v3825_v44, %v1229_v63  ;;  %v3943_v57 = vadd.f32 %v3825_v44, %v4286_v32  ;;  %v1610_v26 = vmax.f32 %v1512_v62, %v1561_v0  ;;  %v1367_v24 = vmax.f32 %v745_v7, 0.0  ;;  %v2206_v53 = vpop.f32.mrb[92].mxu1 }
 0x1bb   :  { %1656 = vst [vmem:[%s4042_s3 + $0x118] sm:$0xff] %v1607_v29  ;;  %v1511_v9 = vmax.f32 %v4283_v55, %v1364_v5  ;;  %v1560_v31 = vmax.f32 %v4285_v41, %v1462_v6  ;;  %v1465_v34 = vmax.f32 %v1235_v58, 0.0  ;;  %v3947_v47 = vadd.f32 %v3825_v44, %v4287_v43  ;;  %v749_v6 = vpop.f32.mrb[91].mxu0  ;;  %v1249_v41 = vpop.f32.mrb[93].mxu1 }
 0x1bc   :  { %v1366_v25 = vmax.f32 %v740_v13, 0.0  ;;  %v1464_v11 = vmax.f32 %v1230_v45, 0.0  ;;  %1659 = vst [vmem:[%s4042_s3 + $0x130] sm:$0xff] %v1610_v26  ;;  %v1514_v42 = vmax.f32 %v1318_v39, %v1367_v24  ;;  %v755_v29 = vadd.f32 %v3825_v44, %v2056_v22  ;;  %v2059_v55 = vpop.f32.mrb[92].mxu0 }
 0x1bd   :  { %v1609_v17 = vmax.f32 %v1511_v9, %v1560_v31  ;;  %v1563_v61 = vmax.f32 %v1416_v21, %v1465_v34  ;;  %v1245_v5 = vadd.f32 %v3825_v44, %v2203_v2  ;;  %v750_v39 = vadd.f32 %v3825_v44, %v749_v6  ;;  %v759_v37 = vpop.f32.mrb[93].mxu0 }
 0x1be   :  { %v1513_v1 = vmax.f32 %v1317_v51, %v1366_v25  ;;  %v1562_v18 = vmax.f32 %v1415_v23, %v1464_v11  ;;  %v1240_v14 = vadd.f32 %v3825_v44, %v1239_v38  ;;  %v1325_v21 = vmax.f32 %v3917_v4, 0.0  ;;  %v2062_v16 = vpop.f32.mrb[94].mxu0 }
 0x1bf   :  { %1658 = vst [vmem:[%s4042_s3 + $0x128] sm:$0xff] %v1609_v17  ;;  %v1612_v62 = vmax.f32 %v1514_v42, %v1563_v61  ;;  %v1369_v0 = vmax.f32 %v755_v29, 0.0  ;;  %v1467_v7 = vmax.f32 %v1245_v5, 0.0  ;;  %v1324_v58 = vmax.f32 %v3943_v57, 0.0  ;;  %v4288_v57 = vld [vmem:[#allocation51_spill] sm:$0xff]  ;;  %v769_v25 = vpop.f32.mrb[95].mxu0 }
 0x1c0   :  { %v1611_v49 = vmax.f32 %v1513_v1, %v1562_v18  ;;  %v1368_v63 = vmax.f32 %v750_v39, 0.0  ;;  %v1466_v20 = vmax.f32 %v1240_v14, 0.0  ;;  %v765_v23 = vadd.f32 %v3825_v44, %v2059_v55  ;;  %v2065_v18 = vpop.f32.mrb[96].mxu0 }
 0x1c1   :  { %1661 = vst [vmem:[%s4042_s3 + $0x140] sm:$0xff] %v1612_v62  ;;  %v1516_v3 = vmax.f32 %v1320_v50, %v1369_v0  ;;  %v1565_v51 = vmax.f32 %v1418_v10, %v1467_v7  ;;  %v1255_v9 = vadd.f32 %v3825_v44, %v2206_v53  ;;  %v760_v50 = vadd.f32 %v3825_v44, %v759_v37  ;;  %v779_v14 = vpop.f32.mrb[97].mxu0 }
 0x1c2   :  { %1660 = vst [vmem:[%s4042_s3 + $0x138] sm:$0xff] %v1611_v49  ;;  %v1515_v31 = vmax.f32 %v1319_v12, %v1368_v63  ;;  %v1564_v8 = vmax.f32 %v1417_v35, %v1466_v20  ;;  %v1250_v33 = vadd.f32 %v3825_v44, %v1249_v41  ;;  %v1422_v10 = vmax.f32 %v3947_v47, 0.0  ;;  %v2209_v12 = vpop.f32.mrb[94].mxu1 }
 0x1c3   :  { %v1614_v13 = vmax.f32 %v1516_v3, %v1565_v51  ;;  %v1371_v45 = vmax.f32 %v765_v23, 0.0  ;;  %v1469_v32 = vmax.f32 %v1255_v9, 0.0  ;;  %v540_v26 = vadd.f32 %v3825_v44, %v4288_v57  ;;  %v1259_v11 = vpop.f32.mrb[95].mxu1 }
 0x1c4   :  { %v1613_v24 = vmax.f32 %v1515_v31, %v1564_v8  ;;  %v1370_v34 = vmax.f32 %v760_v50, 0.0  ;;  %v1468_v43 = vmax.f32 %v1250_v33, 0.0  ;;  %v775_v47 = vadd.f32 %v3825_v44, %v2062_v16  ;;  %v2212_v36 = vpop.f32.mrb[96].mxu1 }
 0x1c5   :  { %1663 = vst [vmem:[%s4042_s3 + $0x150] sm:$0xff] %v1614_v13  ;;  %v1518_v28 = vmax.f32 %v1322_v60, %v1371_v45  ;;  %v1567_v35 = vmax.f32 %v1420_v15, %v1469_v32  ;;  %v1265_v17 = vadd.f32 %v3825_v44, %v2209_v12  ;;  %v770_v60 = vadd.f32 %v3825_v44, %v769_v25  ;;  %v4289_v15 = vld [vmem:[#allocation52_spill] sm:$0xff]  ;;  %v1269_v62 = vpop.f32.mrb[97].mxu1 }
 0x1c6   :  { %1662 = vst [vmem:[%s4042_s3 + $0x148] sm:$0xff] %v1613_v24  ;;  %v1517_v22 = vmax.f32 %v1321_v54, %v1370_v34  ;;  %v1566_v46 = vmax.f32 %v1419_v52, %v1468_v43  ;;  %v1260_v56 = vadd.f32 %v3825_v44, %v1259_v11  ;;  %v1030_v2 = vadd.f32 %v3825_v44, %v4289_v15 }
 0x1c7   :  { %v1616_v42 = vmax.f32 %v1518_v28, %v1567_v35  ;;  %v1373_v61 = vmax.f32 %v775_v47, 0.0  ;;  %v1471_v29 = vmax.f32 %v1265_v17, 0.0  ;;  %v1326_v5 = vmax.f32 %v540_v26, 0.0 }
 0x1c8   :  { %v1615_v6 = vmax.f32 %v1517_v22, %v1566_v46  ;;  %v1372_v38 = vmax.f32 %v770_v60, 0.0  ;;  %v1470_v1 = vmax.f32 %v1260_v56, 0.0  ;;  %v785_v52 = vadd.f32 %v3825_v44, %v2065_v18 }
 0x1c9   :  { %1665 = vst [vmem:[%s4042_s3 + $0x160] sm:$0xff] %v1616_v42  ;;  %v1520_v30 = vmax.f32 %v1324_v58, %v1373_v61  ;;  %v1569_v54 = vmax.f32 %v1422_v10, %v1471_v29  ;;  %v1275_v39 = vadd.f32 %v3825_v44, %v2212_v36  ;;  %v780_v49 = vadd.f32 %v3825_v44, %v779_v14 }
 0x1ca   :  { %1664 = vst [vmem:[%s4042_s3 + $0x158] sm:$0xff] %v1615_v6  ;;  %v1519_v0 = vmax.f32 %v1323_v59, %v1372_v38  ;;  %v1568_v7 = vmax.f32 %v1421_v27, %v1470_v1  ;;  %v1270_v58 = vadd.f32 %v3825_v44, %v1269_v62  ;;  %v1424_v63 = vmax.f32 %v1030_v2, 0.0 }
 0x1cb   :  { %v1618_v20 = vmax.f32 %v1520_v30, %v1569_v54  ;;  %v1375_v55 = vmax.f32 %v785_v52, 0.0  ;;  %v1473_v53 = vmax.f32 %v1275_v39, 0.0  ;;  %v1423_v3 = vmax.f32 %v3921_v48, 0.0 }
 0x1cc   :  { %v1617_v51 = vmax.f32 %v1519_v0, %v1568_v7  ;;  %v1374_v23 = vmax.f32 %v780_v49, 0.0  ;;  %v1472_v9 = vmax.f32 %v1270_v58, 0.0 }
 0x1cd   :  { %1667 = vst [vmem:[%s4042_s3 + $0x170] sm:$0xff] %v1618_v20  ;;  %v1522_v19 = vmax.f32 %v1326_v5, %v1375_v55  ;;  %v1571_v40 = vmax.f32 %v1424_v63, %v1473_v53 }
 0x1ce   :  { %1666 = vst [vmem:[%s4042_s3 + $0x168] sm:$0xff] %v1617_v51  ;;  %v1521_v44 = vmax.f32 %v1325_v21, %v1374_v23  ;;  %v1570_v59 = vmax.f32 %v1423_v3, %v1472_v9 }
 0x1cf   :  { %v1620_v27 = vmax.f32 %v1522_v19, %v1571_v40 }
 0x1d0   :  { %v1619_v37 = vmax.f32 %v1521_v44, %v1570_v59 }
 0x1d1   :  { %1669 = vst [vmem:[%s4042_s3 + $0x180] sm:$0xff] %v1620_v27 }
 0x1d2   :  { %1668 = vst [vmem:[%s4042_s3 + $0x178] sm:$0xff] %v1619_v37 }

// kernel: convnet_forward.3
= control target key start
LH: loop header
LB: loop body
LE: loop exit
PB: predicated region body
PF: predicated region fallthrough
CT: control target
= control target key end

     0   :  { %v8745_v0 = vmov 0.0|0.0   ;;  %vm5902_vm0 = vmmov 0   ;;  %s8735_s1 = inlined_call_operand.vmem [shape: f32[256,128], index: 1, kind: input, shape index: {}]   ;;  %s8736_s0 = inlined_call_operand.vmem [shape: f32[800,256], index: 0, kind: input, shape index: {}]   ;;  %s8737_s2 = inlined_call_operand.vmem [shape: f32[1,128], index: 2, kind: input, shape index: {}]   ;;  %s8738_s3 = inlined_call_operand.vmem [shape: f32[25,128,128], index: 3, kind: input, shape index: {}]   ;;  %s8739_s5 = inlined_call_operand.vmem [shape: f32[128,128], index: 5, kind: input, shape index: {}]   ;;  %s8740_s7 = inlined_call_operand.vmem [shape: f32[128,128], index: 7, kind: input, shape index: {}]   ;;  %s8741_s4 = inlined_call_operand.vmem [shape: f32[1,128], index: 4, kind: input, shape index: {}]   ;;  %s8742_s6 = inlined_call_operand.vmem [shape: f32[1,128], index: 6, kind: input, shape index: {}]   ;;  %s8743_s8 = inlined_call_operand.vmem [shape: f32[1,128], index: 8, kind: input, shape index: {}]   ;;  %s8744_s9 = inlined_call_operand.vmem [shape: f32[8,128], index: 9, kind: output, shape index: {}]  }
   0x1   :  { %5201 = vmatprep.subr.bf16.mxu0 %v8745_v0  ;;  %v232_v1 = vld [vmem:[%s8735_s1] sm:$0xff]  ;;  %v233_v2 = vld [vmem:[%s8735_s1 + $0x8] sm:$0xff]  ;;  %v234_v3 = vld [vmem:[%s8735_s1 + $0x10] sm:$0xff]  ;;  %5249 = vmatprep.subr.bf16.mxu1 %v8745_v0 }
   0x2   :  { %v5202_v4 = vpack.c.bf16 %v233_v2, %v232_v1  ;;  %v235_v5 = vld [vmem:[%s8735_s1 + $0x18] sm:$0xff]  ;;  %v236_v7 = vld [vmem:[%s8735_s1 + $0x20] sm:$0xff]  ;;  %v237_v8 = vld [vmem:[%s8735_s1 + $0x28] sm:$0xff] }
   0x3   :  { %v5205_v6 = vpack.c.bf16 %v235_v5, %v234_v3  ;;  %v5208_v9 = vpack.c.bf16 %v237_v8, %v236_v7  ;;  %v238_v10 = vld [vmem:[%s8735_s1 + $0x30] sm:$0xff]  ;;  %v239_v11 = vld [vmem:[%s8735_s1 + $0x38] sm:$0xff]  ;;  %v33_v12 = vld [vmem:[%s8736_s0 + $0x8] sm:$0xff] }
   0x4   :  { %5203 = vmatpush1.bf16.msra.mxu0 %v5202_v4  ;;  %v5211_v13 = vpack.c.bf16 %v239_v11, %v238_v10  ;;  %335 = vmatprep.mubr.f32.mxu0 %v33_v12  ;;  %v240_v14 = vld [vmem:[%s8735_s1 + $0x40] sm:$0xff]  ;;  %v241_v15 = vld [vmem:[%s8735_s1 + $0x48] sm:$0xff]  ;;  %v242_v17 = vld [vmem:[%s8735_s1 + $0x50] sm:$0xff] }
   0x5   :  { %5204 = vmatprep.subr.bf16.mxu0 %v8745_v0  ;;  %v5214_v16 = vpack.c.bf16 %v241_v15, %v240_v14  ;;  %v243_v18 = vld [vmem:[%s8735_s1 + $0x58] sm:$0xff]  ;;  %v244_v20 = vld [vmem:[%s8735_s1 + $0x60] sm:$0xff]  ;;  %v245_v21 = vld [vmem:[%s8735_s1 + $0x68] sm:$0xff] }
   0x6   :  { %v5217_v19 = vpack.c.bf16 %v243_v18, %v242_v17  ;;  %v5220_v22 = vpack.c.bf16 %v245_v21, %v244_v20  ;;  %v246_v23 = vld [vmem:[%s8735_s1 + $0x70] sm:$0xff]  ;;  %v247_v24 = vld [vmem:[%s8735_s1 + $0x78] sm:$0xff]  ;;  %v248_v26 = vld [vmem:[%s8735_s1 + $0x80] sm:$0xff] }
   0x7   :  { %v5223_v25 = vpack.c.bf16 %v247_v24, %v246_v23  ;;  %v249_v27 = vld [vmem:[%s8735_s1 + $0x88] sm:$0xff]  ;;  %v250_v29 = vld [vmem:[%s8735_s1 + $0x90] sm:$0xff]  ;;  %v251_v30 = vld [vmem:[%s8735_s1 + $0x98] sm:$0xff] }
   0x8   :  { %5206 = vmatpush1.bf16.msra.mxu0 %v5205_v6  ;;  %v5226_v28 = vpack.c.bf16 %v249_v27, %v248_v26  ;;  %v5229_v31 = vpack.c.bf16 %v251_v30, %v250_v29  ;;  %v252_v32 = vld [vmem:[%s8735_s1 + $0xa0] sm:$0xff]  ;;  %v253_v33 = vld [vmem:[%s8735_s1 + $0xa8] sm:$0xff]  ;;  %v254_v35 = vld [vmem:[%s8735_s1 + $0xb0] sm:$0xff] }
   0x9   :  { %5207 = vmatprep.subr.bf16.mxu0 %v8745_v0  ;;  %v5232_v34 = vpack.c.bf16 %v253_v33, %v252_v32  ;;  %v255_v36 = vld [vmem:[%s8735_s1 + $0xb8] sm:$0xff]  ;;  %v256_v38 = vld [vmem:[%s8735_s1 + $0xc0] sm:$0xff]  ;;  %v257_v39 = vld [vmem:[%s8735_s1 + $0xc8] sm:$0xff] }
   0xa   :  { %v5235_v37 = vpack.c.bf16 %v255_v36, %v254_v35  ;;  %v5238_v40 = vpack.c.bf16 %v257_v39, %v256_v38  ;;  %v258_v41 = vld [vmem:[%s8735_s1 + $0xd0] sm:$0xff]  ;;  %v259_v42 = vld [vmem:[%s8735_s1 + $0xd8] sm:$0xff]  ;;  %v260_v44 = vld [vmem:[%s8735_s1 + $0xe0] sm:$0xff] }
   0xb   :  { %v5241_v43 = vpack.c.bf16 %v259_v42, %v258_v41  ;;  %v261_v45 = vld [vmem:[%s8735_s1 + $0xe8] sm:$0xff]  ;;  %v262_v47 = vld [vmem:[%s8735_s1 + $0xf0] sm:$0xff]  ;;  %v263_v48 = vld [vmem:[%s8735_s1 + $0xf8] sm:$0xff] }
   0xc   :  { %5209 = vmatpush1.bf16.msra.mxu0 %v5208_v9  ;;  %v5244_v46 = vpack.c.bf16 %v261_v45, %v260_v44  ;;  %v5247_v49 = vpack.c.bf16 %v263_v48, %v262_v47  ;;  %v32_v50 = vld [vmem:[%s8736_s0] sm:$0xff]  ;;  %v35_v51 = vld [vmem:[%s8736_s0 + $0x18] sm:$0xff]  ;;  %v34_v52 = vld [vmem:[%s8736_s0 + $0x10] sm:$0xff] }
   0xd   :  { %5210 = vmatprep.subr.bf16.mxu0 %v8745_v0  ;;  %v37_v53 = vld [vmem:[%s8736_s0 + $0x28] sm:$0xff]  ;;  %v36_v54 = vld [vmem:[%s8736_s0 + $0x20] sm:$0xff]  ;;  %v39_v55 = vld [vmem:[%s8736_s0 + $0x38] sm:$0xff] }
   0xe   :  { %v38_v56 = vld [vmem:[%s8736_s0 + $0x30] sm:$0xff]  ;;  %v41_v57 = vld [vmem:[%s8736_s0 + $0x48] sm:$0xff]  ;;  %v40_v58 = vld [vmem:[%s8736_s0 + $0x40] sm:$0xff] }
   0xf   :  { %v43_v59 = vld [vmem:[%s8736_s0 + $0x58] sm:$0xff]  ;;  %v42_v60 = vld [vmem:[%s8736_s0 + $0x50] sm:$0xff]  ;;  %v45_v61 = vld [vmem:[%s8736_s0 + $0x68] sm:$0xff] }
  0x10   :  { %5212 = vmatpush1.bf16.msra.mxu0 %v5211_v13  ;;  %v44_v62 = vld [vmem:[%s8736_s0 + $0x60] sm:$0xff]  ;;  %v47_v63 = vld [vmem:[%s8736_s0 + $0x78] sm:$0xff]  ;;  %v46_v1 = vld [vmem:[%s8736_s0 + $0x70] sm:$0xff] }
  0x11   :  { %5213 = vmatprep.subr.bf16.mxu0 %v8745_v0  ;;  %v49_v2 = vld [vmem:[%s8736_s0 + $0x88] sm:$0xff]  ;;  %v48_v3 = vld [vmem:[%s8736_s0 + $0x80] sm:$0xff]  ;;  %v51_v4 = vld [vmem:[%s8736_s0 + $0x98] sm:$0xff] }
  0x12   :  { %v50_v5 = vld [vmem:[%s8736_s0 + $0x90] sm:$0xff]  ;;  %v53_v6 = vld [vmem:[%s8736_s0 + $0xa8] sm:$0xff]  ;;  %v52_v7 = vld [vmem:[%s8736_s0 + $0xa0] sm:$0xff] }
  0x13   :  { %v55_v8 = vld [vmem:[%s8736_s0 + $0xb8] sm:$0xff]  ;;  %v54_v9 = vld [vmem:[%s8736_s0 + $0xb0] sm:$0xff]  ;;  %v57_v10 = vld [vmem:[%s8736_s0 + $0xc8] sm:$0xff] }
  0x14   :  { %5215 = vmatpush1.bf16.msra.mxu0 %v5214_v16  ;;  %v56_v11 = vld [vmem:[%s8736_s0 + $0xc0] sm:$0xff]  ;;  %v59_v12 = vld [vmem:[%s8736_s0 + $0xd8] sm:$0xff]  ;;  %v58_v13 = vld [vmem:[%s8736_s0 + $0xd0] sm:$0xff] }
  0x15   :  { %5216 = vmatprep.subr.bf16.mxu0 %v8745_v0  ;;  %v61_v14 = vld [vmem:[%s8736_s0 + $0xe8] sm:$0xff]  ;;  %v60_v15 = vld [vmem:[%s8736_s0 + $0xe0] sm:$0xff]  ;;  %v63_v16 = vld [vmem:[%s8736_s0 + $0xf8] sm:$0xff] }
  0x16   :  { %v62_v17 = vld [vmem:[%s8736_s0 + $0xf0] sm:$0xff]  ;;  %v65_v18 = vld [vmem:[%s8736_s0 + $0x108] sm:$0xff]  ;;  %v67_v20 = vld [vmem:[%s8736_s0 + $0x118] sm:$0xff] }
  0x17   :  { %v66_v21 = vld [vmem:[%s8736_s0 + $0x110] sm:$0xff]  ;;  %v68_v23 = vld [vmem:[%s8736_s0 + $0x120] sm:$0xff]  ;;  %v71_v24 = vld [vmem:[%s8736_s0 + $0x138] sm:$0xff] }
  0x18   :  { %5218 = vmatpush1.bf16.msra.mxu0 %v5217_v19  ;;  %v64_v19 = vld [vmem:[%s8736_s0 + $0x100] sm:$0xff]  ;;  %v73_v26 = vld [vmem:[%s8736_s0 + $0x148] sm:$0xff]  ;;  %v74_v29 = vld [vmem:[%s8736_s0 + $0x150] sm:$0xff] }
  0x19   :  { %5219 = vmatprep.subr.bf16.mxu0 %v8745_v0  ;;  %v72_v27 = vld [vmem:[%s8736_s0 + $0x140] sm:$0xff]  ;;  %v77_v30 = vld [vmem:[%s8736_s0 + $0x168] sm:$0xff]  ;;  %v79_v32 = vld [vmem:[%s8736_s0 + $0x178] sm:$0xff] }
  0x1a   :  { %v78_v33 = vld [vmem:[%s8736_s0 + $0x170] sm:$0xff]  ;;  %v80_v35 = vld [vmem:[%s8736_s0 + $0x180] sm:$0xff]  ;;  %v83_v36 = vld [vmem:[%s8736_s0 + $0x198] sm:$0xff] }
  0x1b   :  { %v85_v38 = vld [vmem:[%s8736_s0 + $0x1a8] sm:$0xff]  ;;  %v84_v39 = vld [vmem:[%s8736_s0 + $0x1a0] sm:$0xff]  ;;  %v86_v41 = vld [vmem:[%s8736_s0 + $0x1b0] sm:$0xff] }
  0x1c   :  { %5221 = vmatpush1.bf16.msra.mxu0 %v5220_v22  ;;  %v69_v22 = vld [vmem:[%s8736_s0 + $0x128] sm:$0xff]  ;;  %v91_v44 = vld [vmem:[%s8736_s0 + $0x1d8] sm:$0xff]  ;;  %v90_v45 = vld [vmem:[%s8736_s0 + $0x1d0] sm:$0xff] }
  0x1d   :  { %5222 = vmatprep.subr.bf16.mxu0 %v8745_v0  ;;  %v89_v42 = vld [vmem:[%s8736_s0 + $0x1c8] sm:$0xff]  ;;  %v92_v47 = vld [vmem:[%s8736_s0 + $0x1e0] sm:$0xff]  ;;  %v95_v48 = vld [vmem:[%s8736_s0 + $0x1f8] sm:$0xff] }
  0x20   :  { %5224 = vmatpush1.bf16.msra.mxu0 %v5223_v25  ;;  %v70_v25 = vld [vmem:[%s8736_s0 + $0x130] sm:$0xff] }
  0x21   :  { %5225 = vmatprep.subr.bf16.mxu0 %v8745_v0 }
  0x24   :  { %5227 = vmatpush1.bf16.msra.mxu0 %v5226_v28  ;;  %v75_v28 = vld [vmem:[%s8736_s0 + $0x158] sm:$0xff] }
  0x25   :  { %5228 = vmatprep.subr.bf16.mxu0 %v8745_v0 }
  0x28   :  { %5230 = vmatpush1.bf16.msra.mxu0 %v5229_v31  ;;  %v76_v31 = vld [vmem:[%s8736_s0 + $0x160] sm:$0xff] }
  0x29   :  { %5231 = vmatprep.subr.bf16.mxu0 %v8745_v0 }
  0x2c   :  { %5233 = vmatpush1.bf16.msra.mxu0 %v5232_v34  ;;  %v81_v34 = vld [vmem:[%s8736_s0 + $0x188] sm:$0xff] }
  0x2d   :  { %5234 = vmatprep.subr.bf16.mxu0 %v8745_v0 }
  0x30   :  { %5236 = vmatpush1.bf16.msra.mxu0 %v5235_v37  ;;  %v82_v37 = vld [vmem:[%s8736_s0 + $0x190] sm:$0xff] }
  0x31   :  { %5237 = vmatprep.subr.bf16.mxu0 %v8745_v0 }
  0x34   :  { %5239 = vmatpush1.bf16.msra.mxu0 %v5238_v40  ;;  %v87_v40 = vld [vmem:[%s8736_s0 + $0x1b8] sm:$0xff] }
  0x35   :  { %5240 = vmatprep.subr.bf16.mxu0 %v8745_v0 }
  0x38   :  { %5242 = vmatpush1.bf16.msra.mxu0 %v5241_v43  ;;  %v88_v43 = vld [vmem:[%s8736_s0 + $0x1c0] sm:$0xff] }
  0x39   :  { %5243 = vmatprep.subr.bf16.mxu0 %v8745_v0 }
  0x3c   :  { %5245 = vmatpush1.bf16.msra.mxu0 %v5244_v46  ;;  %v93_v46 = vld [vmem:[%s8736_s0 + $0x1e8] sm:$0xff] }
  0x3d   :  { %5246 = vmatprep.subr.bf16.mxu0 %v8745_v0 }
  0x40   :  { %5248 = vmatpush1.bf16.msra.mxu0 %v5247_v49  ;;  %v94_v49 = vld [vmem:[%s8736_s0 + $0x1f0] sm:$0xff] }
  0x41   :  { %5585 = vmatprep.subr.bf16.mxu0 %v8745_v0 }
  0x43   :  { %336 = vmatmul.mubr.f32.vlgmr.msra.gmra.mrb[0].mxu0 %v32_v50  ;;  %v97_v50 = vld [vmem:[%s8736_s0 + $0x208] sm:$0xff] }
  0x44   :  { %340 = vmatprep.mubr.f32.mxu0 %v35_v51  ;;  %v96_v51 = vld [vmem:[%s8736_s0 + $0x200] sm:$0xff] }
  0x47   :  { %341 = vmatmul.mubr.f32.gmra.mrb[2].mxu0 %v34_v52  ;;  %v99_v52 = vld [vmem:[%s8736_s0 + $0x218] sm:$0xff] }
  0x48   :  { %345 = vmatprep.mubr.f32.mxu0 %v37_v53  ;;  %v98_v53 = vld [vmem:[%s8736_s0 + $0x210] sm:$0xff] }
  0x4b   :  { %346 = vmatmul.mubr.f32.gmra.mrb[4].mxu0 %v36_v54  ;;  %v101_v54 = vld [vmem:[%s8736_s0 + $0x228] sm:$0xff] }
  0x4c   :  { %350 = vmatprep.mubr.f32.mxu0 %v39_v55  ;;  %v100_v55 = vld [vmem:[%s8736_s0 + $0x220] sm:$0xff] }
  0x4f   :  { %351 = vmatmul.mubr.f32.gmra.mrb[6].mxu0 %v38_v56  ;;  %v103_v56 = vld [vmem:[%s8736_s0 + $0x238] sm:$0xff] }
  0x50   :  { %355 = vmatprep.mubr.f32.mxu0 %v41_v57  ;;  %v102_v57 = vld [vmem:[%s8736_s0 + $0x230] sm:$0xff] }
  0x53   :  { %356 = vmatmul.mubr.f32.gmra.mrb[8].mxu0 %v40_v58  ;;  %v105_v58 = vld [vmem:[%s8736_s0 + $0x248] sm:$0xff] }
  0x54   :  { %360 = vmatprep.mubr.f32.mxu0 %v43_v59  ;;  %v104_v59 = vld [vmem:[%s8736_s0 + $0x240] sm:$0xff] }
  0x57   :  { %361 = vmatmul.mubr.f32.gmra.mrb[10].mxu0 %v42_v60  ;;  %v107_v60 = vld [vmem:[%s8736_s0 + $0x258] sm:$0xff] }
  0x58   :  { %365 = vmatprep.mubr.f32.mxu0 %v45_v61  ;;  %v106_v61 = vld [vmem:[%s8736_s0 + $0x250] sm:$0xff] }
  0x5b   :  { %366 = vmatmul.mubr.f32.gmra.mrb[12].mxu0 %v44_v62  ;;  %v109_v62 = vld [vmem:[%s8736_s0 + $0x268] sm:$0xff] }
  0x5c   :  { %370 = vmatprep.mubr.f32.mxu0 %v47_v63  ;;  %v108_v63 = vld [vmem:[%s8736_s0 + $0x260] sm:$0xff] }
  0x5f   :  { %371 = vmatmul.mubr.f32.gmra.mrb[14].mxu0 %v46_v1  ;;  %v111_v1 = vld [vmem:[%s8736_s0 + $0x278] sm:$0xff] }
  0x60   :  { %375 = vmatprep.mubr.f32.mxu0 %v49_v2  ;;  %v110_v2 = vld [vmem:[%s8736_s0 + $0x270] sm:$0xff] }
  0x63   :  { %376 = vmatmul.mubr.f32.gmra.mrb[16].mxu0 %v48_v3  ;;  %v113_v3 = vld [vmem:[%s8736_s0 + $0x288] sm:$0xff] }
  0x64   :  { %380 = vmatprep.mubr.f32.mxu0 %v51_v4  ;;  %v112_v4 = vld [vmem:[%s8736_s0 + $0x280] sm:$0xff] }
  0x67   :  { %381 = vmatmul.mubr.f32.gmra.mrb[18].mxu0 %v50_v5  ;;  %v115_v5 = vld [vmem:[%s8736_s0 + $0x298] sm:$0xff] }
  0x68   :  { %385 = vmatprep.mubr.f32.mxu0 %v53_v6  ;;  %v114_v6 = vld [vmem:[%s8736_s0 + $0x290] sm:$0xff] }
  0x6b   :  { %386 = vmatmul.mubr.f32.gmra.mrb[20].mxu0 %v52_v7  ;;  %v117_v7 = vld [vmem:[%s8736_s0 + $0x2a8] sm:$0xff] }
  0x6c   :  { %390 = vmatprep.mubr.f32.mxu0 %v55_v8  ;;  %v116_v8 = vld [vmem:[%s8736_s0 + $0x2a0] sm:$0xff] }
  0x6f   :  { %391 = vmatmul.mubr.f32.gmra.mrb[22].mxu0 %v54_v9  ;;  %v119_v9 = vld [vmem:[%s8736_s0 + $0x2b8] sm:$0xff] }
  0x70   :  { %395 = vmatprep.mubr.f32.mxu0 %v57_v10  ;;  %v118_v10 = vld [vmem:[%s8736_s0 + $0x2b0] sm:$0xff] }
  0x73   :  { %396 = vmatmul.mubr.f32.gmra.mrb[24].mxu0 %v56_v11  ;;  %v121_v11 = vld [vmem:[%s8736_s0 + $0x2c8] sm:$0xff] }
  0x74   :  { %400 = vmatprep.mubr.f32.mxu0 %v59_v12  ;;  %v120_v12 = vld [vmem:[%s8736_s0 + $0x2c0] sm:$0xff] }
  0x77   :  { %401 = vmatmul.mubr.f32.gmra.mrb[26].mxu0 %v58_v13  ;;  %v123_v13 = vld [vmem:[%s8736_s0 + $0x2d8] sm:$0xff] }
  0x78   :  { %405 = vmatprep.mubr.f32.mxu0 %v61_v14  ;;  %v122_v14 = vld [vmem:[%s8736_s0 + $0x2d0] sm:$0xff] }
  0x7b   :  { %406 = vmatmul.mubr.f32.gmra.mrb[28].mxu0 %v60_v15  ;;  %v125_v15 = vld [vmem:[%s8736_s0 + $0x2e8] sm:$0xff] }
  0x7c   :  { %410 = vmatprep.mubr.f32.mxu0 %v63_v16  ;;  %v124_v16 = vld [vmem:[%s8736_s0 + $0x2e0] sm:$0xff] }
  0x7f   :  { %411 = vmatmul.mubr.f32.gmra.mrb[30].mxu0 %v62_v17  ;;  %v127_v17 = vld [vmem:[%s8736_s0 + $0x2f8] sm:$0xff] }
  0x80   :  { %415 = vmatprep.mubr.f32.mxu0 %v65_v18  ;;  %v126_v18 = vld [vmem:[%s8736_s0 + $0x2f0] sm:$0xff] }
  0x83   :  { %416 = vmatmul.mubr.f32.gmra.mrb[32].mxu0 %v64_v19  ;;  %v129_v19 = vld [vmem:[%s8736_s0 + $0x308] sm:$0xff] }
  0x84   :  { %420 = vmatprep.mubr.f32.mxu0 %v67_v20  ;;  %v128_v20 = vld [vmem:[%s8736_s0 + $0x300] sm:$0xff] }
  0x87   :  { %421 = vmatmul.mubr.f32.gmra.mrb[34].mxu0 %v66_v21  ;;  %v131_v21 = vld [vmem:[%s8736_s0 + $0x318] sm:$0xff] }
  0x88   :  { %425 = vmatprep.mubr.f32.mxu0 %v69_v22  ;;  %v130_v22 = vld [vmem:[%s8736_s0 + $0x310] sm:$0xff] }
  0x8b   :  { %426 = vmatmul.mubr.f32.gmra.mrb[36].mxu0 %v68_v23  ;;  %v133_v23 = vld [vmem:[%s8736_s0 + $0x328] sm:$0xff] }
  0x8c   :  { %430 = vmatprep.mubr.f32.mxu0 %v71_v24  ;;  %v132_v24 = vld [vmem:[%s8736_s0 + $0x320] sm:$0xff] }
  0x8f   :  { %431 = vmatmul.mubr.f32.gmra.mrb[38].mxu0 %v70_v25  ;;  %v135_v25 = vld [vmem:[%s8736_s0 + $0x338] sm:$0xff] }
  0x90   :  { %435 = vmatprep.mubr.f32.mxu0 %v73_v26  ;;  %v134_v26 = vld [vmem:[%s8736_s0 + $0x330] sm:$0xff] }
  0x93   :  { %436 = vmatmul.mubr.f32.gmra.mrb[40].mxu0 %v72_v27  ;;  %v137_v27 = vld [vmem:[%s8736_s0 + $0x348] sm:$0xff] }
  0x94   :  { %440 = vmatprep.mubr.f32.mxu0 %v75_v28  ;;  %v136_v28 = vld [vmem:[%s8736_s0 + $0x340] sm:$0xff] }
  0x97   :  { %441 = vmatmul.mubr.f32.gmra.mrb[42].mxu0 %v74_v29  ;;  %v139_v29 = vld [vmem:[%s8736_s0 + $0x358] sm:$0xff] }
  0x98   :  { %445 = vmatprep.mubr.f32.mxu0 %v77_v30  ;;  %v138_v30 = vld [vmem:[%s8736_s0 + $0x350] sm:$0xff] }
  0x9b   :  { %446 = vmatmul.mubr.f32.gmra.mrb[44].mxu0 %v76_v31  ;;  %v141_v31 = vld [vmem:[%s8736_s0 + $0x368] sm:$0xff] }
  0x9c   :  { %450 = vmatprep.mubr.f32.mxu0 %v79_v32 }
  0x9f   :  { %451 = vmatmul.mubr.f32.gmra.mrb[46].mxu0 %v78_v33 }
  0xa0   :  { %455 = vmatprep.mubr.f32.mxu0 %v81_v34  ;;  %v140_v34 = vld [vmem:[%s8736_s0 + $0x360] sm:$0xff] }
  0xa3   :  { %456 = vmatmul.mubr.f32.gmra.mrb[48].mxu0 %v80_v35  ;;  %v143_v35 = vld [vmem:[%s8736_s0 + $0x378] sm:$0xff] }
  0xa4   :  { %460 = vmatprep.mubr.f32.mxu0 %v83_v36 }
  0xa7   :  { %461 = vmatmul.mubr.f32.gmra.mrb[50].mxu0 %v82_v37 }
  0xa8   :  { %465 = vmatprep.mubr.f32.mxu0 %v85_v38  ;;  %v142_v38 = vld [vmem:[%s8736_s0 + $0x370] sm:$0xff] }
  0xab   :  { %466 = vmatmul.mubr.f32.gmra.mrb[52].mxu0 %v84_v39  ;;  %v145_v39 = vld [vmem:[%s8736_s0 + $0x388] sm:$0xff] }
  0xac   :  { %470 = vmatprep.mubr.f32.mxu0 %v87_v40 }
  0xaf   :  { %471 = vmatmul.mubr.f32.gmra.mrb[54].mxu0 %v86_v41 }
  0xb0   :  { %475 = vmatprep.mubr.f32.mxu0 %v89_v42  ;;  %v144_v42 = vld [vmem:[%s8736_s0 + $0x380] sm:$0xff] }
  0xb3   :  { %476 = vmatmul.mubr.f32.gmra.mrb[56].mxu0 %v88_v43  ;;  %v147_v43 = vld [vmem:[%s8736_s0 + $0x398] sm:$0xff] }
  0xb4   :  { %480 = vmatprep.mubr.f32.mxu0 %v91_v44 }
  0xb7   :  { %481 = vmatmul.mubr.f32.gmra.mrb[58].mxu0 %v90_v45 }
  0xb8   :  { %485 = vmatprep.mubr.f32.mxu0 %v93_v46  ;;  %v146_v46 = vld [vmem:[%s8736_s0 + $0x390] sm:$0xff] }
  0xbb   :  { %486 = vmatmul.mubr.f32.gmra.mrb[60].mxu0 %v92_v47  ;;  %v149_v47 = vld [vmem:[%s8736_s0 + $0x3a8] sm:$0xff] }
  0xbc   :  { %490 = vmatprep.mubr.f32.mxu0 %v95_v48 }
  0xbf   :  { %491 = vmatmul.mubr.f32.gmra.mrb[62].mxu0 %v94_v49 }
  0xc0   :  { %495 = vmatprep.mubr.f32.mxu0 %v97_v50  ;;  %v148_v50 = vld [vmem:[%s8736_s0 + $0x3a0] sm:$0xff] }
  0xc3   :  { %496 = vmatmul.mubr.f32.gmra.mrb[64].mxu0 %v96_v51  ;;  %v151_v51 = vld [vmem:[%s8736_s0 + $0x3b8] sm:$0xff] }
  0xc4   :  { %500 = vmatprep.mubr.f32.mxu0 %v99_v52 }
  0xc7   :  { %501 = vmatmul.mubr.f32.gmra.mrb[66].mxu0 %v98_v53 }
  0xc8   :  { %505 = vmatprep.mubr.f32.mxu0 %v101_v54  ;;  %v150_v54 = vld [vmem:[%s8736_s0 + $0x3b0] sm:$0xff] }
  0xcb   :  { %506 = vmatmul.mubr.f32.gmra.mrb[68].mxu0 %v100_v55  ;;  %v153_v55 = vld [vmem:[%s8736_s0 + $0x3c8] sm:$0xff] }
  0xcc   :  { %510 = vmatprep.mubr.f32.mxu0 %v103_v56 }
  0xcf   :  { %511 = vmatmul.mubr.f32.gmra.mrb[70].mxu0 %v102_v57 }
  0xd0   :  { %515 = vmatprep.mubr.f32.mxu0 %v105_v58  ;;  %v152_v58 = vld [vmem:[%s8736_s0 + $0x3c0] sm:$0xff] }
  0xd3   :  { %516 = vmatmul.mubr.f32.gmra.mrb[72].mxu0 %v104_v59  ;;  %v155_v59 = vld [vmem:[%s8736_s0 + $0x3d8] sm:$0xff] }
  0xd4   :  { %520 = vmatprep.mubr.f32.mxu0 %v107_v60 }
  0xd7   :  { %521 = vmatmul.mubr.f32.gmra.mrb[74].mxu0 %v106_v61 }
  0xd8   :  { %525 = vmatprep.mubr.f32.mxu0 %v109_v62  ;;  %v154_v62 = vld [vmem:[%s8736_s0 + $0x3d0] sm:$0xff] }
  0xdb   :  { %526 = vmatmul.mubr.f32.gmra.mrb[76].mxu0 %v108_v63  ;;  %v157_v63 = vld [vmem:[%s8736_s0 + $0x3e8] sm:$0xff] }
  0xdc   :  { %530 = vmatprep.mubr.f32.mxu0 %v111_v1 }
  0xdf   :  { %531 = vmatmul.mubr.f32.gmra.mrb[78].mxu0 %v110_v2 }
  0xe0   :  { %535 = vmatprep.mubr.f32.mxu0 %v113_v3  ;;  %v156_v3 = vld [vmem:[%s8736_s0 + $0x3e0] sm:$0xff] }
  0xe3   :  { %536 = vmatmul.mubr.f32.gmra.mrb[80].mxu0 %v112_v4  ;;  %v159_v4 = vld [vmem:[%s8736_s0 + $0x3f8] sm:$0xff] }
  0xe4   :  { %540 = vmatprep.mubr.f32.mxu0 %v115_v5 }
  0xe7   :  { %541 = vmatmul.mubr.f32.gmra.mrb[82].mxu0 %v114_v6 }
  0xe8   :  { %545 = vmatprep.mubr.f32.mxu0 %v117_v7  ;;  %v158_v7 = vld [vmem:[%s8736_s0 + $0x3f0] sm:$0xff] }
  0xeb   :  { %546 = vmatmul.mubr.f32.gmra.mrb[84].mxu0 %v116_v8  ;;  %v161_v8 = vld [vmem:[%s8736_s0 + $0x408] sm:$0xff] }
  0xec   :  { %550 = vmatprep.mubr.f32.mxu0 %v119_v9 }
  0xef   :  { %551 = vmatmul.mubr.f32.gmra.mrb[86].mxu0 %v118_v10 }
  0xf0   :  { %555 = vmatprep.mubr.f32.mxu0 %v121_v11  ;;  %v160_v11 = vld [vmem:[%s8736_s0 + $0x400] sm:$0xff] }
  0xf3   :  { %556 = vmatmul.mubr.f32.gmra.mrb[88].mxu0 %v120_v12  ;;  %v163_v12 = vld [vmem:[%s8736_s0 + $0x418] sm:$0xff] }
  0xf4   :  { %560 = vmatprep.mubr.f32.mxu0 %v123_v13 }
  0xf7   :  { %561 = vmatmul.mubr.f32.gmra.mrb[90].mxu0 %v122_v14 }
  0xf8   :  { %565 = vmatprep.mubr.f32.mxu0 %v125_v15  ;;  %v162_v15 = vld [vmem:[%s8736_s0 + $0x410] sm:$0xff] }
  0xfb   :  { %566 = vmatmul.mubr.f32.gmra.mrb[92].mxu0 %v124_v16  ;;  %v165_v16 = vld [vmem:[%s8736_s0 + $0x428] sm:$0xff] }
  0xfc   :  { %570 = vmatprep.mubr.f32.mxu0 %v127_v17 }
  0xff   :  { %571 = vmatmul.mubr.f32.gmra.mrb[94].mxu0 %v126_v18 }
 0x100   :  { %575 = vmatprep.mubr.f32.mxu0 %v129_v19  ;;  %v164_v19 = vld [vmem:[%s8736_s0 + $0x420] sm:$0xff] }
 0x103   :  { %576 = vmatmul.mubr.f32.gmra.mrb[96].mxu0 %v128_v20  ;;  %v167_v20 = vld [vmem:[%s8736_s0 + $0x438] sm:$0xff] }
 0x104   :  { %580 = vmatprep.mubr.f32.mxu0 %v131_v21 }
 0x107   :  { %581 = vmatmul.mubr.f32.gmra.mrb[98].mxu0 %v130_v22 }
 0x108   :  { %585 = vmatprep.mubr.f32.mxu0 %v133_v23  ;;  %v166_v23 = vld [vmem:[%s8736_s0 + $0x430] sm:$0xff] }
 0x10b   :  { %586 = vmatmul.mubr.f32.gmra.mrb[100].mxu0 %v132_v24  ;;  %v169_v24 = vld [vmem:[%s8736_s0 + $0x448] sm:$0xff] }
 0x10c   :  { %590 = vmatprep.mubr.f32.mxu0 %v135_v25 }
 0x10f   :  { %591 = vmatmul.mubr.f32.gmra.mrb[102].mxu0 %v134_v26 }
 0x110   :  { %595 = vmatprep.mubr.f32.mxu0 %v137_v27  ;;  %v168_v27 = vld [vmem:[%s8736_s0 + $0x440] sm:$0xff] }
 0x113   :  { %596 = vmatmul.mubr.f32.gmra.mrb[104].mxu0 %v136_v28  ;;  %v171_v28 = vld [vmem:[%s8736_s0 + $0x458] sm:$0xff] }
 0x114   :  { %600 = vmatprep.mubr.f32.mxu0 %v139_v29 }
 0x116   :  { %v6395_v32 = vpop.f32.mrb[0].mxu0 }
 0x117   :  { %v339_v33 = vpop.f32.mrb[1].mxu0  ;;  %601 = vmatmul.mubr.f32.gmra.mrb[106].mxu0 %v138_v30 }
 0x118   :  { %605 = vmatprep.mubr.f32.mxu0 %v141_v31  ;;  %v170_v31 = vld [vmem:[%s8736_s0 + $0x450] sm:$0xff]  ;;  %v173_v33 = vld [vmem:[%s8736_s0 + $0x468] sm:$0xff] }
 0x11a   :  { %v6403_v36 = vpop.f32.mrb[2].mxu0 }
 0x11b   :  { %v344_v37 = vpop.f32.mrb[3].mxu0  ;;  %606 = vmatmul.mubr.f32.gmra.mrb[108].mxu0 %v140_v34 }
 0x11c   :  { %610 = vmatprep.mubr.f32.mxu0 %v143_v35  ;;  %v172_v37 = vld [vmem:[%s8736_s0 + $0x460] sm:$0xff] }
 0x11e   :  { %v6411_v40 = vpop.f32.mrb[4].mxu0 }
 0x11f   :  { %v349_v41 = vpop.f32.mrb[5].mxu0  ;;  %611 = vmatmul.mubr.f32.gmra.mrb[110].mxu0 %v142_v38  ;;  %v175_v38 = vld [vmem:[%s8736_s0 + $0x478] sm:$0xff] }
 0x120   :  { %615 = vmatprep.mubr.f32.mxu0 %v145_v39 }
 0x122   :  { %v6419_v44 = vpop.f32.mrb[6].mxu0 }
 0x123   :  { %v354_v45 = vpop.f32.mrb[7].mxu0  ;;  %616 = vmatmul.mubr.f32.gmra.mrb[112].mxu0 %v144_v42  ;;  %v174_v42 = vld [vmem:[%s8736_s0 + $0x470] sm:$0xff] }
 0x124   :  { %620 = vmatprep.mubr.f32.mxu0 %v147_v43  ;;  %v177_v43 = vld [vmem:[%s8736_s0 + $0x488] sm:$0xff] }
 0x126   :  { %v6427_v48 = vpop.f32.mrb[8].mxu0 }
 0x127   :  { %v359_v49 = vpop.f32.mrb[9].mxu0  ;;  %621 = vmatmul.mubr.f32.gmra.mrb[114].mxu0 %v146_v46 }
 0x128   :  { %625 = vmatprep.mubr.f32.mxu0 %v149_v47  ;;  %v176_v47 = vld [vmem:[%s8736_s0 + $0x480] sm:$0xff]  ;;  %v179_v49 = vld [vmem:[%s8736_s0 + $0x498] sm:$0xff] }
 0x12a   :  { %v6435_v52 = vpop.f32.mrb[10].mxu0 }
 0x12b   :  { %v364_v53 = vpop.f32.mrb[11].mxu0  ;;  %626 = vmatmul.mubr.f32.gmra.mrb[116].mxu0 %v148_v50 }
 0x12c   :  { %630 = vmatprep.mubr.f32.mxu0 %v151_v51  ;;  %v178_v53 = vld [vmem:[%s8736_s0 + $0x490] sm:$0xff] }
 0x12e   :  { %v6443_v56 = vpop.f32.mrb[12].mxu0 }
 0x12f   :  { %v369_v57 = vpop.f32.mrb[13].mxu0  ;;  %631 = vmatmul.mubr.f32.gmra.mrb[118].mxu0 %v150_v54  ;;  %v181_v54 = vld [vmem:[%s8736_s0 + $0x4a8] sm:$0xff] }
 0x130   :  { %635 = vmatprep.mubr.f32.mxu0 %v153_v55 }
 0x132   :  { %v6451_v60 = vpop.f32.mrb[14].mxu0 }
 0x133   :  { %v374_v61 = vpop.f32.mrb[15].mxu0  ;;  %636 = vmatmul.mubr.f32.gmra.mrb[120].mxu0 %v152_v58  ;;  %v180_v58 = vld [vmem:[%s8736_s0 + $0x4a0] sm:$0xff] }
 0x134   :  { %640 = vmatprep.mubr.f32.mxu0 %v155_v59  ;;  %v183_v59 = vld [vmem:[%s8736_s0 + $0x4b8] sm:$0xff] }
 0x136   :  { %v6459_v1 = vpop.f32.mrb[16].mxu0 }
 0x137   :  { %v379_v2 = vpop.f32.mrb[17].mxu0  ;;  %641 = vmatmul.mubr.f32.gmra.mrb[122].mxu0 %v154_v62 }
 0x138   :  { %645 = vmatprep.mubr.f32.mxu0 %v157_v63  ;;  %v182_v63 = vld [vmem:[%s8736_s0 + $0x4b0] sm:$0xff]  ;;  %v185_v2 = vld [vmem:[%s8736_s0 + $0x4c8] sm:$0xff] }
 0x13a   :  { %v6467_v5 = vpop.f32.mrb[18].mxu0 }
 0x13b   :  { %v384_v6 = vpop.f32.mrb[19].mxu0  ;;  %646 = vmatmul.mubr.f32.gmra.mrb[124].mxu0 %v156_v3 }
 0x13c   :  { %650 = vmatprep.mubr.f32.mxu0 %v159_v4  ;;  %v184_v6 = vld [vmem:[%s8736_s0 + $0x4c0] sm:$0xff] }
 0x13e   :  { %v6475_v9 = vpop.f32.mrb[20].mxu0 }
 0x13f   :  { %v389_v10 = vpop.f32.mrb[21].mxu0  ;;  %651 = vmatmul.mubr.f32.gmra.mrb[126].mxu0 %v158_v7  ;;  %v187_v7 = vld [vmem:[%s8736_s0 + $0x4d8] sm:$0xff] }
 0x140   :  { %655 = vmatprep.mubr.f32.mxu0 %v161_v8 }
 0x142   :  { %v6483_v13 = vpop.f32.mrb[22].mxu0 }
 0x143   :  { %v394_v14 = vpop.f32.mrb[23].mxu0  ;;  %656 = vmatmul.mubr.f32.gmra.mrb[128].mxu0 %v160_v11  ;;  %v186_v11 = vld [vmem:[%s8736_s0 + $0x4d0] sm:$0xff] }
 0x144   :  { %660 = vmatprep.mubr.f32.mxu0 %v163_v12  ;;  %v189_v12 = vld [vmem:[%s8736_s0 + $0x4e8] sm:$0xff]  ;;  %v6590_v14 = vld [vmem:[%s8737_s2] ss:$0 sm:$0xff] }
 0x146   :  { %v6491_v17 = vpop.f32.mrb[24].mxu0 }
 0x147   :  { %v399_v18 = vpop.f32.mrb[25].mxu0  ;;  %661 = vmatmul.mubr.f32.gmra.mrb[130].mxu0 %v162_v15 }
 0x148   :  { %665 = vmatprep.mubr.f32.mxu0 %v165_v16  ;;  %v188_v18 = vld [vmem:[%s8736_s0 + $0x4e0] sm:$0xff] }
 0x14a   :  { %v6499_v21 = vpop.f32.mrb[26].mxu0 }
 0x14b   :  { %v404_v22 = vpop.f32.mrb[27].mxu0  ;;  %666 = vmatmul.mubr.f32.gmra.mrb[132].mxu0 %v164_v19  ;;  %v338_v19 = vadd.f32 %v6590_v14, %v6395_v32  ;;  %v193_v32 = vld [vmem:[%s8736_s0 + $0x508] sm:$0xff] }
 0x14c   :  { %670 = vmatprep.mubr.f32.mxu0 %v167_v20  ;;  %v191_v20 = vld [vmem:[%s8736_s0 + $0x4f8] sm:$0xff] }
 0x14e   :  { %v6507_v25 = vpop.f32.mrb[28].mxu0 }
 0x14f   :  { %v409_v26 = vpop.f32.mrb[29].mxu0  ;;  %671 = vmatmul.mubr.f32.gmra.mrb[134].mxu0 %v166_v23 }
 0x150   :  { %675 = vmatprep.mubr.f32.mxu0 %v169_v24  ;;  %v190_v26 = vld [vmem:[%s8736_s0 + $0x4f0] sm:$0xff] }
 0x152   :  { %v6515_v29 = vpop.f32.mrb[30].mxu0 }
 0x153   :  { %v414_v30 = vpop.f32.mrb[31].mxu0  ;;  %676 = vmatmul.mubr.f32.gmra.mrb[136].mxu0 %v168_v27  ;;  %v836_v27 = vmax.f32 %v338_v19, 0.0  ;;  %v198_v19 = vld [vmem:[%s8736_s0 + $0x530] sm:$0xff] }
 0x154   :  { %680 = vmatprep.mubr.f32.mxu0 %v171_v28  ;;  %v343_v28 = vadd.f32 %v6590_v14, %v6403_v36  ;;  %v348_v36 = vadd.f32 %v6590_v14, %v6411_v40  ;;  %v353_v40 = vadd.f32 %v6590_v14, %v6419_v44  ;;  %v358_v44 = vadd.f32 %v6590_v14, %v6427_v48 }
 0x155   :  { %v363_v48 = vadd.f32 %v6590_v14, %v6435_v52  ;;  %v368_v52 = vadd.f32 %v6590_v14, %v6443_v56  ;;  %v373_v56 = vadd.f32 %v6590_v14, %v6451_v60  ;;  %v378_v60 = vadd.f32 %v6590_v14, %v6459_v1 }
 0x156   :  { %v6523_v34 = vpop.f32.mrb[32].mxu0  ;;  %v383_v1 = vadd.f32 %v6590_v14, %v6467_v5  ;;  %v388_v5 = vadd.f32 %v6590_v14, %v6475_v9  ;;  %v393_v9 = vadd.f32 %v6590_v14, %v6483_v13  ;;  %v398_v13 = vadd.f32 %v6590_v14, %v6491_v17  ;;  %v3410_v17 = vld [vmem:[%s8738_s3 + $0x80] sm:$0xff] }
 0x157   :  { %v419_v35 = vpop.f32.mrb[33].mxu0  ;;  %681 = vmatmul.mubr.f32.gmra.mrb[138].mxu0 %v170_v31 }
 0x158   :  { %685 = vmatprep.mubr.f32.mxu0 %v173_v33 }
 0x15a   :  { %v6531_v39 = vpop.f32.mrb[34].mxu0 }
 0x15b   :  { %v424_v41 = vpop.f32.mrb[35].mxu0  ;;  %686 = vmatmul.mubr.f32.gmra.mrb[140].mxu0 %v172_v37 }
 0x15c   :  { %690 = vmatprep.mubr.f32.mxu0 %v175_v38  ;;  %v192_v38 = vld [vmem:[%s8736_s0 + $0x500] sm:$0xff]  ;;  %v837_v41 = vmax.f32 %v343_v28, 0.0 }
 0x15e   :  { %v6539_v45 = vpop.f32.mrb[36].mxu0 }
 0x15f   :  { %v429_v46 = vpop.f32.mrb[37].mxu0  ;;  %691 = vmatmul.mubr.f32.gmra.mrb[142].mxu0 %v174_v42 }
 0x160   :  { %695 = vmatprep.mubr.f32.mxu0 %v177_v43  ;;  %v195_v43 = vld [vmem:[%s8736_s0 + $0x518] sm:$0xff] }
 0x162   :  { %v6547_v50 = vpop.f32.mrb[38].mxu0 }
 0x163   :  { %v434_v51 = vpop.f32.mrb[39].mxu0  ;;  %696 = vmatmul.mubr.f32.gmra.mrb[144].mxu0 %v176_v47 }
 0x164   :  { %700 = vmatprep.mubr.f32.mxu0 %v179_v49 }
 0x166   :  { %v6555_v55 = vpop.f32.mrb[40].mxu0 }
 0x167   :  { %v439_v57 = vpop.f32.mrb[41].mxu0  ;;  %701 = vmatmul.mubr.f32.gmra.mrb[146].mxu0 %v178_v53  ;;  %v194_v53 = vld [vmem:[%s8736_s0 + $0x510] sm:$0xff] }
 0x168   :  { %705 = vmatprep.mubr.f32.mxu0 %v181_v54  ;;  %v838_v54 = vmax.f32 %v348_v36, 0.0 }
 0x16a   :  { %v6563_v61 = vpop.f32.mrb[42].mxu0 }
 0x16b   :  { %v444_v62 = vpop.f32.mrb[43].mxu0  ;;  %706 = vmatmul.mubr.f32.gmra.mrb[148].mxu0 %v180_v58  ;;  %v197_v58 = vld [vmem:[%s8736_s0 + $0x528] sm:$0xff] }
 0x16c   :  { %710 = vmatprep.mubr.f32.mxu0 %v183_v59 }
 0x16e   :  { %v6571_v3 = vpop.f32.mrb[44].mxu0 }
 0x16f   :  { %v449_v4 = vpop.f32.mrb[45].mxu0  ;;  %711 = vmatmul.mubr.f32.gmra.mrb[150].mxu0 %v182_v63 }
 0x170   :  { %715 = vmatprep.mubr.f32.mxu0 %v185_v2  ;;  %v196_v4 = vld [vmem:[%s8736_s0 + $0x520] sm:$0xff] }
 0x172   :  { %v6579_v8 = vpop.f32.mrb[46].mxu0 }
 0x173   :  { %v454_v10 = vpop.f32.mrb[47].mxu0  ;;  %716 = vmatmul.mubr.f32.gmra.mrb[152].mxu0 %v184_v6  ;;  %v839_v6 = vmax.f32 %v353_v40, 0.0 }
 0x174   :  { %720 = vmatprep.mubr.f32.mxu0 %v187_v7  ;;  %v199_v10 = vld [vmem:[%s8736_s0 + $0x538] sm:$0xff] }
 0x176   :  { %v6592_v15 = vpop.f32.mrb[48].mxu0 }
 0x177   :  { %v459_v16 = vpop.f32.mrb[49].mxu0  ;;  %721 = vmatmul.mubr.f32.gmra.mrb[154].mxu0 %v186_v11 }
 0x178   :  { %725 = vmatprep.mubr.f32.mxu0 %v189_v12 }
 0x17a   :  { %v462_v22 = vpop.f32.mrb[50].mxu0 }
 0x17b   :  { %v463_v23 = vadd.f32 %v6590_v14, %v462_v22  ;;  %v464_v24 = vpop.f32.mrb[51].mxu0  ;;  %726 = vmatmul.mubr.f32.gmra.mrb[156].mxu0 %v188_v18 }
 0x17c   :  { %730 = vmatprep.mubr.f32.mxu0 %v191_v20  ;;  %v840_v20 = vmax.f32 %v358_v44, 0.0 }
 0x17d   :  { %v861_v30 = vmax.f32 %v463_v23, 0.0  ;;  %v201_v23 = vld [vmem:[%s8736_s0 + $0x548] sm:$0xff] }
 0x17e   :  { %v467_v31 = vpop.f32.mrb[52].mxu0 }
 0x17f   :  { %v6611_v33 = vmax.f32 %v836_v27, %v861_v30  ;;  %v468_v35 = vadd.f32 %v6590_v14, %v467_v31  ;;  %v469_v37 = vpop.f32.mrb[53].mxu0  ;;  %731 = vmatmul.mubr.f32.gmra.mrb[158].mxu0 %v190_v26  ;;  %v200_v30 = vld [vmem:[%s8736_s0 + $0x540] sm:$0xff] }
 0x180   :  { %735 = vmatprep.mubr.f32.mxu0 %v193_v32  ;;  %v841_v32 = vmax.f32 %v363_v48, 0.0 }
 0x181   :  { %v862_v42 = vmax.f32 %v468_v35, 0.0  ;;  %v203_v35 = vld [vmem:[%s8736_s0 + $0x558] sm:$0xff] }
 0x182   :  { %v472_v46 = vpop.f32.mrb[54].mxu0 }
 0x183   :  { %v6622_v47 = vmax.f32 %v837_v41, %v862_v42  ;;  %v473_v49 = vadd.f32 %v6590_v14, %v472_v46  ;;  %v474_v51 = vpop.f32.mrb[55].mxu0  ;;  %736 = vmatmul.mubr.f32.gmra.mrb[160].mxu0 %v192_v38  ;;  %v202_v42 = vld [vmem:[%s8736_s0 + $0x550] sm:$0xff] }
 0x184   :  { %740 = vmatprep.mubr.f32.mxu0 %v195_v43  ;;  %v842_v43 = vmax.f32 %v368_v52, 0.0 }
 0x185   :  { %v863_v57 = vmax.f32 %v473_v49, 0.0  ;;  %v205_v49 = vld [vmem:[%s8736_s0 + $0x568] sm:$0xff] }
 0x186   :  { %v477_v59 = vpop.f32.mrb[56].mxu0 }
 0x187   :  { %v6633_v62 = vmax.f32 %v838_v54, %v863_v57  ;;  %v478_v63 = vadd.f32 %v6590_v14, %v477_v59  ;;  %v479_v2 = vpop.f32.mrb[57].mxu0  ;;  %741 = vmatmul.mubr.f32.gmra.mrb[162].mxu0 %v194_v53  ;;  %v204_v57 = vld [vmem:[%s8736_s0 + $0x560] sm:$0xff] }
 0x188   :  { %745 = vmatprep.mubr.f32.mxu0 %v197_v58  ;;  %v843_v58 = vmax.f32 %v373_v56, 0.0 }
 0x189   :  { %v864_v7 = vmax.f32 %v478_v63, 0.0  ;;  %v207_v63 = vld [vmem:[%s8736_s0 + $0x578] sm:$0xff] }
 0x18a   :  { %v482_v11 = vpop.f32.mrb[58].mxu0 }
 0x18b   :  { %v6644_v12 = vmax.f32 %v839_v6, %v864_v7  ;;  %v483_v16 = vadd.f32 %v6590_v14, %v482_v11  ;;  %v484_v18 = vpop.f32.mrb[59].mxu0  ;;  %746 = vmatmul.mubr.f32.gmra.mrb[164].mxu0 %v196_v4  ;;  %v206_v7 = vld [vmem:[%s8736_s0 + $0x570] sm:$0xff] }
 0x18c   :  { %750 = vmatprep.mubr.f32.mxu0 %v199_v10  ;;  %v844_v10 = vmax.f32 %v378_v60, 0.0 }
 0x18d   :  { %v865_v22 = vmax.f32 %v483_v16, 0.0  ;;  %v209_v16 = vld [vmem:[%s8736_s0 + $0x588] sm:$0xff] }
 0x18e   :  { %v487_v24 = vpop.f32.mrb[60].mxu0 }
 0x18f   :  { %v6655_v26 = vmax.f32 %v840_v20, %v865_v22  ;;  %v488_v27 = vadd.f32 %v6590_v14, %v487_v24  ;;  %v489_v28 = vpop.f32.mrb[61].mxu0  ;;  %751 = vmatmul.mubr.f32.gmra.mrb[166].mxu0 %v198_v19  ;;  %v208_v22 = vld [vmem:[%s8736_s0 + $0x580] sm:$0xff] }
 0x190   :  { %755 = vmatprep.mubr.f32.mxu0 %v201_v23  ;;  %v845_v23 = vmax.f32 %v383_v1, 0.0 }
 0x191   :  { %v866_v31 = vmax.f32 %v488_v27, 0.0  ;;  %v211_v27 = vld [vmem:[%s8736_s0 + $0x598] sm:$0xff] }
 0x192   :  { %v492_v37 = vpop.f32.mrb[62].mxu0 }
 0x193   :  { %v6666_v38 = vmax.f32 %v841_v32, %v866_v31  ;;  %v493_v41 = vadd.f32 %v6590_v14, %v492_v37  ;;  %v494_v36 = vpop.f32.mrb[63].mxu0  ;;  %756 = vmatmul.mubr.f32.gmra.mrb[168].mxu0 %v200_v30  ;;  %v210_v31 = vld [vmem:[%s8736_s0 + $0x590] sm:$0xff] }
 0x194   :  { %760 = vmatprep.mubr.f32.mxu0 %v203_v35  ;;  %v846_v35 = vmax.f32 %v388_v5, 0.0 }
 0x195   :  { %v867_v46 = vmax.f32 %v493_v41, 0.0  ;;  %v213_v41 = vld [vmem:[%s8736_s0 + $0x5a8] sm:$0xff] }
 0x196   :  { %v497_v51 = vpop.f32.mrb[64].mxu0 }
 0x197   :  { %v6677_v53 = vmax.f32 %v842_v43, %v867_v46  ;;  %v498_v54 = vadd.f32 %v6590_v14, %v497_v51  ;;  %v499_v40 = vpop.f32.mrb[65].mxu0  ;;  %761 = vmatmul.mubr.f32.gmra.mrb[170].mxu0 %v202_v42  ;;  %v212_v46 = vld [vmem:[%s8736_s0 + $0x5a0] sm:$0xff] }
 0x198   :  { %765 = vmatprep.mubr.f32.mxu0 %v205_v49  ;;  %v847_v49 = vmax.f32 %v393_v9, 0.0  ;;  %v3415_v9 = vld [vmem:[%s8738_s3 + $0xa8] sm:$0xff] }
 0x199   :  { %v868_v59 = vmax.f32 %v498_v54, 0.0  ;;  %v215_v54 = vld [vmem:[%s8736_s0 + $0x5b8] sm:$0xff] }
 0x19a   :  { %v502_v2 = vpop.f32.mrb[66].mxu0 }
 0x19b   :  { %v6688_v4 = vmax.f32 %v843_v58, %v868_v59  ;;  %v503_v6 = vadd.f32 %v6590_v14, %v502_v2  ;;  %v504_v44 = vpop.f32.mrb[67].mxu0  ;;  %766 = vmatmul.mubr.f32.gmra.mrb[172].mxu0 %v204_v57  ;;  %v214_v59 = vld [vmem:[%s8736_s0 + $0x5b0] sm:$0xff]  ;;  %v848_v2 = vmax.f32 %v398_v13, 0.0 }
 0x19c   :  { %770 = vmatprep.mubr.f32.mxu0 %v207_v63  ;;  %v3411_v63 = vld [vmem:[%s8738_s3 + $0x88] sm:$0xff] }
 0x19d   :  { %v869_v11 = vmax.f32 %v503_v6, 0.0  ;;  %v403_v6 = vadd.f32 %v6590_v14, %v6499_v21  ;;  %v3412_v21 = vld [vmem:[%s8738_s3 + $0x90] sm:$0xff] }
 0x19e   :  { %v507_v18 = vpop.f32.mrb[68].mxu0 }
 0x19f   :  { %v6699_v19 = vmax.f32 %v844_v10, %v869_v11  ;;  %v508_v20 = vadd.f32 %v6590_v14, %v507_v18  ;;  %v509_v48 = vpop.f32.mrb[69].mxu0  ;;  %771 = vmatmul.mubr.f32.gmra.mrb[174].mxu0 %v206_v7  ;;  %v217_v7 = vld [vmem:[%s8736_s0 + $0x5c8] sm:$0xff]  ;;  %v5250_v10 = vpack.c.bf16 %v3411_v63, %v3410_v17  ;;  %v223_v17 = vld [vmem:[%s8736_s0 + $0x5f8] sm:$0xff] }
 0x1a0   :  { %775 = vmatprep.mubr.f32.mxu0 %v209_v16  ;;  %v3413_v48 = vld [vmem:[%s8738_s3 + $0x98] sm:$0xff] }
 0x1a1   :  { %v870_v24 = vmax.f32 %v508_v20, 0.0  ;;  %5251 = vmatpush3.bf16.msra.mxu1 %v5250_v10  ;;  %v216_v20 = vld [vmem:[%s8736_s0 + $0x5c0] sm:$0xff]  ;;  %v222_v10 = vld [vmem:[%s8736_s0 + $0x5f0] sm:$0xff] }
 0x1a2   :  { %v512_v28 = vpop.f32.mrb[70].mxu0  ;;  %5252 = vmatprep.subr.bf16.mxu1 %v8745_v0 }
 0x1a3   :  { %v6710_v30 = vmax.f32 %v845_v23, %v870_v24  ;;  %v513_v32 = vadd.f32 %v6590_v14, %v512_v28  ;;  %v514_v52 = vpop.f32.mrb[71].mxu0  ;;  %776 = vmatmul.mubr.f32.gmra.mrb[176].mxu0 %v208_v22  ;;  %v849_v22 = vmax.f32 %v403_v6, 0.0  ;;  %v408_v23 = vadd.f32 %v6590_v14, %v6507_v25  ;;  %v219_v24 = vld [vmem:[%s8736_s0 + $0x5d8] sm:$0xff]  ;;  %v3414_v25 = vld [vmem:[%s8738_s3 + $0xa0] sm:$0xff] }
 0x1a4   :  { %780 = vmatprep.mubr.f32.mxu0 %v211_v27  ;;  %v5253_v27 = vpack.c.bf16 %v3413_v48, %v3412_v21  ;;  %v225_v21 = vld [vmem:[%s8736_s0 + $0x608] sm:$0xff] }
 0x1a5   :  { %v871_v37 = vmax.f32 %v513_v32, 0.0 }
 0x1a6   :  { %v517_v36 = vpop.f32.mrb[72].mxu0  ;;  %5254 = vmatpush3.bf16.msra.mxu1 %v5253_v27  ;;  %v224_v27 = vld [vmem:[%s8736_s0 + $0x600] sm:$0xff] }
 0x1a7   :  { %v6721_v42 = vmax.f32 %v846_v35, %v871_v37  ;;  %v518_v43 = vadd.f32 %v6590_v14, %v517_v36  ;;  %v519_v56 = vpop.f32.mrb[73].mxu0  ;;  %781 = vmatmul.mubr.f32.gmra.mrb[178].mxu0 %v210_v31  ;;  %v218_v35 = vld [vmem:[%s8736_s0 + $0x5d0] sm:$0xff]  ;;  %5255 = vmatprep.subr.bf16.mxu1 %v8745_v0  ;;  %v850_v37 = vmax.f32 %v408_v23, 0.0 }
 0x1a8   :  { %785 = vmatprep.mubr.f32.mxu0 %v213_v41  ;;  %v413_v41 = vadd.f32 %v6590_v14, %v6515_v29  ;;  %v5256_v56 = vpack.c.bf16 %v3415_v9, %v3414_v25  ;;  %v3416_v29 = vld [vmem:[%s8738_s3 + $0xb0] sm:$0xff]  ;;  %v227_v25 = vld [vmem:[%s8736_s0 + $0x618] sm:$0xff] }
 0x1a9   :  { %v872_v51 = vmax.f32 %v518_v43, 0.0  ;;  %v221_v43 = vld [vmem:[%s8736_s0 + $0x5e8] sm:$0xff] }
 0x1aa   :  { %v522_v40 = vpop.f32.mrb[74].mxu0  ;;  %5257 = vmatpush3.bf16.msra.mxu1 %v5256_v56  ;;  %v226_v56 = vld [vmem:[%s8736_s0 + $0x610] sm:$0xff] }
 0x1ab   :  { %v6732_v57 = vmax.f32 %v847_v49, %v872_v51  ;;  %v523_v58 = vadd.f32 %v6590_v14, %v522_v40  ;;  %v524_v60 = vpop.f32.mrb[75].mxu0  ;;  %786 = vmatmul.mubr.f32.gmra.mrb[180].mxu0 %v212_v46  ;;  %5258 = vmatprep.subr.bf16.mxu1 %v8745_v0  ;;  %v3417_v40 = vld [vmem:[%s8738_s3 + $0xb8] sm:$0xff] }
 0x1ac   :  { %790 = vmatprep.mubr.f32.mxu0 %v215_v54  ;;  %v220_v54 = vld [vmem:[%s8736_s0 + $0x5e0] sm:$0xff]  ;;  %v418_v60 = vadd.f32 %v6590_v14, %v6523_v34  ;;  %v5259_v63 = vpack.c.bf16 %v3417_v40, %v3416_v29  ;;  %v229_v29 = vld [vmem:[%s8736_s0 + $0x628] sm:$0xff] }
 0x1ad   :  { %v873_v44 = vmax.f32 %v523_v58, 0.0  ;;  %v851_v58 = vmax.f32 %v413_v41, 0.0  ;;  %v3418_v34 = vld [vmem:[%s8738_s3 + $0xc0] sm:$0xff] }
 0x1ae   :  { %v527_v1 = vpop.f32.mrb[76].mxu0  ;;  %5260 = vmatpush3.bf16.msra.mxu1 %v5259_v63  ;;  %v438_v63 = vadd.f32 %v6590_v14, %v6555_v55  ;;  %v231_v55 = vld [vmem:[%s8736_s0 + $0x638] sm:$0xff] }
 0x1af   :  { %v6749_v11 = vmax.f32 %v848_v2, %v873_v44  ;;  %v528_v16 = vadd.f32 %v6590_v14, %v527_v1  ;;  %v529_v18 = vpop.f32.mrb[77].mxu0  ;;  %791 = vmatmul.mubr.f32.gmra.mrb[182].mxu0 %v214_v59  ;;  %5261 = vmatprep.subr.bf16.mxu1 %v8745_v0  ;;  %v3419_v1 = vld [vmem:[%s8738_s3 + $0xc8] sm:$0xff] }
 0x1b0   :  { %795 = vmatprep.mubr.f32.mxu0 %v217_v7  ;;  %v423_v18 = vadd.f32 %v6590_v14, %v6531_v39  ;;  %v5262_v48 = vpack.c.bf16 %v3419_v1, %v3418_v34  ;;  %v3420_v39 = vld [vmem:[%s8738_s3 + $0xd0] sm:$0xff] }
 0x1b1   :  { %v874_v5 = vmax.f32 %v528_v16, 0.0  ;;  %v852_v16 = vmax.f32 %v418_v60, 0.0 }
 0x1b2   :  { %v532_v28 = vpop.f32.mrb[78].mxu0  ;;  %5263 = vmatpush3.bf16.msra.mxu1 %v5262_v48  ;;  %v230_v48 = vld [vmem:[%s8736_s0 + $0x630] sm:$0xff] }
 0x1b3   :  { %v6767_v32 = vmax.f32 %v849_v22, %v874_v5  ;;  %v533_v52 = vadd.f32 %v6590_v14, %v532_v28  ;;  %v534_v31 = vpop.f32.mrb[79].mxu0  ;;  %796 = vmatmul.mubr.f32.gmra.mrb[184].mxu0 %v216_v20  ;;  %5264 = vmatprep.subr.bf16.mxu1 %v8745_v0  ;;  %v3421_v28 = vld [vmem:[%s8738_s3 + $0xd8] sm:$0xff] }
 0x1b4   :  { %800 = vmatprep.mubr.f32.mxu0 %v219_v24  ;;  %v428_v31 = vadd.f32 %v6590_v14, %v6539_v45  ;;  %v5265_v9 = vpack.c.bf16 %v3421_v28, %v3420_v39  ;;  %v3422_v45 = vld [vmem:[%s8738_s3 + $0xe0] sm:$0xff] }
 0x1b5   :  { %v875_v36 = vmax.f32 %v533_v52, 0.0  ;;  %v853_v52 = vmax.f32 %v423_v18, 0.0 }
 0x1b6   :  { %v537_v46 = vpop.f32.mrb[80].mxu0  ;;  %5266 = vmatpush3.bf16.msra.mxu1 %v5265_v9 }
 0x1b7   :  { %v6785_v49 = vmax.f32 %v850_v37, %v875_v36  ;;  %v538_v13 = vadd.f32 %v6590_v14, %v537_v46  ;;  %v539_v51 = vpop.f32.mrb[81].mxu0  ;;  %801 = vmatmul.mubr.f32.gmra.mrb[186].mxu0 %v218_v35  ;;  %5267 = vmatprep.subr.bf16.mxu1 %v8745_v0  ;;  %v3423_v46 = vld [vmem:[%s8738_s3 + $0xe8] sm:$0xff] }
 0x1b8   :  { %805 = vmatprep.mubr.f32.mxu0 %v221_v43  ;;  %v433_v51 = vadd.f32 %v6590_v14, %v6547_v50  ;;  %v5268_v40 = vpack.c.bf16 %v3423_v46, %v3422_v45  ;;  %v228_v50 = vld [vmem:[%s8736_s0 + $0x620] sm:$0xff] }
 0x1b9   :  { %v876_v59 = vmax.f32 %v538_v13, 0.0  ;;  %v854_v13 = vmax.f32 %v428_v31, 0.0 }
 0x1ba   :  { %v542_v2 = vpop.f32.mrb[82].mxu0  ;;  %5269 = vmatpush3.bf16.msra.mxu1 %v5268_v40 }
 0x1bb   :  { %v6803_v6 = vmax.f32 %v851_v58, %v876_v59  ;;  %v543_v44 = vadd.f32 %v6590_v14, %v542_v2  ;;  %v544_v7 = vpop.f32.mrb[83].mxu0  ;;  %806 = vmatmul.mubr.f32.gmra.mrb[188].mxu0 %v220_v54  ;;  %5270 = vmatprep.subr.bf16.mxu1 %v8745_v0  ;;  %v3424_v2 = vld [vmem:[%s8738_s3 + $0xf0] sm:$0xff] }
 0x1bc   :  { %810 = vmatprep.mubr.f32.mxu0 %v223_v17  ;;  %v855_v7 = vmax.f32 %v433_v51, 0.0 }
 0x1bd   :  { %v877_v20 = vmax.f32 %v543_v44, 0.0  ;;  %v3425_v44 = vld [vmem:[%s8738_s3 + $0xf8] sm:$0xff] }
 0x1be   :  { %v547_v22 = vpop.f32.mrb[84].mxu0  ;;  %v5271_v34 = vpack.c.bf16 %v3425_v44, %v3424_v2 }
 0x1bf   :  { %v6821_v23 = vmax.f32 %v852_v16, %v877_v20  ;;  %v548_v5 = vadd.f32 %v6590_v14, %v547_v22  ;;  %v549_v24 = vpop.f32.mrb[85].mxu0  ;;  %811 = vmatmul.mubr.f32.gmra.mrb[190].mxu0 %v222_v10  ;;  %v443_v22 = vadd.f32 %v6590_v14, %v6563_v61  ;;  %v448_v61 = vadd.f32 %v6590_v14, %v6571_v3 }
 0x1c0   :  { %815 = vmatprep.mubr.f32.mxu0 %v225_v21  ;;  %5272 = vmatpush3.bf16.msra.mxu1 %v5271_v34  ;;  %v856_v21 = vmax.f32 %v438_v63, 0.0  ;;  %v458_v3 = vadd.f32 %v6590_v14, %v6592_v15  ;;  %v3619_v15 = vld [vmem:[%s8738_s3 + $0x708] sm:$0xff] }
 0x1c1   :  { %v878_v35 = vmax.f32 %v548_v5, 0.0  ;;  %5273 = vmatprep.subr.bf16.mxu1 %v8745_v0  ;;  %v857_v31 = vmax.f32 %v443_v22, 0.0 }
 0x1c2   :  { %v552_v37 = vpop.f32.mrb[86].mxu0 }
 0x1c3   :  { %v6839_v41 = vmax.f32 %v853_v52, %v878_v35  ;;  %v553_v36 = vadd.f32 %v6590_v14, %v552_v37  ;;  %v554_v43 = vpop.f32.mrb[87].mxu0  ;;  %816 = vmatmul.mubr.f32.gmra.mrb[192].mxu0 %v224_v27  ;;  %v8747_v27 = vmov 0.0  }
 0x1c4   :  { %820 = vmatprep.mubr.f32.mxu0 %v227_v25  ;;  %4288 = vmatprep.mubr.msk.f32.mxu1 %vm5902_vm0, %v8747_v27  ;;  %v858_v43 = vmax.f32 %v448_v61, 0.0  ;;  %v3624_v61 = vld [vmem:[%s8738_s3 + $0x730] sm:$0xff] }
 0x1c5   :  { %v879_v54 = vmax.f32 %v553_v36, 0.0 }
 0x1c6   :  { %v557_v58 = vpop.f32.mrb[88].mxu0 }
 0x1c7   :  { %v6857_v60 = vmax.f32 %v854_v13, %v879_v54  ;;  %v558_v59 = vadd.f32 %v6590_v14, %v557_v58  ;;  %v559_v17 = vpop.f32.mrb[89].mxu0  ;;  %821 = vmatmul.mubr.f32.gmra.mrb[194].mxu0 %v226_v56  ;;  %v453_v56 = vadd.f32 %v6590_v14, %v6579_v8 }
 0x1c8   :  { %825 = vmatprep.mubr.f32.mxu0 %v229_v29 }
 0x1c9   :  { %v880_v10 = vmax.f32 %v558_v59, 0.0  ;;  %v859_v29 = vmax.f32 %v453_v56, 0.0 }
 0x1ca   :  { %v562_v1 = vpop.f32.mrb[90].mxu0 }
 0x1cb   :  { %v6875_v16 = vmax.f32 %v855_v7, %v880_v10  ;;  %v563_v18 = vadd.f32 %v6590_v14, %v562_v1  ;;  %v564_v20 = vpop.f32.mrb[91].mxu0  ;;  %826 = vmatmul.mubr.f32.gmra.mrb[196].mxu0 %v228_v50  ;;  %v860_v50 = vmax.f32 %v458_v3, 0.0  ;;  %v3618_v10 = vld [vmem:[%s8738_s3 + $0x700] sm:$0xff]  ;;  %v3629_v3 = vld [vmem:[%s8738_s3 + $0x758] sm:$0xff] }
 0x1cc   :  { %830 = vmatprep.mubr.f32.mxu0 %v231_v55  ;;  %v5586_v34 = vpack.c.bf16 %v3619_v15, %v3618_v10  ;;  %v3632_v10 = vld [vmem:[%s8738_s3 + $0x770] sm:$0xff] }
 0x1cd   :  { %v881_v5 = vmax.f32 %v563_v18, 0.0  ;;  %v3620_v18 = vld [vmem:[%s8738_s3 + $0x710] sm:$0xff] }
 0x1ce   :  { %v567_v24 = vpop.f32.mrb[92].mxu0  ;;  %5587 = vmatpush3.bf16.msra.mxu0 %v5586_v34  ;;  %v3633_v34 = vld [vmem:[%s8738_s3 + $0x778] sm:$0xff] }
 0x1cf   :  { %v6886_v39 = vmax.f32 %v856_v21, %v881_v5  ;;  %v568_v28 = vadd.f32 %v6590_v14, %v567_v24  ;;  %v569_v52 = vpop.f32.mrb[93].mxu0  ;;  %831 = vmatmul.mubr.f32.gmra.mrb[198].mxu0 %v230_v48  ;;  %5588 = vmatprep.subr.bf16.mxu0 %v8745_v0  ;;  %v3621_v21 = vld [vmem:[%s8738_s3 + $0x718] sm:$0xff]  ;;  %v3622_v5 = vld [vmem:[%s8738_s3 + $0x720] sm:$0xff] }
 0x1d0   :  { %4778 = vmatprep.mubr.msk.f32.mxu0 %vm5902_vm0, %v8747_v27  ;;  %v5589_v22 = vpack.c.bf16 %v3621_v21, %v3620_v18  ;;  %v5607_v18 = vpack.c.bf16 %v3633_v34, %v3632_v10 }
 0x1d1   :  { %v882_v35 = vmax.f32 %v568_v28, 0.0  ;;  %v3623_v28 = vld [vmem:[%s8738_s3 + $0x728] sm:$0xff] }
 0x1d2   :  { %v572_v25 = vpop.f32.mrb[94].mxu0  ;;  %5590 = vmatpush3.bf16.msra.mxu0 %v5589_v22 }
 0x1d3   :  { %v6893_v9 = vmax.f32 %v857_v31, %v882_v35  ;;  %v573_v37 = vadd.f32 %v6590_v14, %v572_v25  ;;  %v574_v36 = vpop.f32.mrb[95].mxu0  ;;  %5591 = vmatprep.subr.bf16.mxu0 %v8745_v0  ;;  %v5592_v31 = vpack.c.bf16 %v3623_v28, %v3622_v5  ;;  %v3625_v25 = vld [vmem:[%s8738_s3 + $0x738] sm:$0xff] }
 0x1d4   :  { %v5595_v36 = vpack.c.bf16 %v3625_v25, %v3624_v61 }
 0x1d5   :  { %v883_v45 = vmax.f32 %v573_v37, 0.0 }
 0x1d6   :  { %v577_v46 = vpop.f32.mrb[96].mxu0  ;;  %5593 = vmatpush3.bf16.msra.mxu0 %v5592_v31 }
 0x1d7   :  { %v6898_v13 = vmax.f32 %v858_v43, %v883_v45  ;;  %v578_v51 = vadd.f32 %v6590_v14, %v577_v46  ;;  %v579_v54 = vpop.f32.mrb[97].mxu0  ;;  %5594 = vmatprep.subr.bf16.mxu0 %v8745_v0  ;;  %v3626_v43 = vld [vmem:[%s8738_s3 + $0x740] sm:$0xff]  ;;  %v3627_v45 = vld [vmem:[%s8738_s3 + $0x748] sm:$0xff] }
 0x1d8   :  { %v3628_v54 = vld [vmem:[%s8738_s3 + $0x750] sm:$0xff] }
 0x1d9   :  { %v884_v40 = vmax.f32 %v578_v51, 0.0  ;;  %v5598_v51 = vpack.c.bf16 %v3627_v45, %v3626_v43 }
 0x1da   :  { %v582_v58 = vpop.f32.mrb[98].mxu0  ;;  %5596 = vmatpush3.bf16.msra.mxu0 %v5595_v36 }
 0x1db   :  { %v6903_v59 = vmax.f32 %v859_v29, %v884_v40  ;;  %v583_v17 = vadd.f32 %v6590_v14, %v582_v58  ;;  %v584_v63 = vpop.f32.mrb[99].mxu0  ;;  %5597 = vmatprep.subr.bf16.mxu0 %v8745_v0  ;;  %v5601_v58 = vpack.c.bf16 %v3629_v3, %v3628_v54 }
 0x1dd   :  { %v885_v8 = vmax.f32 %v583_v17, 0.0  ;;  %v3630_v17 = vld [vmem:[%s8738_s3 + $0x760] sm:$0xff] }
 0x1de   :  { %v6906_v2 = vpop.f32.mrb[100].mxu0  ;;  %5599 = vmatpush3.bf16.msra.mxu0 %v5598_v51 }
 0x1df   :  { %v6908_v44 = vmax.f32 %v860_v50, %v885_v8  ;;  %v589_v7 = vpop.f32.mrb[101].mxu0  ;;  %5600 = vmatprep.subr.bf16.mxu0 %v8745_v0  ;;  %v3631_v50 = vld [vmem:[%s8738_s3 + $0x768] sm:$0xff] }
 0x1e0   :  { %v5604_v7 = vpack.c.bf16 %v3631_v50, %v3630_v17 }
 0x1e1   :  { %8751 = vst [vmem:[#allocation2_spill] sm:$0xff] %v6908_v44  ;;  %v1014_v44 = vld [vmem:[%s8738_s3 + $0x18] sm:$0xff] }
 0x1e2   :  { %v6916_v55 = vpop.f32.mrb[102].mxu0  ;;  %5602 = vmatpush3.bf16.msra.mxu0 %v5601_v58 }
 0x1e3   :  { %v594_v1 = vpop.f32.mrb[103].mxu0  ;;  %5603 = vmatprep.subr.bf16.mxu0 %v8745_v0 }
 0x1e6   :  { %v6922_v20 = vpop.f32.mrb[104].mxu0  ;;  %5605 = vmatpush3.bf16.msra.mxu0 %v5604_v7 }
 0x1e7   :  { %v599_v48 = vpop.f32.mrb[105].mxu0  ;;  %5606 = vmatprep.subr.bf16.mxu0 %v8745_v0 }
 0x1ea   :  { %v6930_v24 = vpop.f32.mrb[106].mxu0  ;;  %5608 = vmatpush3.bf16.msra.mxu0 %v5607_v18 }
 0x1eb   :  { %v604_v52 = vpop.f32.mrb[107].mxu0  ;;  %5633 = vmatprep.subr.bf16.mxu0 %v8745_v0 }
 0x1ee   :  { %v6939_v35 = vpop.f32.mrb[108].mxu0 }
 0x1ef   :  { %v609_v37 = vpop.f32.mrb[109].mxu0 }
 0x1f2   :  { %v6948_v56 = vpop.f32.mrb[110].mxu0 }
 0x1f3   :  { %v614_v46 = vpop.f32.mrb[111].mxu0 }
 0x1f6   :  { %v6957_v29 = vpop.f32.mrb[112].mxu0 }
 0x1f7   :  { %v619_v40 = vpop.f32.mrb[113].mxu0 }
 0x1fa   :  { %v6966_v63 = vpop.f32.mrb[114].mxu0 }
 0x1fb   :  { %v624_v8 = vpop.f32.mrb[115].mxu0 }
 0x1fe   :  { %v6975_v15 = vpop.f32.mrb[116].mxu0 }
 0x1ff   :  { %v629_v1 = vpop.f32.mrb[117].mxu0 }
 0x202   :  { %v6981_v21 = vpop.f32.mrb[118].mxu0 }
 0x203   :  { %v634_v48 = vpop.f32.mrb[119].mxu0 }
 0x206   :  { %v6984_v22 = vpop.f32.mrb[120].mxu0 }
 0x207   :  { %v639_v5 = vpop.f32.mrb[121].mxu0 }
 0x20a   :  { %v6986_v28 = vpop.f32.mrb[122].mxu0 }
 0x20b   :  { %v644_v52 = vpop.f32.mrb[123].mxu0 }
 0x20e   :  { %v6988_v31 = vpop.f32.mrb[124].mxu0 }
 0x20f   :  { %v649_v61 = vpop.f32.mrb[125].mxu0 }
 0x212   :  { %v6990_v25 = vpop.f32.mrb[126].mxu0 }
 0x213   :  { %v654_v37 = vpop.f32.mrb[127].mxu0 }
 0x216   :  { %v6992_v36 = vpop.f32.mrb[128].mxu0 }
 0x217   :  { %v659_v43 = vpop.f32.mrb[129].mxu0 }
 0x218   :  { %v588_v43 = vadd.f32 %v6590_v14, %v6906_v2  ;;  %v1013_v2 = vld [vmem:[%s8738_s3 + $0x10] sm:$0xff] }
 0x21a   :  { %v6994_v45 = vpop.f32.mrb[130].mxu0 }
 0x21b   :  { %v664_v46 = vpop.f32.mrb[131].mxu0 }
 0x21e   :  { %v6996_v51 = vpop.f32.mrb[132].mxu0 }
 0x21f   :  { %v669_v54 = vpop.f32.mrb[133].mxu0 }
 0x222   :  { %v6998_v3 = vpop.f32.mrb[134].mxu0 }
 0x223   :  { %v674_v40 = vpop.f32.mrb[135].mxu0 }
 0x226   :  { %v7000_v58 = vpop.f32.mrb[136].mxu0 }
 0x227   :  { %v679_v17 = vpop.f32.mrb[137].mxu0 }
 0x228   :  { %v886_v17 = vmax.f32 %v588_v43, 0.0  ;;  %v1011_v43 = vld [vmem:[%s8738_s3] sm:$0xff] }
 0x22a   :  { %v7002_v50 = vpop.f32.mrb[138].mxu0 }
 0x22b   :  { %v684_v8 = vpop.f32.mrb[139].mxu0 }
 0x22c   :  { %v593_v8 = vadd.f32 %v6590_v14, %v6916_v55  ;;  %v1012_v55 = vld [vmem:[%s8738_s3 + $0x8] sm:$0xff] }
 0x22e   :  { %v7004_v7 = vpop.f32.mrb[140].mxu0  ;;  %v887_v27 = vmax.f32 %v593_v8, 0.0  ;;  %v5274_v8 = vpack.c.bf16 %v1012_v55, %v1011_v43  ;;  %v8752_v55 = vmov 0.0  }
 0x22f   :  { %v689_v10 = vpop.f32.mrb[141].mxu0 }
 0x232   :  { %v7006_v34 = vpop.f32.mrb[142].mxu0 }
 0x233   :  { %v694_v1 = vpop.f32.mrb[143].mxu0 }
 0x236   :  { %v7008_v18 = vpop.f32.mrb[144].mxu0 }
 0x237   :  { %v699_v48 = vpop.f32.mrb[145].mxu0 }
 0x23a   :  { %v7010_v5 = vpop.f32.mrb[146].mxu0 }
 0x23b   :  { %v704_v52 = vpop.f32.mrb[147].mxu0 }
 0x23e   :  { %v7012_v61 = vpop.f32.mrb[148].mxu0 }
 0x23f   :  { %v709_v37 = vpop.f32.mrb[149].mxu0 }
 0x240   :  { %v598_v37 = vadd.f32 %v6590_v14, %v6922_v20  ;;  %v603_v20 = vadd.f32 %v6590_v14, %v6930_v24  ;;  %v5277_v24 = vpack.c.bf16 %v1014_v44, %v1013_v2  ;;  %v1016_v44 = vld [vmem:[%s8738_s3 + $0x28] sm:$0xff] }
 0x242   :  { %v712_v46 = vpop.f32.mrb[150].mxu0 }
 0x243   :  { %v713_v54 = vadd.f32 %v6590_v14, %v712_v46  ;;  %v714_v40 = vpop.f32.mrb[151].mxu0 }
 0x245   :  { %v911_v10 = vmax.f32 %v713_v54, 0.0 }
 0x246   :  { %v717_v1 = vpop.f32.mrb[152].mxu0 }
 0x247   :  { %v7019_v48 = vmax.f32 %v886_v17, %v911_v10  ;;  %v718_v52 = vadd.f32 %v6590_v14, %v717_v1  ;;  %v719_v0 = vpop.f32.mrb[153].mxu0  ;;  %v888_v10 = vmax.f32 %v598_v37, 0.0 }
 0x249   :  { %v912_v46 = vmax.f32 %v718_v52, 0.0 }
 0x24a   :  { %v722_v54 = vpop.f32.mrb[154].mxu0 }
 0x24b   :  { %v962_v40 = vmax.f32 %v887_v27, %v912_v46  ;;  %v723_v0 = vadd.f32 %v6590_v14, %v722_v54  ;;  %v724_v17 = vpop.f32.mrb[155].mxu0  ;;  %v608_v54 = vadd.f32 %v6590_v14, %v6939_v35 }
 0x24c   :  { %v8753_v17 = vmov 0.0|0.0  }
 0x24d   :  { %v913_v1 = vmax.f32 %v723_v0, 0.0  ;;  %v987_v52 = vmax.f32 %v6622_v47, %v962_v40  ;;  %v889_v47 = vmax.f32 %v603_v20, 0.0 }
 0x24e   :  { %v727_v27 = vpop.f32.mrb[156].mxu0 }
 0x24f   :  { %v7042_v46 = vmax.f32 %v888_v10, %v913_v1  ;;  %v728_v43 = vadd.f32 %v6590_v14, %v727_v27  ;;  %4289 = vmatmul.mubr.f32.vlgmr.msra.gmra.mrb[0].mxu1 %v987_v52  ;;  %v729_v37 = vpop.f32.mrb[157].mxu0  ;;  %v1015_v10 = vld [vmem:[%s8738_s3 + $0x20] sm:$0xff]  ;;  %v890_v52 = vmax.f32 %v608_v54, 0.0  ;;  %v613_v27 = vadd.f32 %v6590_v14, %v6948_v56 }
 0x250   :  { %5275 = vmatpush3.bf16.msra.mxu1 %v5274_v8  ;;  %4323 = vmatprep.mubr.msk.f32.mxu1 %vm5902_vm0, %v8752_v55  ;;  %v5280_v1 = vpack.c.bf16 %v1016_v44, %v1015_v10 }
 0x251   :  { %v914_v0 = vmax.f32 %v728_v43, 0.0  ;;  %5276 = vmatprep.subr.bf16.mxu1 %v8753_v17 }
 0x252   :  { %v732_v2 = vpop.f32.mrb[158].mxu0 }
 0x253   :  { %v7058_v8 = vmax.f32 %v889_v47, %v914_v0  ;;  %v733_v20 = vadd.f32 %v6590_v14, %v732_v2  ;;  %v734_v35 = vpop.f32.mrb[159].mxu0  ;;  %v1017_v47 = vld [vmem:[%s8738_s3 + $0x30] sm:$0xff]  ;;  %v1018_v0 = vld [vmem:[%s8738_s3 + $0x38] sm:$0xff]  ;;  %v891_v2 = vmax.f32 %v613_v27, 0.0 }
 0x254   :  { %5278 = vmatpush3.bf16.msra.mxu1 %v5277_v24  ;;  %v5283_v44 = vpack.c.bf16 %v1018_v0, %v1017_v47 }
 0x255   :  { %v915_v37 = vmax.f32 %v733_v20, 0.0  ;;  %5279 = vmatprep.subr.bf16.mxu1 %v8753_v17  ;;  %v618_v20 = vadd.f32 %v6590_v14, %v6957_v29 }
 0x256   :  { %v737_v24 = vpop.f32.mrb[160].mxu0 }
 0x257   :  { %v7072_v10 = vmax.f32 %v890_v52, %v915_v37  ;;  %v738_v54 = vadd.f32 %v6590_v14, %v737_v24  ;;  %v739_v56 = vpop.f32.mrb[161].mxu0  ;;  %v1019_v52 = vld [vmem:[%s8738_s3 + $0x40] sm:$0xff]  ;;  %v1020_v37 = vld [vmem:[%s8738_s3 + $0x48] sm:$0xff]  ;;  %v892_v24 = vmax.f32 %v618_v20, 0.0 }
 0x258   :  { %5281 = vmatpush3.bf16.msra.mxu1 %v5280_v1  ;;  %v5286_v0 = vpack.c.bf16 %v1020_v37, %v1019_v52 }
 0x259   :  { %v916_v43 = vmax.f32 %v738_v54, 0.0  ;;  %5282 = vmatprep.subr.bf16.mxu1 %v8753_v17  ;;  %v623_v54 = vadd.f32 %v6590_v14, %v6966_v63 }
 0x25a   :  { %v742_v1 = vpop.f32.mrb[162].mxu0 }
 0x25b   :  { %v7086_v47 = vmax.f32 %v891_v2, %v916_v43  ;;  %v743_v27 = vadd.f32 %v6590_v14, %v742_v1  ;;  %v744_v29 = vpop.f32.mrb[163].mxu0  ;;  %v1021_v43 = vld [vmem:[%s8738_s3 + $0x50] sm:$0xff]  ;;  %v1022_v2 = vld [vmem:[%s8738_s3 + $0x58] sm:$0xff]  ;;  %v893_v1 = vmax.f32 %v623_v54, 0.0 }
 0x25c   :  { %5284 = vmatpush3.bf16.msra.mxu1 %v5283_v44  ;;  %v5289_v37 = vpack.c.bf16 %v1022_v2, %v1021_v43 }
 0x25d   :  { %v917_v35 = vmax.f32 %v743_v27, 0.0  ;;  %5285 = vmatprep.subr.bf16.mxu1 %v8753_v17  ;;  %v628_v27 = vadd.f32 %v6590_v14, %v6975_v15 }
 0x25e   :  { %v747_v44 = vpop.f32.mrb[164].mxu0 }
 0x25f   :  { %v7100_v52 = vmax.f32 %v892_v24, %v917_v35  ;;  %v748_v20 = vadd.f32 %v6590_v14, %v747_v44  ;;  %v749_v63 = vpop.f32.mrb[165].mxu0  ;;  %v1023_v35 = vld [vmem:[%s8738_s3 + $0x60] sm:$0xff]  ;;  %v1024_v24 = vld [vmem:[%s8738_s3 + $0x68] sm:$0xff]  ;;  %v894_v44 = vmax.f32 %v628_v27, 0.0 }
 0x260   :  { %5287 = vmatpush3.bf16.msra.mxu1 %v5286_v0  ;;  %v5292_v2 = vpack.c.bf16 %v1024_v24, %v1023_v35 }
 0x261   :  { %v918_v56 = vmax.f32 %v748_v20, 0.0  ;;  %5288 = vmatprep.subr.bf16.mxu1 %v8753_v17  ;;  %v633_v20 = vadd.f32 %v6590_v14, %v6981_v21 }
 0x262   :  { %v752_v0 = vpop.f32.mrb[166].mxu0 }
 0x263   :  { %v7114_v43 = vmax.f32 %v893_v1, %v918_v56  ;;  %v753_v54 = vadd.f32 %v6590_v14, %v752_v0  ;;  %v754_v15 = vpop.f32.mrb[167].mxu0  ;;  %v1025_v56 = vld [vmem:[%s8738_s3 + $0x70] sm:$0xff]  ;;  %v1026_v1 = vld [vmem:[%s8738_s3 + $0x78] sm:$0xff]  ;;  %v895_v0 = vmax.f32 %v633_v20, 0.0 }
 0x264   :  { %5290 = vmatpush3.bf16.msra.mxu1 %v5289_v37  ;;  %v5295_v24 = vpack.c.bf16 %v1026_v1, %v1025_v56 }
 0x265   :  { %v919_v29 = vmax.f32 %v753_v54, 0.0  ;;  %5291 = vmatprep.subr.bf16.mxu1 %v8753_v17  ;;  %v7134_v54 = vld [vmem:[%s8737_s2] ss:$0 sm:$0xff] }
 0x266   :  { %v757_v37 = vpop.f32.mrb[168].mxu0  ;;  %v638_v15 = vadd.f32 %v7134_v54, %v6984_v22 }
 0x267   :  { %v7128_v35 = vmax.f32 %v894_v44, %v919_v29  ;;  %v758_v27 = vadd.f32 %v6590_v14, %v757_v37  ;;  %v759_v21 = vpop.f32.mrb[169].mxu0  ;;  %v3426_v14 = vld [vmem:[%s8738_s3 + $0x100] sm:$0xff]  ;;  %v3427_v29 = vld [vmem:[%s8738_s3 + $0x108] sm:$0xff]  ;;  %v643_v37 = vadd.f32 %v7134_v54, %v6986_v28  ;;  %v8754_v28 = vmax.f32 %v6611_v33, %v7019_v48 }
 0x268   :  { %5293 = vmatpush3.bf16.msra.mxu1 %v5292_v2  ;;  %v5298_v56 = vpack.c.bf16 %v3427_v29, %v3426_v14  ;;  %v896_v1 = vmax.f32 %v638_v15, 0.0  ;;  %v3430_v33 = vld [vmem:[%s8738_s3 + $0x120] sm:$0xff]  ;;  %v3431_v48 = vld [vmem:[%s8738_s3 + $0x128] sm:$0xff] }
 0x269   :  { %v920_v40 = vmax.f32 %v758_v27, 0.0  ;;  %5294 = vmatprep.subr.bf16.mxu1 %v8753_v17  ;;  %v668_v27 = vadd.f32 %v7134_v54, %v6996_v51 }
 0x26a   :  { %v762_v2 = vpop.f32.mrb[170].mxu0 }
 0x26b   :  { %v7147_v44 = vmax.f32 %v895_v0, %v920_v40  ;;  %v763_v20 = vadd.f32 %v7134_v54, %v762_v2  ;;  %v764_v22 = vpop.f32.mrb[171].mxu0  ;;  %v3428_v40 = vld [vmem:[%s8738_s3 + $0x110] sm:$0xff]  ;;  %v3429_v0 = vld [vmem:[%s8738_s3 + $0x118] sm:$0xff] }
 0x26c   :  { %5296 = vmatpush3.bf16.msra.mxu1 %v5295_v24  ;;  %v5301_v2 = vpack.c.bf16 %v3429_v0, %v3428_v40  ;;  %v648_v22 = vadd.f32 %v7134_v54, %v6988_v31  ;;  %v5304_v0 = vpack.c.bf16 %v3431_v48, %v3430_v33 }
 0x26d   :  { %v921_v21 = vmax.f32 %v763_v20, 0.0  ;;  %5297 = vmatprep.subr.bf16.mxu1 %v8753_v17  ;;  %v897_v20 = vmax.f32 %v643_v37, 0.0 }
 0x26e   :  { %v767_v24 = vpop.f32.mrb[172].mxu0 }
 0x26f   :  { %v7161_v14 = vmax.f32 %v896_v1, %v921_v21  ;;  %v768_v15 = vadd.f32 %v7134_v54, %v767_v24  ;;  %4324 = vmatmul.mubr.f32.vlgmr.msra.gmra.mrb[2].mxu1 %v8754_v28  ;;  %v769_v29 = vpop.f32.mrb[173].mxu0  ;;  %v898_v24 = vmax.f32 %v648_v22, 0.0 }
 0x270   :  { %5299 = vmatpush3.bf16.msra.mxu1 %v5298_v56  ;;  %4358 = vmatprep.mubr.msk.f32.mxu1 %vm5902_vm0, %v8752_v55 }
 0x271   :  { %v922_v21 = vmax.f32 %v768_v15, 0.0  ;;  %5300 = vmatprep.subr.bf16.mxu1 %v8753_v17  ;;  %v653_v15 = vadd.f32 %v7134_v54, %v6990_v25 }
 0x272   :  { %v772_v56 = vpop.f32.mrb[174].mxu0 }
 0x273   :  { %v7180_v40 = vmax.f32 %v897_v20, %v922_v21  ;;  %v773_v37 = vadd.f32 %v7134_v54, %v772_v56  ;;  %v774_v31 = vpop.f32.mrb[175].mxu0  ;;  %v3432_v20 = vld [vmem:[%s8738_s3 + $0x130] sm:$0xff]  ;;  %v3433_v21 = vld [vmem:[%s8738_s3 + $0x138] sm:$0xff]  ;;  %v899_v56 = vmax.f32 %v653_v15, 0.0 }
 0x274   :  { %5302 = vmatpush3.bf16.msra.mxu1 %v5301_v2  ;;  %v5307_v48 = vpack.c.bf16 %v3433_v21, %v3432_v20 }
 0x275   :  { %v923_v29 = vmax.f32 %v773_v37, 0.0  ;;  %5303 = vmatprep.subr.bf16.mxu1 %v8753_v17  ;;  %v658_v37 = vadd.f32 %v7134_v54, %v6992_v36 }
 0x276   :  { %v777_v2 = vpop.f32.mrb[176].mxu0 }
 0x277   :  { %v7194_v33 = vmax.f32 %v898_v24, %v923_v29  ;;  %v778_v22 = vadd.f32 %v7134_v54, %v777_v2  ;;  %v779_v25 = vpop.f32.mrb[177].mxu0  ;;  %v3434_v24 = vld [vmem:[%s8738_s3 + $0x140] sm:$0xff]  ;;  %v3435_v29 = vld [vmem:[%s8738_s3 + $0x148] sm:$0xff]  ;;  %v3436_v2 = vld [vmem:[%s8738_s3 + $0x150] sm:$0xff] }
 0x278   :  { %5305 = vmatpush3.bf16.msra.mxu1 %v5304_v0  ;;  %v5310_v21 = vpack.c.bf16 %v3435_v29, %v3434_v24  ;;  %v663_v25 = vadd.f32 %v7134_v54, %v6994_v45 }
 0x279   :  { %v924_v28 = vmax.f32 %v778_v22, 0.0  ;;  %5306 = vmatprep.subr.bf16.mxu1 %v8753_v17  ;;  %v900_v22 = vmax.f32 %v658_v37, 0.0 }
 0x27a   :  { %v782_v0 = vpop.f32.mrb[178].mxu0  ;;  %v901_v31 = vmax.f32 %v663_v25, 0.0 }
 0x27b   :  { %v7208_v20 = vmax.f32 %v899_v56, %v924_v28  ;;  %v783_v15 = vadd.f32 %v7134_v54, %v782_v0  ;;  %v784_v36 = vpop.f32.mrb[179].mxu0  ;;  %v3437_v28 = vld [vmem:[%s8738_s3 + $0x158] sm:$0xff]  ;;  %v3651_v56 = vld [vmem:[%s8738_s3 + $0x808] sm:$0xff] }
 0x27c   :  { %5308 = vmatpush3.bf16.msra.mxu1 %v5307_v48  ;;  %v3650_v48 = vld [vmem:[%s8738_s3 + $0x800] sm:$0xff]  ;;  %v5313_v0 = vpack.c.bf16 %v3437_v28, %v3436_v2  ;;  %v3653_v2 = vld [vmem:[%s8738_s3 + $0x818] sm:$0xff] }
 0x27d   :  { %8755 = vst [vmem:[#allocation3_spill] sm:$0xff] %v7208_v20  ;;  %v925_v1 = vmax.f32 %v783_v15, 0.0  ;;  %5309 = vmatprep.subr.bf16.mxu1 %v8753_v17  ;;  %v5634_v15 = vpack.c.bf16 %v3651_v56, %v3650_v48  ;;  %v3438_v36 = vld [vmem:[%s8738_s3 + $0x160] sm:$0xff]  ;;  %v3440_v56 = vld [vmem:[%s8738_s3 + $0x170] sm:$0xff] }
 0x27e   :  { %v787_v37 = vpop.f32.mrb[180].mxu0 }
 0x27f   :  { %v975_v45 = vmax.f32 %v900_v22, %v925_v1  ;;  %v788_v24 = vadd.f32 %v7134_v54, %v787_v37  ;;  %v789_v29 = vpop.f32.mrb[181].mxu0  ;;  %v3439_v1 = vld [vmem:[%s8738_s3 + $0x168] sm:$0xff]  ;;  %v902_v37 = vmax.f32 %v668_v27, 0.0 }
 0x280   :  { %5311 = vmatpush3.bf16.msra.mxu1 %v5310_v21  ;;  %v3652_v21 = vld [vmem:[%s8738_s3 + $0x810] sm:$0xff]  ;;  %v5316_v28 = vpack.c.bf16 %v3439_v1, %v3438_v36 }
 0x281   :  { %v1000_v63 = vmax.f32 %v6785_v49, %v975_v45  ;;  %v926_v20 = vmax.f32 %v788_v24, 0.0  ;;  %5312 = vmatprep.subr.bf16.mxu1 %v8753_v17  ;;  %v5637_v48 = vpack.c.bf16 %v3653_v2, %v3652_v21  ;;  %v673_v45 = vadd.f32 %v7134_v54, %v6998_v3  ;;  %v3654_v24 = vld [vmem:[%s8738_s3 + $0x820] sm:$0xff]  ;;  %v3655_v3 = vld [vmem:[%s8738_s3 + $0x828] sm:$0xff] }
 0x282   :  { %v792_v22 = vpop.f32.mrb[182].mxu0  ;;  %v5640_v1 = vpack.c.bf16 %v3655_v3, %v3654_v24  ;;  %v3442_v21 = vld [vmem:[%s8738_s3 + $0x180] sm:$0xff]  ;;  %v3444_v3 = vld [vmem:[%s8738_s3 + $0x190] sm:$0xff] }
 0x283   :  { %v7245_v25 = vmax.f32 %v901_v31, %v926_v20  ;;  %v793_v49 = vadd.f32 %v7134_v54, %v792_v22  ;;  %4779 = vmatmul.mubr.f32.vlgmr.msra.gmra.mrb[200].mxu0 %v1000_v63  ;;  %v794_v51 = vpop.f32.mrb[183].mxu0  ;;  %v3441_v63 = vld [vmem:[%s8738_s3 + $0x178] sm:$0xff]  ;;  %v903_v2 = vmax.f32 %v673_v45, 0.0  ;;  %v678_v22 = vadd.f32 %v7134_v54, %v7000_v58 }
 0x284   :  { %5314 = vmatpush3.bf16.msra.mxu1 %v5313_v0  ;;  %5635 = vmatpush3.bf16.msra.mxu0 %v5634_v15  ;;  %v5319_v36 = vpack.c.bf16 %v3441_v63, %v3440_v56  ;;  %v3657_v58 = vld [vmem:[%s8738_s3 + $0x838] sm:$0xff] }
 0x285   :  { %v1001_v31 = vmax.f32 %v6803_v6, %v7245_v25  ;;  %v927_v20 = vmax.f32 %v793_v49, 0.0  ;;  %5315 = vmatprep.subr.bf16.mxu1 %v8753_v17  ;;  %5636 = vmatprep.subr.bf16.mxu0 %v8753_v17  ;;  %v3672_v6 = vld [vmem:[%s8738_s3 + $0x8b0] sm:$0xff]  ;;  %v3673_v25 = vld [vmem:[%s8738_s3 + $0x8b8] sm:$0xff] }
 0x286   :  { %v797_v27 = vpop.f32.mrb[184].mxu0  ;;  %4848 = vmatprep.mubr.msk.f32.mxu0 %vm5902_vm0, %v8752_v55 }
 0x287   :  { %v7268_v29 = vmax.f32 %v902_v37, %v927_v20  ;;  %v798_v0 = vadd.f32 %v7134_v54, %v797_v27  ;;  %v799_v15 = vpop.f32.mrb[185].mxu0  ;;  %v904_v27 = vmax.f32 %v678_v22, 0.0 }
 0x288   :  { %5317 = vmatpush3.bf16.msra.mxu1 %v5316_v28  ;;  %5638 = vmatpush3.bf16.msra.mxu0 %v5637_v48  ;;  %v3443_v28 = vld [vmem:[%s8738_s3 + $0x188] sm:$0xff]  ;;  %v3656_v48 = vld [vmem:[%s8738_s3 + $0x830] sm:$0xff] }
 0x289   :  { %v1002_v49 = vmax.f32 %v6821_v23, %v7268_v29  ;;  %v928_v51 = vmax.f32 %v798_v0, 0.0  ;;  %5318 = vmatprep.subr.bf16.mxu1 %v8753_v17  ;;  %5639 = vmatprep.subr.bf16.mxu0 %v8753_v17  ;;  %v5322_v63 = vpack.c.bf16 %v3443_v28, %v3442_v21  ;;  %v5643_v24 = vpack.c.bf16 %v3657_v58, %v3656_v48  ;;  %v3457_v23 = vld [vmem:[%s8738_s3 + $0x1f8] sm:$0xff]  ;;  %v3687_v29 = vld [vmem:[%s8738_s3 + $0x928] sm:$0xff] }
 0x28a   :  { %v802_v56 = vpop.f32.mrb[186].mxu0  ;;  %v683_v0 = vadd.f32 %v7134_v54, %v7002_v50  ;;  %v3659_v50 = vld [vmem:[%s8738_s3 + $0x848] sm:$0xff]  ;;  %v8756_v28 = vmax.f32 %v6633_v62, %v7042_v46  ;;  %v3660_v46 = vld [vmem:[%s8738_s3 + $0x850] sm:$0xff] }
 0x28b   :  { %v7289_v37 = vmax.f32 %v903_v2, %v928_v51  ;;  %v803_v45 = vadd.f32 %v7134_v54, %v802_v56  ;;  %v804_v20 = vpop.f32.mrb[187].mxu0  ;;  %v3447_v62 = vld [vmem:[%s8738_s3 + $0x1a8] sm:$0xff] }
 0x28c   :  { %5320 = vmatpush3.bf16.msra.mxu1 %v5319_v36  ;;  %5641 = vmatpush3.bf16.msra.mxu0 %v5640_v1  ;;  %v3445_v36 = vld [vmem:[%s8738_s3 + $0x198] sm:$0xff]  ;;  %v3658_v1 = vld [vmem:[%s8738_s3 + $0x840] sm:$0xff]  ;;  %v905_v20 = vmax.f32 %v683_v0, 0.0 }
 0x28d   :  { %v929_v2 = vmax.f32 %v803_v45, 0.0  ;;  %5321 = vmatprep.subr.bf16.mxu1 %v8753_v17  ;;  %5642 = vmatprep.subr.bf16.mxu0 %v8753_v17  ;;  %v5325_v58 = vpack.c.bf16 %v3445_v36, %v3444_v3  ;;  %v5646_v56 = vpack.c.bf16 %v3659_v50, %v3658_v1  ;;  %v3446_v45 = vld [vmem:[%s8738_s3 + $0x1a0] sm:$0xff]  ;;  %v3448_v50 = vld [vmem:[%s8738_s3 + $0x1b0] sm:$0xff] }
 0x28e   :  { %v807_v21 = vpop.f32.mrb[188].mxu0  ;;  %v5328_v36 = vpack.c.bf16 %v3447_v62, %v3446_v45 }
 0x28f   :  { %v7310_v22 = vmax.f32 %v904_v27, %v929_v2  ;;  %v808_v51 = vadd.f32 %v7134_v54, %v807_v21  ;;  %4359 = vmatmul.mubr.f32.vlgmr.msra.gmra.mrb[4].mxu1 %v8756_v28  ;;  %v809_v48 = vpop.f32.mrb[189].mxu0  ;;  %v688_v27 = vadd.f32 %v7134_v54, %v7004_v7  ;;  %v3661_v7 = vld [vmem:[%s8738_s3 + $0x858] sm:$0xff]  ;;  %v693_v28 = vadd.f32 %v7134_v54, %v7006_v34  ;;  %v3663_v34 = vld [vmem:[%s8738_s3 + $0x868] sm:$0xff] }
 0x290   :  { %5323 = vmatpush3.bf16.msra.mxu1 %v5322_v63  ;;  %5644 = vmatpush3.bf16.msra.mxu0 %v5643_v24  ;;  %v5649_v1 = vpack.c.bf16 %v3661_v7, %v3660_v46 }
 0x291   :  { %v1004_v2 = vmax.f32 %v6857_v60, %v7310_v22  ;;  %v930_v21 = vmax.f32 %v808_v51, 0.0  ;;  %5324 = vmatprep.subr.bf16.mxu1 %v8753_v17  ;;  %5645 = vmatprep.subr.bf16.mxu0 %v8753_v17  ;;  %v906_v51 = vmax.f32 %v688_v27, 0.0  ;;  %v3718_v60 = vld [vmem:[%s8738_s3 + $0xa20] sm:$0xff]  ;;  %v3719_v22 = vld [vmem:[%s8738_s3 + $0xa28] sm:$0xff] }
 0x292   :  { %v812_v63 = vpop.f32.mrb[190].mxu0  ;;  %4393 = vmatprep.mubr.msk.f32.mxu1 %vm5902_vm0, %v8752_v55 }
 0x293   :  { %v7336_v24 = vmax.f32 %v905_v20, %v930_v21  ;;  %v813_v3 = vadd.f32 %v7134_v54, %v812_v63  ;;  %v814_v0 = vpop.f32.mrb[191].mxu0  ;;  %v3450_v63 = vld [vmem:[%s8738_s3 + $0x1c0] sm:$0xff] }
 0x294   :  { %5326 = vmatpush3.bf16.msra.mxu1 %v5325_v58  ;;  %5647 = vmatpush3.bf16.msra.mxu0 %v5646_v56  ;;  %v3449_v58 = vld [vmem:[%s8738_s3 + $0x1b8] sm:$0xff]  ;;  %v3662_v56 = vld [vmem:[%s8738_s3 + $0x860] sm:$0xff]  ;;  %v698_v0 = vadd.f32 %v7134_v54, %v7008_v18 }
 0x295   :  { %v931_v20 = vmax.f32 %v813_v3, 0.0  ;;  %5327 = vmatprep.subr.bf16.mxu1 %v8753_v17  ;;  %5648 = vmatprep.subr.bf16.mxu0 %v8753_v17  ;;  %v5331_v46 = vpack.c.bf16 %v3449_v58, %v3448_v50  ;;  %v5652_v7 = vpack.c.bf16 %v3663_v34, %v3662_v56  ;;  %v907_v3 = vmax.f32 %v693_v28, 0.0  ;;  %v3665_v18 = vld [vmem:[%s8738_s3 + $0x878] sm:$0xff] }
 0x296   :  { %v817_v45 = vpop.f32.mrb[192].mxu0 }
 0x297   :  { %v7357_v27 = vmax.f32 %v906_v51, %v931_v20  ;;  %v818_v21 = vadd.f32 %v7134_v54, %v817_v45  ;;  %v819_v62 = vpop.f32.mrb[193].mxu0  ;;  %v3452_v45 = vld [vmem:[%s8738_s3 + $0x1d0] sm:$0xff] }
 0x298   :  { %5329 = vmatpush3.bf16.msra.mxu1 %v5328_v36  ;;  %5650 = vmatpush3.bf16.msra.mxu0 %v5649_v1  ;;  %v3451_v36 = vld [vmem:[%s8738_s3 + $0x1c8] sm:$0xff]  ;;  %v3664_v1 = vld [vmem:[%s8738_s3 + $0x870] sm:$0xff]  ;;  %v703_v62 = vadd.f32 %v7134_v54, %v7010_v5 }
 0x299   :  { %v1006_v48 = vmax.f32 %v6886_v39, %v7357_v27  ;;  %v932_v51 = vmax.f32 %v818_v21, 0.0  ;;  %5330 = vmatprep.subr.bf16.mxu1 %v8753_v17  ;;  %5651 = vmatprep.subr.bf16.mxu0 %v8753_v17  ;;  %v5334_v56 = vpack.c.bf16 %v3451_v36, %v3450_v63  ;;  %v5655_v34 = vpack.c.bf16 %v3665_v18, %v3664_v1  ;;  %v3683_v5 = vld [vmem:[%s8738_s3 + $0x908] sm:$0xff]  ;;  %v3750_v39 = vld [vmem:[%s8738_s3 + $0xb20] sm:$0xff] }
 0x29a   :  { %v822_v50 = vpop.f32.mrb[194].mxu0  ;;  %v908_v21 = vmax.f32 %v698_v0, 0.0 }
 0x29b   :  { %v7378_v28 = vmax.f32 %v907_v3, %v932_v51  ;;  %v823_v20 = vadd.f32 %v7134_v54, %v822_v50  ;;  %v824_v58 = vpop.f32.mrb[195].mxu0  ;;  %v3454_v50 = vld [vmem:[%s8738_s3 + $0x1e0] sm:$0xff] }
 0x29c   :  { %5332 = vmatpush3.bf16.msra.mxu1 %v5331_v46  ;;  %5653 = vmatpush3.bf16.msra.mxu0 %v5652_v7  ;;  %v3453_v46 = vld [vmem:[%s8738_s3 + $0x1d8] sm:$0xff]  ;;  %v3682_v7 = vld [vmem:[%s8738_s3 + $0x900] sm:$0xff]  ;;  %v708_v58 = vadd.f32 %v7134_v54, %v7012_v61 }
 0x29d   :  { %v933_v3 = vmax.f32 %v823_v20, 0.0  ;;  %5333 = vmatprep.subr.bf16.mxu1 %v8753_v17  ;;  %5654 = vmatprep.subr.bf16.mxu0 %v8753_v17  ;;  %v5337_v1 = vpack.c.bf16 %v3453_v46, %v3452_v45  ;;  %v5682_v18 = vpack.c.bf16 %v3683_v5, %v3682_v7  ;;  %v909_v20 = vmax.f32 %v703_v62, 0.0  ;;  %v3685_v61 = vld [vmem:[%s8738_s3 + $0x918] sm:$0xff] }
 0x29e   :  { %v827_v63 = vpop.f32.mrb[196].mxu0 }
 0x29f   :  { %v7399_v0 = vmax.f32 %v908_v21, %v933_v3  ;;  %v828_v51 = vadd.f32 %v7134_v54, %v827_v63  ;;  %v829_v36 = vpop.f32.mrb[197].mxu0  ;;  %v3456_v63 = vld [vmem:[%s8738_s3 + $0x1f0] sm:$0xff] }
 0x2a0   :  { %5335 = vmatpush3.bf16.msra.mxu1 %v5334_v56  ;;  %5656 = vmatpush3.bf16.msra.mxu0 %v5655_v34  ;;  %v3455_v56 = vld [vmem:[%s8738_s3 + $0x1e8] sm:$0xff]  ;;  %v3684_v34 = vld [vmem:[%s8738_s3 + $0x910] sm:$0xff] }
 0x2a1   :  { %v1008_v15 = vmax.f32 %v6898_v13, %v7399_v0  ;;  %v934_v21 = vmax.f32 %v828_v51, 0.0  ;;  %5336 = vmatprep.subr.bf16.mxu1 %v8753_v17  ;;  %5681 = vmatprep.subr.bf16.mxu0 %v8753_v17  ;;  %v5340_v7 = vpack.c.bf16 %v3455_v56, %v3454_v50  ;;  %v5685_v5 = vpack.c.bf16 %v3685_v61, %v3684_v34  ;;  %v3458_v50 = vld [vmem:[%s8738_s3 + $0x200] sm:$0xff]  ;;  %v3459_v56 = vld [vmem:[%s8738_s3 + $0x208] sm:$0xff]  ;;  %v3688_v34 = vld [vmem:[%s8738_s3 + $0x930] sm:$0xff] }
 0x2a2   :  { %v832_v45 = vpop.f32.mrb[198].mxu0  ;;  %v910_v51 = vmax.f32 %v708_v58, 0.0  ;;  %v8757_v58 = vld [vmem:[#allocation2_spill] sm:$0xff]  ;;  %v3689_v61 = vld [vmem:[%s8738_s3 + $0x938] sm:$0xff] }
 0x2a3   :  { %v7420_v62 = vmax.f32 %v909_v20, %v934_v21  ;;  %v833_v3 = vadd.f32 %v7134_v54, %v832_v45  ;;  %4849 = vmatmul.mubr.f32.vlgmr.msra.gmra.mrb[202].mxu0 %v1002_v49  ;;  %v834_v46 = vpop.f32.mrb[199].mxu0  ;;  %v3686_v54 = vld [vmem:[%s8738_s3 + $0x920] sm:$0xff]  ;;  %v5346_v45 = vpack.c.bf16 %v3459_v56, %v3458_v50  ;;  %v3464_v50 = vld [vmem:[%s8738_s3 + $0x230] sm:$0xff]  ;;  %v3465_v56 = vld [vmem:[%s8738_s3 + $0x238] sm:$0xff] }
 0x2a4   :  { %5338 = vmatpush3.bf16.msra.mxu1 %v5337_v1  ;;  %5683 = vmatpush3.bf16.msra.mxu0 %v5682_v18  ;;  %v5343_v1 = vpack.c.bf16 %v3457_v23, %v3456_v63  ;;  %v5688_v18 = vpack.c.bf16 %v3687_v29, %v3686_v54  ;;  %v3460_v46 = vld [vmem:[%s8738_s3 + $0x210] sm:$0xff]  ;;  %v3691_v63 = vld [vmem:[%s8738_s3 + $0x948] sm:$0xff]  ;;  %v3462_v54 = vld [vmem:[%s8738_s3 + $0x220] sm:$0xff] }
 0x2a5   :  { %v1009_v36 = vmax.f32 %v6903_v59, %v7420_v62  ;;  %v935_v20 = vmax.f32 %v833_v3, 0.0  ;;  %5339 = vmatprep.subr.bf16.mxu1 %v8753_v17  ;;  %5684 = vmatprep.subr.bf16.mxu0 %v8753_v17  ;;  %v5691_v3 = vpack.c.bf16 %v3689_v61, %v3688_v34  ;;  %v3463_v29 = vld [vmem:[%s8738_s3 + $0x228] sm:$0xff]  ;;  %v3694_v34 = vld [vmem:[%s8738_s3 + $0x960] sm:$0xff]  ;;  %v3219_v59 = vld [vmem:[%s8739_s5 + $0x10] sm:$0xff] }
 0x2a6   :  { %4918 = vmatprep.mubr.msk.f32.mxu0 %vm5902_vm0, %v8752_v55  ;;  %v3695_v61 = vld [vmem:[%s8738_s3 + $0x968] sm:$0xff]  ;;  %v3782_v13 = vld [vmem:[%s8738_s3 + $0xc20] sm:$0xff] }
 0x2a7   :  { %v7444_v49 = vmax.f32 %v910_v51, %v935_v20  ;;  %v8758_v51 = vmax.f32 %v6644_v12, %v7058_v8  ;;  %v3692_v12 = vld [vmem:[%s8738_s3 + $0x950] sm:$0xff]  ;;  %v3693_v8 = vld [vmem:[%s8738_s3 + $0x958] sm:$0xff] }
 0x2a8   :  { %5341 = vmatpush3.bf16.msra.mxu1 %v5340_v7  ;;  %5686 = vmatpush3.bf16.msra.mxu0 %v5685_v5  ;;  %v3461_v7 = vld [vmem:[%s8738_s3 + $0x218] sm:$0xff]  ;;  %v3690_v5 = vld [vmem:[%s8738_s3 + $0x940] sm:$0xff] }
 0x2a9   :  { %v1010_v21 = vmax.f32 %v8757_v58, %v7444_v49  ;;  %5342 = vmatprep.subr.bf16.mxu1 %v8753_v17  ;;  %5687 = vmatprep.subr.bf16.mxu0 %v8753_v17  ;;  %v5349_v20 = vpack.c.bf16 %v3461_v7, %v3460_v46  ;;  %v5694_v23 = vpack.c.bf16 %v3691_v63, %v3690_v5  ;;  %v3466_v46 = vld [vmem:[%s8738_s3 + $0x240] sm:$0xff]  ;;  %v3467_v7 = vld [vmem:[%s8738_s3 + $0x248] sm:$0xff]  ;;  %v3696_v5 = vld [vmem:[%s8738_s3 + $0x970] sm:$0xff] }
 0x2aa   :  { %v3697_v63 = vld [vmem:[%s8738_s3 + $0x978] sm:$0xff]  ;;  %v3522_v49 = vld [vmem:[%s8738_s3 + $0x400] sm:$0xff]  ;;  %v3523_v58 = vld [vmem:[%s8738_s3 + $0x408] sm:$0xff] }
 0x2ac   :  { %5344 = vmatpush3.bf16.msra.mxu1 %v5343_v1  ;;  %5689 = vmatpush3.bf16.msra.mxu0 %v5688_v18  ;;  %v5352_v1 = vpack.c.bf16 %v3463_v29, %v3462_v54  ;;  %v5697_v18 = vpack.c.bf16 %v3693_v8, %v3692_v12  ;;  %v3469_v54 = vld [vmem:[%s8738_s3 + $0x258] sm:$0xff]  ;;  %v3714_v29 = vld [vmem:[%s8738_s3 + $0xa00] sm:$0xff]  ;;  %v3715_v12 = vld [vmem:[%s8738_s3 + $0xa08] sm:$0xff] }
 0x2ad   :  { %5345 = vmatprep.subr.bf16.mxu1 %v8753_v17  ;;  %5690 = vmatprep.subr.bf16.mxu0 %v8753_v17 }
 0x2af   :  { %4394 = vmatmul.mubr.f32.vlgmr.msra.gmra.mrb[6].mxu1 %v8758_v51  ;;  %v5358_v51 = vpack.c.bf16 %v3467_v7, %v3466_v46  ;;  %v3473_v46 = vld [vmem:[%s8738_s3 + $0x278] sm:$0xff]  ;;  %v5736_v7 = vpack.c.bf16 %v3719_v22, %v3718_v60  ;;  %v3726_v22 = vld [vmem:[%s8738_s3 + $0xa60] sm:$0xff] }
 0x2b0   :  { %5347 = vmatpush3.bf16.msra.mxu1 %v5346_v45  ;;  %5692 = vmatpush3.bf16.msra.mxu0 %v5691_v3  ;;  %v5355_v45 = vpack.c.bf16 %v3465_v56, %v3464_v50  ;;  %v5700_v3 = vpack.c.bf16 %v3695_v61, %v3694_v34  ;;  %v3471_v50 = vld [vmem:[%s8738_s3 + $0x268] sm:$0xff]  ;;  %v3716_v56 = vld [vmem:[%s8738_s3 + $0xa10] sm:$0xff]  ;;  %v3717_v34 = vld [vmem:[%s8738_s3 + $0xa18] sm:$0xff] }
 0x2b1   :  { %5348 = vmatprep.subr.bf16.mxu1 %v8753_v17  ;;  %5693 = vmatprep.subr.bf16.mxu0 %v8753_v17  ;;  %v3481_v60 = vld [vmem:[%s8738_s3 + $0x2b8] sm:$0xff] }
 0x2b2   :  { %4428 = vmatprep.mubr.msk.f32.mxu1 %vm5902_vm0, %v8752_v55 }
 0x2b4   :  { %5350 = vmatpush3.bf16.msra.mxu1 %v5349_v20  ;;  %5695 = vmatpush3.bf16.msra.mxu0 %v5694_v23  ;;  %v5703_v20 = vpack.c.bf16 %v3697_v63, %v3696_v5  ;;  %v3468_v23 = vld [vmem:[%s8738_s3 + $0x250] sm:$0xff]  ;;  %v3474_v5 = vld [vmem:[%s8738_s3 + $0x280] sm:$0xff]  ;;  %v3475_v63 = vld [vmem:[%s8738_s3 + $0x288] sm:$0xff] }
 0x2b5   :  { %5351 = vmatprep.subr.bf16.mxu1 %v8753_v17  ;;  %5696 = vmatprep.subr.bf16.mxu0 %v8753_v17  ;;  %v5361_v8 = vpack.c.bf16 %v3469_v54, %v3468_v23  ;;  %v5370_v23 = vpack.c.bf16 %v3475_v63, %v3474_v5  ;;  %v3482_v63 = vld [vmem:[%s8738_s3 + $0x2c0] sm:$0xff] }
 0x2b8   :  { %5353 = vmatpush3.bf16.msra.mxu1 %v5352_v1  ;;  %5698 = vmatpush3.bf16.msra.mxu0 %v5697_v18  ;;  %v5730_v1 = vpack.c.bf16 %v3715_v12, %v3714_v29  ;;  %v3470_v18 = vld [vmem:[%s8738_s3 + $0x260] sm:$0xff]  ;;  %v3476_v29 = vld [vmem:[%s8738_s3 + $0x290] sm:$0xff]  ;;  %v3477_v12 = vld [vmem:[%s8738_s3 + $0x298] sm:$0xff] }
 0x2b9   :  { %5354 = vmatprep.subr.bf16.mxu1 %v8753_v17  ;;  %5699 = vmatprep.subr.bf16.mxu0 %v8753_v17  ;;  %v5364_v61 = vpack.c.bf16 %v3471_v50, %v3470_v18  ;;  %v8759_v18 = vmax.f32 %v6655_v26, %v7072_v10  ;;  %v5373_v50 = vpack.c.bf16 %v3477_v12, %v3476_v29  ;;  %v3724_v26 = vld [vmem:[%s8738_s3 + $0xa50] sm:$0xff]  ;;  %v3725_v10 = vld [vmem:[%s8738_s3 + $0xa58] sm:$0xff] }
 0x2ba   :  { %v3484_v12 = vld [vmem:[%s8738_s3 + $0x2d0] sm:$0xff] }
 0x2bc   :  { %5356 = vmatpush3.bf16.msra.mxu1 %v5355_v45  ;;  %5701 = vmatpush3.bf16.msra.mxu0 %v5700_v3  ;;  %v5733_v45 = vpack.c.bf16 %v3717_v34, %v3716_v56  ;;  %v3472_v3 = vld [vmem:[%s8738_s3 + $0x270] sm:$0xff]  ;;  %v3478_v34 = vld [vmem:[%s8738_s3 + $0x2a0] sm:$0xff] }
 0x2bd   :  { %5357 = vmatprep.subr.bf16.mxu1 %v8753_v17  ;;  %5702 = vmatprep.subr.bf16.mxu0 %v8753_v17 }
 0x2c0   :  { %5359 = vmatpush3.bf16.msra.mxu1 %v5358_v51  ;;  %5704 = vmatpush3.bf16.msra.mxu0 %v5703_v20  ;;  %v3720_v51 = vld [vmem:[%s8738_s3 + $0xa30] sm:$0xff]  ;;  %v3721_v20 = vld [vmem:[%s8738_s3 + $0xa38] sm:$0xff] }
 0x2c1   :  { %5360 = vmatprep.subr.bf16.mxu1 %v8753_v17  ;;  %5729 = vmatprep.subr.bf16.mxu0 %v8753_v17  ;;  %v5739_v54 = vpack.c.bf16 %v3721_v20, %v3720_v51  ;;  %v3483_v51 = vld [vmem:[%s8738_s3 + $0x2c8] sm:$0xff]  ;;  %v3728_v20 = vld [vmem:[%s8738_s3 + $0xa70] sm:$0xff] }
 0x2c3   :  { %4919 = vmatmul.mubr.f32.vlgmr.msra.gmra.mrb[204].mxu0 %v1004_v2  ;;  %v5367_v2 = vpack.c.bf16 %v3473_v46, %v3472_v3  ;;  %v5745_v3 = vpack.c.bf16 %v3725_v10, %v3724_v26  ;;  %v3480_v46 = vld [vmem:[%s8738_s3 + $0x2b0] sm:$0xff]  ;;  %v3749_v10 = vld [vmem:[%s8738_s3 + $0xb18] sm:$0xff] }
 0x2c4   :  { %5362 = vmatpush3.bf16.msra.mxu1 %v5361_v8  ;;  %5731 = vmatpush3.bf16.msra.mxu0 %v5730_v1  ;;  %v3722_v8 = vld [vmem:[%s8738_s3 + $0xa40] sm:$0xff]  ;;  %v3723_v1 = vld [vmem:[%s8738_s3 + $0xa48] sm:$0xff]  ;;  %v3748_v26 = vld [vmem:[%s8738_s3 + $0xb10] sm:$0xff] }
 0x2c5   :  { %5363 = vmatprep.subr.bf16.mxu1 %v8753_v17  ;;  %5732 = vmatprep.subr.bf16.mxu0 %v8753_v17  ;;  %v5742_v56 = vpack.c.bf16 %v3723_v1, %v3722_v8  ;;  %v3485_v8 = vld [vmem:[%s8738_s3 + $0x2d8] sm:$0xff]  ;;  %v3746_v1 = vld [vmem:[%s8738_s3 + $0xb00] sm:$0xff] }
 0x2c6   :  { %4988 = vmatprep.mubr.msk.f32.mxu0 %vm5902_vm0, %v8752_v55 }
 0x2c8   :  { %5365 = vmatpush3.bf16.msra.mxu1 %v5364_v61  ;;  %5734 = vmatpush3.bf16.msra.mxu0 %v5733_v45  ;;  %v3479_v61 = vld [vmem:[%s8738_s3 + $0x2a8] sm:$0xff] }
 0x2c9   :  { %5366 = vmatprep.subr.bf16.mxu1 %v8753_v17  ;;  %5735 = vmatprep.subr.bf16.mxu0 %v8753_v17  ;;  %v5376_v45 = vpack.c.bf16 %v3479_v61, %v3478_v34  ;;  %v3486_v34 = vld [vmem:[%s8738_s3 + $0x2e0] sm:$0xff]  ;;  %v3487_v61 = vld [vmem:[%s8738_s3 + $0x2e8] sm:$0xff] }
 0x2cc   :  { %5368 = vmatpush3.bf16.msra.mxu1 %v5367_v2  ;;  %5737 = vmatpush3.bf16.msra.mxu0 %v5736_v7  ;;  %v3727_v2 = vld [vmem:[%s8738_s3 + $0xa68] sm:$0xff]  ;;  %v5379_v7 = vpack.c.bf16 %v3481_v60, %v3480_v46  ;;  %v3488_v46 = vld [vmem:[%s8738_s3 + $0x2f0] sm:$0xff]  ;;  %v3489_v60 = vld [vmem:[%s8738_s3 + $0x2f8] sm:$0xff] }
 0x2cd   :  { %5369 = vmatprep.subr.bf16.mxu1 %v8753_v17  ;;  %5738 = vmatprep.subr.bf16.mxu0 %v8753_v17  ;;  %v5748_v5 = vpack.c.bf16 %v3727_v2, %v3726_v22  ;;  %v5391_v27 = vpack.c.bf16 %v3489_v60, %v3488_v46  ;;  %v3490_v2 = vld [vmem:[%s8738_s3 + $0x300] sm:$0xff] }
 0x2cf   :  { %4429 = vmatmul.mubr.f32.vlgmr.msra.gmra.mrb[8].mxu1 %v8759_v18  ;;  %v3747_v18 = vld [vmem:[%s8738_s3 + $0xb08] sm:$0xff] }
 0x2d0   :  { %5371 = vmatpush3.bf16.msra.mxu1 %v5370_v23  ;;  %5740 = vmatpush3.bf16.msra.mxu0 %v5739_v54  ;;  %v3729_v23 = vld [vmem:[%s8738_s3 + $0xa78] sm:$0xff]  ;;  %v5382_v54 = vpack.c.bf16 %v3483_v51, %v3482_v63 }
 0x2d1   :  { %5372 = vmatprep.subr.bf16.mxu1 %v8753_v17  ;;  %5741 = vmatprep.subr.bf16.mxu0 %v8753_v17  ;;  %v5751_v29 = vpack.c.bf16 %v3729_v23, %v3728_v20  ;;  %v3753_v63 = vld [vmem:[%s8738_s3 + $0xb38] sm:$0xff]  ;;  %v3492_v23 = vld [vmem:[%s8738_s3 + $0x310] sm:$0xff] }
 0x2d2   :  { %4463 = vmatprep.mubr.msk.f32.mxu1 %vm5902_vm0, %v8752_v55 }
 0x2d4   :  { %5374 = vmatpush3.bf16.msra.mxu1 %v5373_v50  ;;  %5743 = vmatpush3.bf16.msra.mxu0 %v5742_v56  ;;  %v5385_v50 = vpack.c.bf16 %v3485_v8, %v3484_v12  ;;  %v5778_v56 = vpack.c.bf16 %v3747_v18, %v3746_v1  ;;  %v3755_v12 = vld [vmem:[%s8738_s3 + $0xb48] sm:$0xff]  ;;  %v8760_v8 = vmax.f32 %v6666_v38, %v7086_v47  ;;  %v3756_v38 = vld [vmem:[%s8738_s3 + $0xb50] sm:$0xff]  ;;  %v3757_v47 = vld [vmem:[%s8738_s3 + $0xb58] sm:$0xff] }
 0x2d5   :  { %5375 = vmatprep.subr.bf16.mxu1 %v8753_v17  ;;  %5744 = vmatprep.subr.bf16.mxu0 %v8753_v17 }
 0x2d8   :  { %5377 = vmatpush3.bf16.msra.mxu1 %v5376_v45  ;;  %5746 = vmatpush3.bf16.msra.mxu0 %v5745_v3  ;;  %v5388_v45 = vpack.c.bf16 %v3487_v61, %v3486_v34  ;;  %v5781_v3 = vpack.c.bf16 %v3749_v10, %v3748_v26  ;;  %v5793_v61 = vpack.c.bf16 %v3757_v47, %v3756_v38  ;;  %v3496_v26 = vld [vmem:[%s8738_s3 + $0x330] sm:$0xff]  ;;  %v3497_v10 = vld [vmem:[%s8738_s3 + $0x338] sm:$0xff] }
 0x2d9   :  { %5378 = vmatprep.subr.bf16.mxu1 %v8753_v17  ;;  %5747 = vmatprep.subr.bf16.mxu0 %v8753_v17  ;;  %v5403_v46 = vpack.c.bf16 %v3497_v10, %v3496_v26  ;;  %v3505_v38 = vld [vmem:[%s8738_s3 + $0x378] sm:$0xff]  ;;  %v3784_v26 = vld [vmem:[%s8738_s3 + $0xc30] sm:$0xff] }
 0x2da   :  { %v3785_v10 = vld [vmem:[%s8738_s3 + $0xc38] sm:$0xff] }
 0x2dc   :  { %5380 = vmatpush3.bf16.msra.mxu1 %v5379_v7  ;;  %5749 = vmatpush3.bf16.msra.mxu0 %v5748_v5  ;;  %v3491_v7 = vld [vmem:[%s8738_s3 + $0x308] sm:$0xff]  ;;  %v3752_v5 = vld [vmem:[%s8738_s3 + $0xb30] sm:$0xff] }
 0x2dd   :  { %5381 = vmatprep.subr.bf16.mxu1 %v8753_v17  ;;  %5750 = vmatprep.subr.bf16.mxu0 %v8753_v17  ;;  %v5394_v51 = vpack.c.bf16 %v3491_v7, %v3490_v2  ;;  %v5787_v20 = vpack.c.bf16 %v3753_v63, %v3752_v5  ;;  %v3500_v5 = vld [vmem:[%s8738_s3 + $0x350] sm:$0xff]  ;;  %v3501_v63 = vld [vmem:[%s8738_s3 + $0x358] sm:$0xff] }
 0x2e0   :  { %5383 = vmatpush3.bf16.msra.mxu1 %v5382_v54  ;;  %5752 = vmatpush3.bf16.msra.mxu0 %v5751_v29  ;;  %v3493_v54 = vld [vmem:[%s8738_s3 + $0x318] sm:$0xff]  ;;  %v3754_v29 = vld [vmem:[%s8738_s3 + $0xb40] sm:$0xff] }
 0x2e1   :  { %5384 = vmatprep.subr.bf16.mxu1 %v8753_v17  ;;  %5777 = vmatprep.subr.bf16.mxu0 %v8753_v17  ;;  %v5397_v1 = vpack.c.bf16 %v3493_v54, %v3492_v23  ;;  %v5790_v18 = vpack.c.bf16 %v3755_v12, %v3754_v29  ;;  %v5409_v23 = vpack.c.bf16 %v3501_v63, %v3500_v5  ;;  %v3502_v29 = vld [vmem:[%s8738_s3 + $0x360] sm:$0xff]  ;;  %v3503_v12 = vld [vmem:[%s8738_s3 + $0x368] sm:$0xff] }
 0x2e2   :  { %v3511_v5 = vld [vmem:[%s8738_s3 + $0x3a8] sm:$0xff] }
 0x2e3   :  { %4989 = vmatmul.mubr.f32.vlgmr.msra.gmra.mrb[206].mxu0 %v1006_v48  ;;  %v3751_v48 = vld [vmem:[%s8738_s3 + $0xb28] sm:$0xff] }
 0x2e4   :  { %5386 = vmatpush3.bf16.msra.mxu1 %v5385_v50  ;;  %5779 = vmatpush3.bf16.msra.mxu0 %v5778_v56  ;;  %v5784_v22 = vpack.c.bf16 %v3751_v48, %v3750_v39  ;;  %v3494_v50 = vld [vmem:[%s8738_s3 + $0x320] sm:$0xff]  ;;  %v3495_v56 = vld [vmem:[%s8738_s3 + $0x328] sm:$0xff] }
 0x2e5   :  { %5387 = vmatprep.subr.bf16.mxu1 %v8753_v17  ;;  %5780 = vmatprep.subr.bf16.mxu0 %v8753_v17  ;;  %v5400_v34 = vpack.c.bf16 %v3495_v56, %v3494_v50  ;;  %v3498_v39 = vld [vmem:[%s8738_s3 + $0x340] sm:$0xff]  ;;  %v3499_v48 = vld [vmem:[%s8738_s3 + $0x348] sm:$0xff]  ;;  %v3504_v56 = vld [vmem:[%s8738_s3 + $0x370] sm:$0xff] }
 0x2e6   :  { %5058 = vmatprep.mubr.msk.f32.mxu0 %vm5902_vm0, %v8752_v55  ;;  %v5406_v2 = vpack.c.bf16 %v3499_v48, %v3498_v39  ;;  %v5415_v0 = vpack.c.bf16 %v3505_v38, %v3504_v56  ;;  %v3786_v39 = vld [vmem:[%s8738_s3 + $0xc40] sm:$0xff]  ;;  %v3787_v48 = vld [vmem:[%s8738_s3 + $0xc48] sm:$0xff]  ;;  %v3793_v56 = vld [vmem:[%s8738_s3 + $0xc78] sm:$0xff] }
 0x2e8   :  { %5389 = vmatpush3.bf16.msra.mxu1 %v5388_v45  ;;  %5782 = vmatpush3.bf16.msra.mxu0 %v5781_v3  ;;  %v3758_v45 = vld [vmem:[%s8738_s3 + $0xb60] sm:$0xff]  ;;  %v3759_v3 = vld [vmem:[%s8738_s3 + $0xb68] sm:$0xff] }
 0x2e9   :  { %5390 = vmatprep.subr.bf16.mxu1 %v8753_v17  ;;  %5783 = vmatprep.subr.bf16.mxu0 %v8753_v17  ;;  %v5796_v60 = vpack.c.bf16 %v3759_v3, %v3758_v45  ;;  %v5835_v3 = vpack.c.bf16 %v3785_v10, %v3784_v26 }
 0x2ec   :  { %5392 = vmatpush3.bf16.msra.mxu1 %v5391_v27  ;;  %5785 = vmatpush3.bf16.msra.mxu0 %v5784_v22  ;;  %v3760_v27 = vld [vmem:[%s8738_s3 + $0xb70] sm:$0xff]  ;;  %v3761_v22 = vld [vmem:[%s8738_s3 + $0xb78] sm:$0xff] }
 0x2ed   :  { %5393 = vmatprep.subr.bf16.mxu1 %v8753_v17  ;;  %5786 = vmatprep.subr.bf16.mxu0 %v8753_v17  ;;  %v5799_v7 = vpack.c.bf16 %v3761_v22, %v3760_v27  ;;  %v8761_v27 = vmax.f32 %v6677_v53, %v7100_v52  ;;  %v3788_v53 = vld [vmem:[%s8738_s3 + $0xc50] sm:$0xff]  ;;  %v3789_v52 = vld [vmem:[%s8738_s3 + $0xc58] sm:$0xff] }
 0x2ef   :  { %4464 = vmatmul.mubr.f32.vlgmr.msra.gmra.mrb[10].mxu1 %v8760_v8  ;;  %v3780_v8 = vld [vmem:[%s8738_s3 + $0xc10] sm:$0xff] }
 0x2f0   :  { %5395 = vmatpush3.bf16.msra.mxu1 %v5394_v51  ;;  %5788 = vmatpush3.bf16.msra.mxu0 %v5787_v20  ;;  %v3778_v51 = vld [vmem:[%s8738_s3 + $0xc00] sm:$0xff]  ;;  %v3779_v20 = vld [vmem:[%s8738_s3 + $0xc08] sm:$0xff] }
 0x2f1   :  { %5396 = vmatprep.subr.bf16.mxu1 %v8753_v17  ;;  %5789 = vmatprep.subr.bf16.mxu0 %v8753_v17  ;;  %v5826_v54 = vpack.c.bf16 %v3779_v20, %v3778_v51  ;;  %v5841_v51 = vpack.c.bf16 %v3789_v52, %v3788_v53  ;;  %v3512_v20 = vld [vmem:[%s8738_s3 + $0x3b0] sm:$0xff]  ;;  %v3530_v52 = vld [vmem:[%s8738_s3 + $0x440] sm:$0xff] }
 0x2f2   :  { %4498 = vmatprep.mubr.msk.f32.mxu1 %vm5902_vm0, %v8752_v55 }
 0x2f4   :  { %5398 = vmatpush3.bf16.msra.mxu1 %v5397_v1  ;;  %5791 = vmatpush3.bf16.msra.mxu0 %v5790_v18  ;;  %v3781_v1 = vld [vmem:[%s8738_s3 + $0xc18] sm:$0xff]  ;;  %v5412_v18 = vpack.c.bf16 %v3503_v12, %v3502_v29  ;;  %v3791_v29 = vld [vmem:[%s8738_s3 + $0xc68] sm:$0xff] }
 0x2f5   :  { %5399 = vmatprep.subr.bf16.mxu1 %v8753_v17  ;;  %5792 = vmatprep.subr.bf16.mxu0 %v8753_v17  ;;  %v5829_v50 = vpack.c.bf16 %v3781_v1, %v3780_v8  ;;  %v3514_v1 = vld [vmem:[%s8738_s3 + $0x3c0] sm:$0xff] }
 0x2f8   :  { %5401 = vmatpush3.bf16.msra.mxu1 %v5400_v34  ;;  %5794 = vmatpush3.bf16.msra.mxu0 %v5793_v61  ;;  %v3506_v34 = vld [vmem:[%s8738_s3 + $0x380] sm:$0xff]  ;;  %v3507_v61 = vld [vmem:[%s8738_s3 + $0x388] sm:$0xff] }
 0x2f9   :  { %5402 = vmatprep.subr.bf16.mxu1 %v8753_v17  ;;  %5795 = vmatprep.subr.bf16.mxu0 %v8753_v17  ;;  %v5418_v45 = vpack.c.bf16 %v3507_v61, %v3506_v34  ;;  %v3518_v34 = vld [vmem:[%s8738_s3 + $0x3e0] sm:$0xff]  ;;  %v3519_v61 = vld [vmem:[%s8738_s3 + $0x3e8] sm:$0xff] }
 0x2fc   :  { %5404 = vmatpush3.bf16.msra.mxu1 %v5403_v46  ;;  %5797 = vmatpush3.bf16.msra.mxu0 %v5796_v60  ;;  %v3508_v46 = vld [vmem:[%s8738_s3 + $0x390] sm:$0xff]  ;;  %v3509_v60 = vld [vmem:[%s8738_s3 + $0x398] sm:$0xff] }
 0x2fd   :  { %5405 = vmatprep.subr.bf16.mxu1 %v8753_v17  ;;  %5798 = vmatprep.subr.bf16.mxu0 %v8753_v17  ;;  %v5421_v22 = vpack.c.bf16 %v3509_v60, %v3508_v46  ;;  %v3521_v46 = vld [vmem:[%s8738_s3 + $0x3f8] sm:$0xff] }
 0x300   :  { %5407 = vmatpush3.bf16.msra.mxu1 %v5406_v2  ;;  %5800 = vmatpush3.bf16.msra.mxu0 %v5799_v7  ;;  %v5838_v2 = vpack.c.bf16 %v3787_v48, %v3786_v39  ;;  %v3510_v7 = vld [vmem:[%s8738_s3 + $0x3a0] sm:$0xff]  ;;  %v3524_v39 = vld [vmem:[%s8738_s3 + $0x410] sm:$0xff]  ;;  %v3525_v48 = vld [vmem:[%s8738_s3 + $0x418] sm:$0xff] }
 0x301   :  { %5408 = vmatprep.subr.bf16.mxu1 %v8753_v17  ;;  %5825 = vmatprep.subr.bf16.mxu0 %v8753_v17  ;;  %v5424_v63 = vpack.c.bf16 %v3511_v5, %v3510_v7  ;;  %v3527_v7 = vld [vmem:[%s8738_s3 + $0x428] sm:$0xff] }
 0x303   :  { %5059 = vmatmul.mubr.f32.vlgmr.msra.gmra.mrb[208].mxu0 %v1008_v15  ;;  %v3783_v15 = vld [vmem:[%s8738_s3 + $0xc28] sm:$0xff] }
 0x304   :  { %5410 = vmatpush3.bf16.msra.mxu1 %v5409_v23  ;;  %5827 = vmatpush3.bf16.msra.mxu0 %v5826_v54  ;;  %v5832_v47 = vpack.c.bf16 %v3783_v15, %v3782_v13  ;;  %v3513_v23 = vld [vmem:[%s8738_s3 + $0x3b8] sm:$0xff]  ;;  %v3790_v54 = vld [vmem:[%s8738_s3 + $0xc60] sm:$0xff]  ;;  %v3516_v15 = vld [vmem:[%s8738_s3 + $0x3d0] sm:$0xff] }
 0x305   :  { %5411 = vmatprep.subr.bf16.mxu1 %v8753_v17  ;;  %5828 = vmatprep.subr.bf16.mxu0 %v8753_v17  ;;  %v5427_v12 = vpack.c.bf16 %v3513_v23, %v3512_v20  ;;  %v5844_v8 = vpack.c.bf16 %v3791_v29, %v3790_v54  ;;  %v3532_v20 = vld [vmem:[%s8738_s3 + $0x450] sm:$0xff]  ;;  %v3533_v23 = vld [vmem:[%s8738_s3 + $0x458] sm:$0xff]  ;;  %v3534_v29 = vld [vmem:[%s8738_s3 + $0x460] sm:$0xff] }
 0x306   :  { %5128 = vmatprep.mubr.msk.f32.mxu0 %vm5902_vm0, %v8752_v55  ;;  %v5457_v54 = vpack.c.bf16 %v3533_v23, %v3532_v20  ;;  %v3554_v23 = vld [vmem:[%s8738_s3 + $0x500] sm:$0xff] }
 0x308   :  { %5413 = vmatpush3.bf16.msra.mxu1 %v5412_v18  ;;  %5830 = vmatpush3.bf16.msra.mxu0 %v5829_v50  ;;  %v3515_v18 = vld [vmem:[%s8738_s3 + $0x3c8] sm:$0xff]  ;;  %v3792_v50 = vld [vmem:[%s8738_s3 + $0xc70] sm:$0xff] }
 0x309   :  { %5414 = vmatprep.subr.bf16.mxu1 %v8753_v17  ;;  %5831 = vmatprep.subr.bf16.mxu0 %v8753_v17  ;;  %v5430_v38 = vpack.c.bf16 %v3515_v18, %v3514_v1  ;;  %v5847_v13 = vpack.c.bf16 %v3793_v56, %v3792_v50  ;;  %v3536_v56 = vld [vmem:[%s8738_s3 + $0x470] sm:$0xff] }
 0x30c   :  { %5416 = vmatpush3.bf16.msra.mxu1 %v5415_v0  ;;  %5833 = vmatpush3.bf16.msra.mxu0 %v5832_v47  ;;  %v3517_v0 = vld [vmem:[%s8738_s3 + $0x3d8] sm:$0xff] }
 0x30d   :  { %5417 = vmatprep.subr.bf16.mxu1 %v8753_v17  ;;  %5834 = vmatprep.subr.bf16.mxu0 %v8753_v17  ;;  %v5433_v47 = vpack.c.bf16 %v3517_v0, %v3516_v15  ;;  %v3538_v15 = vld [vmem:[%s8738_s3 + $0x480] sm:$0xff]  ;;  %v3539_v0 = vld [vmem:[%s8738_s3 + $0x488] sm:$0xff] }
 0x30f   :  { %4499 = vmatmul.mubr.f32.vlgmr.msra.gmra.mrb[12].mxu1 %v8761_v27  ;;  %v8762_v27 = vmax.f32 %v6688_v4, %v7114_v43  ;;  %v3528_v4 = vld [vmem:[%s8738_s3 + $0x430] sm:$0xff]  ;;  %v3529_v43 = vld [vmem:[%s8738_s3 + $0x438] sm:$0xff] }
 0x310   :  { %5419 = vmatpush3.bf16.msra.mxu1 %v5418_v45  ;;  %5836 = vmatpush3.bf16.msra.mxu0 %v5835_v3  ;;  %v5436_v45 = vpack.c.bf16 %v3519_v61, %v3518_v34  ;;  %v3520_v3 = vld [vmem:[%s8738_s3 + $0x3f0] sm:$0xff]  ;;  %v5451_v53 = vpack.c.bf16 %v3529_v43, %v3528_v4  ;;  %v3541_v61 = vld [vmem:[%s8738_s3 + $0x498] sm:$0xff] }
 0x311   :  { %5420 = vmatprep.subr.bf16.mxu1 %v8753_v17  ;;  %5837 = vmatprep.subr.bf16.mxu0 %v8753_v17  ;;  %v5439_v60 = vpack.c.bf16 %v3521_v46, %v3520_v3  ;;  %v3540_v34 = vld [vmem:[%s8738_s3 + $0x490] sm:$0xff]  ;;  %v3543_v3 = vld [vmem:[%s8738_s3 + $0x4a8] sm:$0xff] }
 0x312   :  { %4533 = vmatprep.mubr.msk.f32.mxu1 %vm5902_vm0, %v8752_v55 }
 0x314   :  { %5422 = vmatpush3.bf16.msra.mxu1 %v5421_v22  ;;  %5839 = vmatpush3.bf16.msra.mxu0 %v5838_v2  ;;  %v5445_v22 = vpack.c.bf16 %v3525_v48, %v3524_v39  ;;  %v3526_v2 = vld [vmem:[%s8738_s3 + $0x420] sm:$0xff]  ;;  %v3547_v39 = vld [vmem:[%s8738_s3 + $0x4c8] sm:$0xff] }
 0x315   :  { %5423 = vmatprep.subr.bf16.mxu1 %v8753_v17  ;;  %5840 = vmatprep.subr.bf16.mxu0 %v8753_v17  ;;  %v5448_v5 = vpack.c.bf16 %v3527_v7, %v3526_v2  ;;  %v3550_v7 = vld [vmem:[%s8738_s3 + $0x4e0] sm:$0xff] }
 0x318   :  { %5425 = vmatpush3.bf16.msra.mxu1 %v5424_v63  ;;  %5842 = vmatpush3.bf16.msra.mxu0 %v5841_v51  ;;  %v3531_v63 = vld [vmem:[%s8738_s3 + $0x448] sm:$0xff] }
 0x319   :  { %5426 = vmatprep.subr.bf16.mxu1 %v8753_v17  ;;  %5843 = vmatprep.subr.bf16.mxu0 %v8753_v17  ;;  %v5454_v51 = vpack.c.bf16 %v3531_v63, %v3530_v52  ;;  %v3552_v63 = vld [vmem:[%s8738_s3 + $0x4f0] sm:$0xff] }
 0x31c   :  { %5428 = vmatpush3.bf16.msra.mxu1 %v5427_v12  ;;  %5845 = vmatpush3.bf16.msra.mxu0 %v5844_v8  ;;  %v3535_v12 = vld [vmem:[%s8738_s3 + $0x468] sm:$0xff] }
 0x31d   :  { %5429 = vmatprep.subr.bf16.mxu1 %v8753_v17  ;;  %5846 = vmatprep.subr.bf16.mxu0 %v8753_v17  ;;  %v5460_v50 = vpack.c.bf16 %v3535_v12, %v3534_v29  ;;  %v3556_v12 = vld [vmem:[%s8738_s3 + $0x510] sm:$0xff] }
 0x320   :  { %5431 = vmatpush3.bf16.msra.mxu1 %v5430_v38  ;;  %5848 = vmatpush3.bf16.msra.mxu0 %v5847_v13  ;;  %v3537_v38 = vld [vmem:[%s8738_s3 + $0x478] sm:$0xff] }
 0x321   :  { %5432 = vmatprep.subr.bf16.mxu1 %v8753_v17  ;;  %5873 = vmatprep.subr.bf16.mxu0 %v8753_v17  ;;  %v5463_v13 = vpack.c.bf16 %v3537_v38, %v3536_v56  ;;  %v3559_v56 = vld [vmem:[%s8738_s3 + $0x528] sm:$0xff] }
 0x322   :  { %v1110_v26 = vpop.f32.mrb[0].mxu1 }
 0x323   :  { %5129 = vmatmul.mubr.f32.vlgmr.msra.gmra.mrb[210].mxu0 %v1010_v21  ;;  %v4290_v10 = vpop.f32.mrb[1].mxu1  ;;  %v5442_v21 = vpack.c.bf16 %v3523_v58, %v3522_v49 }
 0x324   :  { %5434 = vmatpush3.bf16.msra.mxu1 %v5433_v47  ;;  %5198 = vmatprep.mubr.msk.f32.mxu0 %vm5902_vm0, %v8752_v55  ;;  %v5466_v47 = vpack.c.bf16 %v3539_v0, %v3538_v15  ;;  %v5469_v10 = vpack.c.bf16 %v3541_v61, %v3540_v34  ;;  %v3563_v34 = vld [vmem:[%s8738_s3 + $0x548] sm:$0xff] }
 0x325   :  { %5435 = vmatprep.subr.bf16.mxu1 %v8753_v17 }
 0x328   :  { %5437 = vmatpush3.bf16.msra.mxu1 %v5436_v45  ;;  %v3542_v45 = vld [vmem:[%s8738_s3 + $0x4a0] sm:$0xff] }
 0x329   :  { %5438 = vmatprep.subr.bf16.mxu1 %v8753_v17  ;;  %v5472_v46 = vpack.c.bf16 %v3543_v3, %v3542_v45  ;;  %v3566_v3 = vld [vmem:[%s8738_s3 + $0x560] sm:$0xff] }
 0x32c   :  { %5440 = vmatpush3.bf16.msra.mxu1 %v5439_v60 }
 0x32d   :  { %5441 = vmatprep.subr.bf16.mxu1 %v8753_v17 }
 0x32f   :  { %4534 = vmatmul.mubr.f32.vlgmr.msra.gmra.mrb[14].mxu1 %v8762_v27  ;;  %v3548_v27 = vld [vmem:[%s8738_s3 + $0x4d0] sm:$0xff] }
 0x330   :  { %5443 = vmatpush3.bf16.msra.mxu1 %v5442_v21  ;;  %4568 = vmatprep.mubr.msk.f32.mxu1 %vm5902_vm0, %v8752_v55  ;;  %v3546_v21 = vld [vmem:[%s8738_s3 + $0x4c0] sm:$0xff] }
 0x331   :  { %5444 = vmatprep.subr.bf16.mxu1 %v8753_v17  ;;  %v5478_v48 = vpack.c.bf16 %v3547_v39, %v3546_v21  ;;  %v3568_v21 = vld [vmem:[%s8738_s3 + $0x570] sm:$0xff]  ;;  %v3569_v39 = vld [vmem:[%s8738_s3 + $0x578] sm:$0xff] }
 0x334   :  { %5446 = vmatpush3.bf16.msra.mxu1 %v5445_v22  ;;  %v3549_v22 = vld [vmem:[%s8738_s3 + $0x4d8] sm:$0xff] }
 0x335   :  { %5447 = vmatprep.subr.bf16.mxu1 %v8753_v17  ;;  %v5481_v2 = vpack.c.bf16 %v3549_v22, %v3548_v27  ;;  %v3570_v27 = vld [vmem:[%s8738_s3 + $0x580] sm:$0xff]  ;;  %v3571_v22 = vld [vmem:[%s8738_s3 + $0x588] sm:$0xff] }
 0x338   :  { %5449 = vmatpush3.bf16.msra.mxu1 %v5448_v5  ;;  %v3551_v5 = vld [vmem:[%s8738_s3 + $0x4e8] sm:$0xff] }
 0x339   :  { %5450 = vmatprep.subr.bf16.mxu1 %v8753_v17  ;;  %v5484_v52 = vpack.c.bf16 %v3551_v5, %v3550_v7  ;;  %v3572_v7 = vld [vmem:[%s8738_s3 + $0x590] sm:$0xff]  ;;  %v3573_v5 = vld [vmem:[%s8738_s3 + $0x598] sm:$0xff] }
 0x33c   :  { %5452 = vmatpush3.bf16.msra.mxu1 %v5451_v53 }
 0x33d   :  { %5453 = vmatprep.subr.bf16.mxu1 %v8753_v17 }
 0x340   :  { %5455 = vmatpush3.bf16.msra.mxu1 %v5454_v51  ;;  %v3553_v51 = vld [vmem:[%s8738_s3 + $0x4f8] sm:$0xff] }
 0x341   :  { %5456 = vmatprep.subr.bf16.mxu1 %v8753_v17  ;;  %v5487_v20 = vpack.c.bf16 %v3553_v51, %v3552_v63 }
 0x342   :  { %v1180_v8 = vpop.f32.mrb[2].mxu1 }
 0x343   :  { %v1181_v1 = vadd.f32 %v1180_v8, %v1110_v26  ;;  %v4325_v18 = vpop.f32.mrb[3].mxu1  ;;  %v8763_v26 = vmax.f32 %v6699_v19, %v7128_v35  ;;  %v3544_v19 = vld [vmem:[%s8738_s3 + $0x4b0] sm:$0xff]  ;;  %v3545_v35 = vld [vmem:[%s8738_s3 + $0x4b8] sm:$0xff] }
 0x344   :  { %5458 = vmatpush3.bf16.msra.mxu1 %v5457_v54  ;;  %v5475_v58 = vpack.c.bf16 %v3545_v35, %v3544_v19  ;;  %v3555_v54 = vld [vmem:[%s8738_s3 + $0x508] sm:$0xff]  ;;  %v3557_v8 = vld [vmem:[%s8738_s3 + $0x518] sm:$0xff] }
 0x345   :  { %5459 = vmatprep.subr.bf16.mxu1 %v8753_v17  ;;  %v5490_v29 = vpack.c.bf16 %v3555_v54, %v3554_v23  ;;  %v5493_v18 = vpack.c.bf16 %v3557_v8, %v3556_v12  ;;  %v3578_v54 = vld [vmem:[%s8738_s3 + $0x5c0] sm:$0xff]  ;;  %v3580_v8 = vld [vmem:[%s8738_s3 + $0x5d0] sm:$0xff] }
 0x348   :  { %5461 = vmatpush3.bf16.msra.mxu1 %v5460_v50  ;;  %v3558_v50 = vld [vmem:[%s8738_s3 + $0x520] sm:$0xff] }
 0x349   :  { %5462 = vmatprep.subr.bf16.mxu1 %v8753_v17  ;;  %v5496_v38 = vpack.c.bf16 %v3559_v56, %v3558_v50  ;;  %v3582_v50 = vld [vmem:[%s8738_s3 + $0x5e0] sm:$0xff]  ;;  %v3583_v56 = vld [vmem:[%s8738_s3 + $0x5e8] sm:$0xff] }
 0x34c   :  { %5464 = vmatpush3.bf16.msra.mxu1 %v5463_v13 }
 0x34d   :  { %5465 = vmatprep.subr.bf16.mxu1 %v8753_v17 }
 0x34f   :  { %4569 = vmatmul.mubr.f32.vlgmr.msra.gmra.mrb[16].mxu1 %v8763_v26  ;;  %v3564_v26 = vld [vmem:[%s8738_s3 + $0x550] sm:$0xff] }
 0x350   :  { %5467 = vmatpush3.bf16.msra.mxu1 %v5466_v47  ;;  %4603 = vmatprep.mubr.msk.f32.mxu1 %vm5902_vm0, %v8752_v55  ;;  %v3562_v47 = vld [vmem:[%s8738_s3 + $0x540] sm:$0xff] }
 0x351   :  { %5468 = vmatprep.subr.bf16.mxu1 %v8753_v17  ;;  %v5502_v61 = vpack.c.bf16 %v3563_v34, %v3562_v47  ;;  %v3585_v47 = vld [vmem:[%s8738_s3 + $0x5f8] sm:$0xff] }
 0x354   :  { %5470 = vmatpush3.bf16.msra.mxu1 %v5469_v10  ;;  %v3565_v10 = vld [vmem:[%s8738_s3 + $0x558] sm:$0xff] }
 0x355   :  { %5471 = vmatprep.subr.bf16.mxu1 %v8753_v17  ;;  %v5505_v45 = vpack.c.bf16 %v3565_v10, %v3564_v26  ;;  %v3587_v26 = vld [vmem:[%s8738_s3 + $0x608] sm:$0xff] }
 0x356   :  { %v8011_v60 = vpop.f32.mrb[200].mxu0 }
 0x357   :  { %v4780_v49 = vpop.f32.mrb[201].mxu0 }
 0x358   :  { %5473 = vmatpush3.bf16.msra.mxu1 %v5472_v46  ;;  %v3567_v46 = vld [vmem:[%s8738_s3 + $0x568] sm:$0xff] }
 0x359   :  { %5474 = vmatprep.subr.bf16.mxu1 %v8753_v17 }
 0x35c   :  { %5476 = vmatpush3.bf16.msra.mxu1 %v5475_v58  ;;  %v5508_v58 = vpack.c.bf16 %v3567_v46, %v3566_v3  ;;  %v3589_v3 = vld [vmem:[%s8738_s3 + $0x618] sm:$0xff]  ;;  %v8766_v46 = vmax.f32 %v6732_v57, %v7180_v40  ;;  %v3592_v57 = vld [vmem:[%s8738_s3 + $0x630] sm:$0xff] }
 0x35d   :  { %5477 = vmatprep.subr.bf16.mxu1 %v8753_v17  ;;  %v3593_v40 = vld [vmem:[%s8738_s3 + $0x638] sm:$0xff] }
 0x360   :  { %5479 = vmatpush3.bf16.msra.mxu1 %v5478_v48  ;;  %v5511_v48 = vpack.c.bf16 %v3569_v39, %v3568_v21 }
 0x361   :  { %5480 = vmatprep.subr.bf16.mxu1 %v8753_v17 }
 0x362   :  { %v1267_v4 = vpop.f32.mrb[4].mxu1 }
 0x363   :  { %v1271_v43 = vadd.f32 %v1267_v4, %v1181_v1  ;;  %v4360_v53 = vpop.f32.mrb[5].mxu1  ;;  %v8764_v1 = vmax.f32 %v6710_v30, %v7147_v44  ;;  %v3560_v30 = vld [vmem:[%s8738_s3 + $0x530] sm:$0xff]  ;;  %v3561_v44 = vld [vmem:[%s8738_s3 + $0x538] sm:$0xff]  ;;  %v8765_v4 = vmax.f32 %v6721_v42, %v7161_v14 }
 0x364   :  { %5482 = vmatpush3.bf16.msra.mxu1 %v5481_v2  ;;  %v5499_v0 = vpack.c.bf16 %v3561_v44, %v3560_v30  ;;  %v5514_v2 = vpack.c.bf16 %v3571_v22, %v3570_v27  ;;  %v3574_v53 = vld [vmem:[%s8738_s3 + $0x5a0] sm:$0xff]  ;;  %v3576_v42 = vld [vmem:[%s8738_s3 + $0x5b0] sm:$0xff]  ;;  %v3577_v14 = vld [vmem:[%s8738_s3 + $0x5b8] sm:$0xff] }
 0x365   :  { %5483 = vmatprep.subr.bf16.mxu1 %v8753_v17  ;;  %v5523_v23 = vpack.c.bf16 %v3577_v14, %v3576_v42  ;;  %v3594_v27 = vld [vmem:[%s8738_s3 + $0x640] sm:$0xff]  ;;  %v3595_v22 = vld [vmem:[%s8738_s3 + $0x648] sm:$0xff] }
 0x368   :  { %5485 = vmatpush3.bf16.msra.mxu1 %v5484_v52  ;;  %v3575_v52 = vld [vmem:[%s8738_s3 + $0x5a8] sm:$0xff] }
 0x369   :  { %5486 = vmatprep.subr.bf16.mxu1 %v8753_v17  ;;  %v5520_v63 = vpack.c.bf16 %v3575_v52, %v3574_v53  ;;  %v3599_v53 = vld [vmem:[%s8738_s3 + $0x668] sm:$0xff] }
 0x36c   :  { %5488 = vmatpush3.bf16.msra.mxu1 %v5487_v20 }
 0x36d   :  { %5489 = vmatprep.subr.bf16.mxu1 %v8753_v17 }
 0x36f   :  { %4604 = vmatmul.mubr.f32.vlgmr.msra.gmra.mrb[18].mxu1 %v8764_v1  ;;  %v3581_v1 = vld [vmem:[%s8738_s3 + $0x5d8] sm:$0xff] }
 0x370   :  { %5491 = vmatpush3.bf16.msra.mxu1 %v5490_v29  ;;  %4638 = vmatprep.mubr.msk.f32.mxu1 %vm5902_vm0, %v8752_v55  ;;  %v3579_v29 = vld [vmem:[%s8738_s3 + $0x5c8] sm:$0xff] }
 0x371   :  { %5492 = vmatprep.subr.bf16.mxu1 %v8753_v17  ;;  %v5526_v12 = vpack.c.bf16 %v3579_v29, %v3578_v54  ;;  %v3602_v29 = vld [vmem:[%s8738_s3 + $0x680] sm:$0xff] }
 0x374   :  { %5494 = vmatpush3.bf16.msra.mxu1 %v5493_v18  ;;  %v5529_v18 = vpack.c.bf16 %v3581_v1, %v3580_v8  ;;  %v3604_v1 = vld [vmem:[%s8738_s3 + $0x690] sm:$0xff] }
 0x375   :  { %5495 = vmatprep.subr.bf16.mxu1 %v8753_v17 }
 0x376   :  { %v8074_v13 = vpop.f32.mrb[202].mxu0 }
 0x377   :  { %v4850_v15 = vpop.f32.mrb[203].mxu0 }
 0x378   :  { %5497 = vmatpush3.bf16.msra.mxu1 %v5496_v38  ;;  %v5532_v15 = vpack.c.bf16 %v3583_v56, %v3582_v50  ;;  %v8767_v50 = vmax.f32 %v6749_v11, %v7194_v33  ;;  %v3608_v11 = vld [vmem:[%s8738_s3 + $0x6b0] sm:$0xff]  ;;  %v3609_v33 = vld [vmem:[%s8738_s3 + $0x6b8] sm:$0xff] }
 0x379   :  { %5498 = vmatprep.subr.bf16.mxu1 %v8753_v17 }
 0x37c   :  { %5500 = vmatpush3.bf16.msra.mxu1 %v5499_v0  ;;  %v3584_v0 = vld [vmem:[%s8738_s3 + $0x5f0] sm:$0xff] }
 0x37d   :  { %5501 = vmatprep.subr.bf16.mxu1 %v8753_v17  ;;  %v5535_v34 = vpack.c.bf16 %v3585_v47, %v3584_v0  ;;  %v5571_v47 = vpack.c.bf16 %v3609_v33, %v3608_v11 }
 0x380   :  { %5503 = vmatpush3.bf16.msra.mxu1 %v5502_v61  ;;  %v3586_v61 = vld [vmem:[%s8738_s3 + $0x600] sm:$0xff] }
 0x381   :  { %5504 = vmatprep.subr.bf16.mxu1 %v8753_v17  ;;  %v5538_v10 = vpack.c.bf16 %v3587_v26, %v3586_v61  ;;  %v3611_v61 = vld [vmem:[%s8738_s3 + $0x6c8] sm:$0xff] }
 0x382   :  { %v1355_v19 = vpop.f32.mrb[6].mxu1 }
 0x383   :  { %v1359_v35 = vadd.f32 %v1355_v19, %v1271_v43  ;;  %v4395_v49 = vpop.f32.mrb[7].mxu1  ;;  %v5517_v43 = vpack.c.bf16 %v3573_v5, %v3572_v7  ;;  %v3596_v7 = vld [vmem:[%s8738_s3 + $0x650] sm:$0xff]  ;;  %v3597_v5 = vld [vmem:[%s8738_s3 + $0x658] sm:$0xff] }
 0x384   :  { %5506 = vmatpush3.bf16.msra.mxu1 %v5505_v45  ;;  %v3588_v45 = vld [vmem:[%s8738_s3 + $0x610] sm:$0xff]  ;;  %v3591_v49 = vld [vmem:[%s8738_s3 + $0x628] sm:$0xff] }
 0x385   :  { %5507 = vmatprep.subr.bf16.mxu1 %v8753_v17  ;;  %v5541_v19 = vpack.c.bf16 %v3589_v3, %v3588_v45  ;;  %v3613_v45 = vld [vmem:[%s8738_s3 + $0x6d8] sm:$0xff] }
 0x388   :  { %5509 = vmatpush3.bf16.msra.mxu1 %v5508_v58 }
 0x389   :  { %5510 = vmatprep.subr.bf16.mxu1 %v8753_v17 }
 0x38c   :  { %5512 = vmatpush3.bf16.msra.mxu1 %v5511_v48  ;;  %v5547_v48 = vpack.c.bf16 %v3593_v40, %v3592_v57  ;;  %v3616_v40 = vld [vmem:[%s8738_s3 + $0x6f0] sm:$0xff] }
 0x38d   :  { %5513 = vmatprep.subr.bf16.mxu1 %v8753_v17 }
 0x38f   :  { %4639 = vmatmul.mubr.f32.vlgmr.msra.gmra.mrb[20].mxu1 %v8765_v4  ;;  %v5553_v4 = vpack.c.bf16 %v3597_v5, %v3596_v7  ;;  %v3636_v7 = vld [vmem:[%s8738_s3 + $0x790] sm:$0xff]  ;;  %v3637_v5 = vld [vmem:[%s8738_s3 + $0x798] sm:$0xff] }
 0x390   :  { %5515 = vmatpush3.bf16.msra.mxu1 %v5514_v2  ;;  %4673 = vmatprep.mubr.msk.f32.mxu1 %vm5902_vm0, %v8752_v55  ;;  %v5550_v2 = vpack.c.bf16 %v3595_v22, %v3594_v27  ;;  %v3634_v27 = vld [vmem:[%s8738_s3 + $0x780] sm:$0xff]  ;;  %v3635_v22 = vld [vmem:[%s8738_s3 + $0x788] sm:$0xff] }
 0x391   :  { %5516 = vmatprep.subr.bf16.mxu1 %v8753_v17 }
 0x394   :  { %5518 = vmatpush3.bf16.msra.mxu1 %v5517_v43  ;;  %v3598_v43 = vld [vmem:[%s8738_s3 + $0x660] sm:$0xff] }
 0x395   :  { %5519 = vmatprep.subr.bf16.mxu1 %v8753_v17  ;;  %v5556_v14 = vpack.c.bf16 %v3599_v53, %v3598_v43  ;;  %v5613_v53 = vpack.c.bf16 %v3637_v5, %v3636_v7 }
 0x396   :  { %v8137_v51 = vpop.f32.mrb[204].mxu0 }
 0x397   :  { %v4920_v20 = vpop.f32.mrb[205].mxu0 }
 0x398   :  { %5521 = vmatpush3.bf16.msra.mxu1 %v5520_v63  ;;  %v3600_v20 = vld [vmem:[%s8738_s3 + $0x670] sm:$0xff] }
 0x399   :  { %5522 = vmatprep.subr.bf16.mxu1 %v8753_v17 }
 0x39c   :  { %5524 = vmatpush3.bf16.msra.mxu1 %v5523_v23  ;;  %v3601_v23 = vld [vmem:[%s8738_s3 + $0x678] sm:$0xff] }
 0x39d   :  { %5525 = vmatprep.subr.bf16.mxu1 %v8753_v17  ;;  %v5559_v54 = vpack.c.bf16 %v3601_v23, %v3600_v20 }
 0x3a0   :  { %5527 = vmatpush3.bf16.msra.mxu1 %v5526_v12  ;;  %v3603_v12 = vld [vmem:[%s8738_s3 + $0x688] sm:$0xff] }
 0x3a1   :  { %5528 = vmatprep.subr.bf16.mxu1 %v8753_v17  ;;  %v5562_v8 = vpack.c.bf16 %v3603_v12, %v3602_v29  ;;  %v3642_v29 = vld [vmem:[%s8738_s3 + $0x7c0] sm:$0xff]  ;;  %v3643_v12 = vld [vmem:[%s8738_s3 + $0x7c8] sm:$0xff] }
 0x3a2   :  { %v1443_v38 = vpop.f32.mrb[8].mxu1 }
 0x3a3   :  { %v1447_v30 = vadd.f32 %v1443_v38, %v1359_v35  ;;  %v4430_v44 = vpop.f32.mrb[9].mxu1  ;;  %v3590_v35 = vld [vmem:[%s8738_s3 + $0x620] sm:$0xff] }
 0x3a4   :  { %5530 = vmatpush3.bf16.msra.mxu1 %v5529_v18  ;;  %v5544_v58 = vpack.c.bf16 %v3591_v49, %v3590_v35  ;;  %v3605_v18 = vld [vmem:[%s8738_s3 + $0x698] sm:$0xff]  ;;  %v3606_v38 = vld [vmem:[%s8738_s3 + $0x6a0] sm:$0xff] }
 0x3a5   :  { %5531 = vmatprep.subr.bf16.mxu1 %v8753_v17  ;;  %v5565_v56 = vpack.c.bf16 %v3605_v18, %v3604_v1  ;;  %v3644_v1 = vld [vmem:[%s8738_s3 + $0x7d0] sm:$0xff]  ;;  %v3645_v18 = vld [vmem:[%s8738_s3 + $0x7d8] sm:$0xff] }
 0x3a8   :  { %5533 = vmatpush3.bf16.msra.mxu1 %v5532_v15 }
 0x3a9   :  { %5534 = vmatprep.subr.bf16.mxu1 %v8753_v17 }
 0x3ac   :  { %5536 = vmatpush3.bf16.msra.mxu1 %v5535_v34  ;;  %v3610_v34 = vld [vmem:[%s8738_s3 + $0x6c0] sm:$0xff] }
 0x3ad   :  { %5537 = vmatprep.subr.bf16.mxu1 %v8753_v17  ;;  %v5574_v26 = vpack.c.bf16 %v3611_v61, %v3610_v34  ;;  %v3666_v61 = vld [vmem:[%s8738_s3 + $0x880] sm:$0xff] }
 0x3af   :  { %4674 = vmatmul.mubr.f32.vlgmr.msra.gmra.mrb[22].mxu1 %v8766_v46  ;;  %v3614_v46 = vld [vmem:[%s8738_s3 + $0x6e0] sm:$0xff] }
 0x3b0   :  { %5539 = vmatpush3.bf16.msra.mxu1 %v5538_v10  ;;  %4708 = vmatprep.mubr.msk.f32.mxu1 %vm5902_vm0, %v8752_v55  ;;  %v3612_v10 = vld [vmem:[%s8738_s3 + $0x6d0] sm:$0xff] }
 0x3b1   :  { %5540 = vmatprep.subr.bf16.mxu1 %v8753_v17  ;;  %v5577_v3 = vpack.c.bf16 %v3613_v45, %v3612_v10  ;;  %v3668_v45 = vld [vmem:[%s8738_s3 + $0x890] sm:$0xff] }
 0x3b4   :  { %5542 = vmatpush3.bf16.msra.mxu1 %v5541_v19  ;;  %v3615_v19 = vld [vmem:[%s8738_s3 + $0x6e8] sm:$0xff] }
 0x3b5   :  { %5543 = vmatprep.subr.bf16.mxu1 %v8753_v17  ;;  %v5580_v57 = vpack.c.bf16 %v3615_v19, %v3614_v46  ;;  %v3670_v19 = vld [vmem:[%s8738_s3 + $0x8a0] sm:$0xff] }
 0x3b6   :  { %v8200_v21 = vpop.f32.mrb[206].mxu0 }
 0x3b7   :  { %v4990_v39 = vpop.f32.mrb[207].mxu0 }
 0x3b8   :  { %5545 = vmatpush3.bf16.msra.mxu1 %v5544_v58  ;;  %v3617_v39 = vld [vmem:[%s8738_s3 + $0x6f8] sm:$0xff] }
 0x3b9   :  { %5546 = vmatprep.subr.bf16.mxu1 %v8753_v17 }
 0x3bc   :  { %5548 = vmatpush3.bf16.msra.mxu1 %v5547_v48  ;;  %v5583_v48 = vpack.c.bf16 %v3617_v39, %v3616_v40  ;;  %v3676_v39 = vld [vmem:[%s8738_s3 + $0x8d0] sm:$0xff] }
 0x3bd   :  { %5549 = vmatprep.subr.bf16.mxu1 %v8753_v17 }
 0x3c0   :  { %5551 = vmatpush3.bf16.msra.mxu1 %v5550_v2  ;;  %v5610_v2 = vpack.c.bf16 %v3635_v22, %v3634_v27  ;;  %v3678_v22 = vld [vmem:[%s8738_s3 + $0x8e0] sm:$0xff] }
 0x3c1   :  { %5552 = vmatprep.subr.bf16.mxu1 %v8753_v17 }
 0x3c2   :  { %v1531_v52 = vpop.f32.mrb[10].mxu1 }
 0x3c3   :  { %v1535_v63 = vadd.f32 %v1531_v52, %v1447_v30  ;;  %v4465_v42 = vpop.f32.mrb[11].mxu1  ;;  %v3607_v30 = vld [vmem:[%s8738_s3 + $0x6a8] sm:$0xff]  ;;  %v3638_v52 = vld [vmem:[%s8738_s3 + $0x7a0] sm:$0xff] }
 0x3c4   :  { %5554 = vmatpush3.bf16.msra.mxu1 %v5553_v4  ;;  %v5568_v44 = vpack.c.bf16 %v3607_v30, %v3606_v38  ;;  %v8768_v4 = vld [vmem:[#allocation3_spill] sm:$0xff] }
 0x3c5   :  { %5555 = vmatprep.subr.bf16.mxu1 %v8753_v17  ;;  %v8769_v43 = vmax.f32 %v6767_v32, %v8768_v4  ;;  %v3640_v32 = vld [vmem:[%s8738_s3 + $0x7b0] sm:$0xff]  ;;  %v3647_v38 = vld [vmem:[%s8738_s3 + $0x7e8] sm:$0xff] }
 0x3c8   :  { %5557 = vmatpush3.bf16.msra.mxu1 %v5556_v14  ;;  %v3641_v14 = vld [vmem:[%s8738_s3 + $0x7b8] sm:$0xff] }
 0x3c9   :  { %5558 = vmatprep.subr.bf16.mxu1 %v8753_v17 }
 0x3cc   :  { %5560 = vmatpush3.bf16.msra.mxu1 %v5559_v54  ;;  %v5619_v54 = vpack.c.bf16 %v3641_v14, %v3640_v32  ;;  %v3699_v32 = vld [vmem:[%s8738_s3 + $0x988] sm:$0xff] }
 0x3cd   :  { %5561 = vmatprep.subr.bf16.mxu1 %v8753_v17 }
 0x3cf   :  { %4709 = vmatmul.mubr.f32.vlgmr.msra.gmra.mrb[24].mxu1 %v8767_v50  ;;  %v5625_v50 = vpack.c.bf16 %v3645_v18, %v3644_v1  ;;  %v3703_v1 = vld [vmem:[%s8738_s3 + $0x9a8] sm:$0xff] }
 0x3d0   :  { %5563 = vmatpush3.bf16.msra.mxu1 %v5562_v8  ;;  %4743 = vmatprep.mubr.msk.f32.mxu1 %vm5902_vm0, %v8752_v55  ;;  %v5622_v8 = vpack.c.bf16 %v3643_v12, %v3642_v29  ;;  %v8770_v29 = vmax.f32 %v6839_v41, %v7289_v37  ;;  %v3704_v41 = vld [vmem:[%s8738_s3 + $0x9b0] sm:$0xff]  ;;  %v3705_v37 = vld [vmem:[%s8738_s3 + $0x9b8] sm:$0xff] }
 0x3d1   :  { %5564 = vmatprep.subr.bf16.mxu1 %v8753_v17 }
 0x3d4   :  { %5566 = vmatpush3.bf16.msra.mxu1 %v5565_v56  ;;  %v3646_v56 = vld [vmem:[%s8738_s3 + $0x7e0] sm:$0xff] }
 0x3d5   :  { %5567 = vmatprep.subr.bf16.mxu1 %v8753_v17  ;;  %v5628_v33 = vpack.c.bf16 %v3647_v38, %v3646_v56  ;;  %v3706_v56 = vld [vmem:[%s8738_s3 + $0x9c0] sm:$0xff]  ;;  %v3707_v38 = vld [vmem:[%s8738_s3 + $0x9c8] sm:$0xff] }
 0x3d6   :  { %v8263_v15 = vpop.f32.mrb[208].mxu0 }
 0x3d7   :  { %v5060_v0 = vpop.f32.mrb[209].mxu0 }
 0x3d8   :  { %5569 = vmatpush3.bf16.msra.mxu1 %v5568_v44  ;;  %v3648_v0 = vld [vmem:[%s8738_s3 + $0x7f0] sm:$0xff] }
 0x3d9   :  { %5570 = vmatprep.subr.bf16.mxu1 %v8753_v17 }
 0x3dc   :  { %5572 = vmatpush3.bf16.msra.mxu1 %v5571_v47  ;;  %v3649_v47 = vld [vmem:[%s8738_s3 + $0x7f8] sm:$0xff] }
 0x3dd   :  { %5573 = vmatprep.subr.bf16.mxu1 %v8753_v17  ;;  %v5631_v34 = vpack.c.bf16 %v3649_v47, %v3648_v0  ;;  %v3710_v0 = vld [vmem:[%s8738_s3 + $0x9e0] sm:$0xff]  ;;  %v3711_v47 = vld [vmem:[%s8738_s3 + $0x9e8] sm:$0xff] }
 0x3e0   :  { %5575 = vmatpush3.bf16.msra.mxu1 %v5574_v26  ;;  %v3667_v26 = vld [vmem:[%s8738_s3 + $0x888] sm:$0xff] }
 0x3e1   :  { %5576 = vmatprep.subr.bf16.mxu1 %v8753_v17  ;;  %v5658_v10 = vpack.c.bf16 %v3667_v26, %v3666_v61 }
 0x3e2   :  { %v1619_v35 = vpop.f32.mrb[12].mxu1 }
 0x3e3   :  { %v1623_v49 = vadd.f32 %v1619_v35, %v1535_v63  ;;  %v4500_v58 = vpop.f32.mrb[13].mxu1  ;;  %v3639_v63 = vld [vmem:[%s8738_s3 + $0x7a8] sm:$0xff] }
 0x3e4   :  { %5578 = vmatpush3.bf16.msra.mxu1 %v5577_v3  ;;  %v5616_v42 = vpack.c.bf16 %v3639_v63, %v3638_v52  ;;  %v3669_v3 = vld [vmem:[%s8738_s3 + $0x898] sm:$0xff]  ;;  %v3671_v35 = vld [vmem:[%s8738_s3 + $0x8a8] sm:$0xff]  ;;  %v3674_v58 = vld [vmem:[%s8738_s3 + $0x8c0] sm:$0xff] }
 0x3e5   :  { %5579 = vmatprep.subr.bf16.mxu1 %v8753_v17  ;;  %v5661_v46 = vpack.c.bf16 %v3669_v3, %v3668_v45  ;;  %v3681_v52 = vld [vmem:[%s8738_s3 + $0x8f8] sm:$0xff]  ;;  %v3712_v45 = vld [vmem:[%s8738_s3 + $0x9f0] sm:$0xff] }
 0x3e6   :  { %v3713_v3 = vld [vmem:[%s8738_s3 + $0x9f8] sm:$0xff] }
 0x3e8   :  { %5581 = vmatpush3.bf16.msra.mxu1 %v5580_v57  ;;  %v3675_v57 = vld [vmem:[%s8738_s3 + $0x8c8] sm:$0xff] }
 0x3e9   :  { %5582 = vmatprep.subr.bf16.mxu1 %v8753_v17  ;;  %v5670_v40 = vpack.c.bf16 %v3675_v57, %v3674_v58  ;;  %v3734_v57 = vld [vmem:[%s8738_s3 + $0xaa0] sm:$0xff] }
 0x3ec   :  { %5584 = vmatpush3.bf16.msra.mxu1 %v5583_v48  ;;  %v3677_v48 = vld [vmem:[%s8738_s3 + $0x8d8] sm:$0xff] }
 0x3ed   :  { %5609 = vmatprep.subr.bf16.mxu1 %v8753_v17  ;;  %v5673_v27 = vpack.c.bf16 %v3677_v48, %v3676_v39 }
 0x3ef   :  { %4744 = vmatmul.mubr.f32.vlgmr.msra.gmra.mrb[26].mxu1 %v8769_v43 }
 0x3f0   :  { %5611 = vmatpush3.bf16.msra.mxu1 %v5610_v2  ;;  %4813 = vmatprep.mubr.msk.f32.mxu1 %vm5902_vm0, %v8752_v55  ;;  %v3679_v2 = vld [vmem:[%s8738_s3 + $0x8e8] sm:$0xff] }
 0x3f1   :  { %5612 = vmatprep.subr.bf16.mxu1 %v8753_v17  ;;  %v5676_v43 = vpack.c.bf16 %v3679_v2, %v3678_v22  ;;  %v3739_v22 = vld [vmem:[%s8738_s3 + $0xac8] sm:$0xff] }
 0x3f4   :  { %5614 = vmatpush3.bf16.msra.mxu1 %v5613_v53  ;;  %v3680_v53 = vld [vmem:[%s8738_s3 + $0x8f0] sm:$0xff] }
 0x3f5   :  { %5615 = vmatprep.subr.bf16.mxu1 %v8753_v17  ;;  %v5679_v63 = vpack.c.bf16 %v3681_v52, %v3680_v53  ;;  %v3743_v53 = vld [vmem:[%s8738_s3 + $0xae8] sm:$0xff] }
 0x3f6   :  { %v8326_v20 = vpop.f32.mrb[210].mxu0 }
 0x3f7   :  { %v5130_v23 = vpop.f32.mrb[211].mxu0 }
 0x3f8   :  { %5617 = vmatpush3.bf16.msra.mxu1 %v5616_v42  ;;  %v3698_v42 = vld [vmem:[%s8738_s3 + $0x980] sm:$0xff]  ;;  %v3700_v23 = vld [vmem:[%s8738_s3 + $0x990] sm:$0xff] }
 0x3f9   :  { %5618 = vmatprep.subr.bf16.mxu1 %v8753_v17  ;;  %v5706_v14 = vpack.c.bf16 %v3699_v32, %v3698_v42 }
 0x3fc   :  { %5620 = vmatpush3.bf16.msra.mxu1 %v5619_v54  ;;  %v3701_v54 = vld [vmem:[%s8738_s3 + $0x998] sm:$0xff] }
 0x3fd   :  { %5621 = vmatprep.subr.bf16.mxu1 %v8753_v17  ;;  %v5709_v12 = vpack.c.bf16 %v3701_v54, %v3700_v23  ;;  %v3745_v23 = vld [vmem:[%s8738_s3 + $0xaf8] sm:$0xff] }
 0x400   :  { %5623 = vmatpush3.bf16.msra.mxu1 %v5622_v8  ;;  %v3702_v8 = vld [vmem:[%s8738_s3 + $0x9a0] sm:$0xff] }
 0x401   :  { %5624 = vmatprep.subr.bf16.mxu1 %v8753_v17  ;;  %v5712_v18 = vpack.c.bf16 %v3703_v1, %v3702_v8  ;;  %v3764_v1 = vld [vmem:[%s8738_s3 + $0xb90] sm:$0xff] }
 0x402   :  { %v1707_v30 = vpop.f32.mrb[14].mxu1 }
 0x403   :  { %v1711_v44 = vadd.f32 %v1707_v30, %v1623_v49  ;;  %v4535_v11 = vpop.f32.mrb[15].mxu1  ;;  %v5664_v49 = vpack.c.bf16 %v3671_v35, %v3670_v19  ;;  %v5718_v30 = vpack.c.bf16 %v3707_v38, %v3706_v56  ;;  %v3730_v19 = vld [vmem:[%s8738_s3 + $0xa80] sm:$0xff]  ;;  %v3731_v35 = vld [vmem:[%s8738_s3 + $0xa88] sm:$0xff] }
 0x404   :  { %5626 = vmatpush3.bf16.msra.mxu1 %v5625_v50  ;;  %v5715_v50 = vpack.c.bf16 %v3705_v37, %v3704_v41  ;;  %v3709_v11 = vld [vmem:[%s8738_s3 + $0x9d8] sm:$0xff]  ;;  %v8772_v41 = vmax.f32 %v6893_v9, %v7378_v28  ;;  %v3767_v56 = vld [vmem:[%s8738_s3 + $0xba8] sm:$0xff]  ;;  %v3768_v9 = vld [vmem:[%s8738_s3 + $0xbb0] sm:$0xff] }
 0x405   :  { %5627 = vmatprep.subr.bf16.mxu1 %v8753_v17  ;;  %v3769_v28 = vld [vmem:[%s8738_s3 + $0xbb8] sm:$0xff] }
 0x408   :  { %5629 = vmatpush3.bf16.msra.mxu1 %v5628_v33 }
 0x409   :  { %5630 = vmatprep.subr.bf16.mxu1 %v8753_v17 }
 0x40c   :  { %5632 = vmatpush3.bf16.msra.mxu1 %v5631_v34 }
 0x40d   :  { %5657 = vmatprep.subr.bf16.mxu1 %v8753_v17 }
 0x40f   :  { %4814 = vmatmul.mubr.f32.vlgmr.msra.gmra.mrb[28].mxu1 %v1001_v31  ;;  %v5667_v31 = vpack.c.bf16 %v3673_v25, %v3672_v6  ;;  %v3732_v6 = vld [vmem:[%s8738_s3 + $0xa90] sm:$0xff]  ;;  %v3733_v25 = vld [vmem:[%s8738_s3 + $0xa98] sm:$0xff] }
 0x410   :  { %5659 = vmatpush3.bf16.msra.mxu1 %v5658_v10  ;;  %4883 = vmatprep.mubr.msk.f32.mxu1 %vm5902_vm0, %v8752_v55  ;;  %v5724_v10 = vpack.c.bf16 %v3711_v47, %v3710_v0  ;;  %v5757_v58 = vpack.c.bf16 %v3733_v25, %v3732_v6  ;;  %v3772_v0 = vld [vmem:[%s8738_s3 + $0xbd0] sm:$0xff]  ;;  %v3773_v47 = vld [vmem:[%s8738_s3 + $0xbd8] sm:$0xff] }
 0x411   :  { %5660 = vmatprep.subr.bf16.mxu1 %v8753_v17 }
 0x414   :  { %5662 = vmatpush3.bf16.msra.mxu1 %v5661_v46  ;;  %v5727_v46 = vpack.c.bf16 %v3713_v3, %v3712_v45 }
 0x415   :  { %5663 = vmatprep.subr.bf16.mxu1 %v8753_v17 }
 0x418   :  { %5665 = vmatpush3.bf16.msra.mxu1 %v5664_v49  ;;  %v5754_v49 = vpack.c.bf16 %v3731_v35, %v3730_v19  ;;  %v3776_v19 = vld [vmem:[%s8738_s3 + $0xbf0] sm:$0xff]  ;;  %v3777_v35 = vld [vmem:[%s8738_s3 + $0xbf8] sm:$0xff] }
 0x419   :  { %5666 = vmatprep.subr.bf16.mxu1 %v8753_v17 }
 0x41c   :  { %5668 = vmatpush3.bf16.msra.mxu1 %v5667_v31  ;;  %v8771_v31 = vmax.f32 %v6875_v16, %v7336_v24  ;;  %v3736_v16 = vld [vmem:[%s8738_s3 + $0xab0] sm:$0xff]  ;;  %v3737_v24 = vld [vmem:[%s8738_s3 + $0xab8] sm:$0xff] }
 0x41d   :  { %5669 = vmatprep.subr.bf16.mxu1 %v8753_v17  ;;  %v5763_v48 = vpack.c.bf16 %v3737_v24, %v3736_v16  ;;  %v3218_v16 = vld [vmem:[%s8739_s5 + $0x8] sm:$0xff] }
 0x420   :  { %5671 = vmatpush3.bf16.msra.mxu1 %v5670_v40  ;;  %v3735_v40 = vld [vmem:[%s8738_s3 + $0xaa8] sm:$0xff] }
 0x421   :  { %5672 = vmatprep.subr.bf16.mxu1 %v8753_v17  ;;  %v5760_v39 = vpack.c.bf16 %v3735_v40, %v3734_v57 }
 0x422   :  { %v1795_v7 = vpop.f32.mrb[16].mxu1 }
 0x423   :  { %v1799_v5 = vadd.f32 %v1795_v7, %v1711_v44  ;;  %v4570_v4 = vpop.f32.mrb[17].mxu1  ;;  %v3708_v44 = vld [vmem:[%s8738_s3 + $0x9d0] sm:$0xff] }
 0x424   :  { %5674 = vmatpush3.bf16.msra.mxu1 %v5673_v27  ;;  %v5721_v33 = vpack.c.bf16 %v3709_v11, %v3708_v44  ;;  %v3738_v27 = vld [vmem:[%s8738_s3 + $0xac0] sm:$0xff]  ;;  %v3740_v7 = vld [vmem:[%s8738_s3 + $0xad0] sm:$0xff]  ;;  %v3771_v11 = vld [vmem:[%s8738_s3 + $0xbc8] sm:$0xff] }
 0x425   :  { %5675 = vmatprep.subr.bf16.mxu1 %v8753_v17  ;;  %v5766_v2 = vpack.c.bf16 %v3739_v22, %v3738_v27  ;;  %v3770_v44 = vld [vmem:[%s8738_s3 + $0xbc0] sm:$0xff]  ;;  %v3222_v27 = vld [vmem:[%s8739_s5 + $0x28] sm:$0xff] }
 0x428   :  { %5677 = vmatpush3.bf16.msra.mxu1 %v5676_v43  ;;  %v3742_v43 = vld [vmem:[%s8738_s3 + $0xae0] sm:$0xff] }
 0x429   :  { %5678 = vmatprep.subr.bf16.mxu1 %v8753_v17  ;;  %v5772_v32 = vpack.c.bf16 %v3743_v53, %v3742_v43  ;;  %v3227_v53 = vld [vmem:[%s8739_s5 + $0x50] sm:$0xff] }
 0x42c   :  { %5680 = vmatpush3.bf16.msra.mxu1 %v5679_v63 }
 0x42d   :  { %5705 = vmatprep.subr.bf16.mxu1 %v8753_v17 }
 0x42f   :  { %4884 = vmatmul.mubr.f32.vlgmr.msra.gmra.mrb[30].mxu1 %v8770_v29  ;;  %v3762_v29 = vld [vmem:[%s8738_s3 + $0xb80] sm:$0xff] }
 0x430   :  { %5707 = vmatpush3.bf16.msra.mxu1 %v5706_v14  ;;  %4953 = vmatprep.mubr.msk.f32.mxu1 %vm5902_vm0, %v8752_v55  ;;  %v3744_v14 = vld [vmem:[%s8738_s3 + $0xaf0] sm:$0xff] }
 0x431   :  { %5708 = vmatprep.subr.bf16.mxu1 %v8753_v17  ;;  %v5775_v54 = vpack.c.bf16 %v3745_v23, %v3744_v14 }
 0x434   :  { %5710 = vmatpush3.bf16.msra.mxu1 %v5709_v12  ;;  %v3763_v12 = vld [vmem:[%s8738_s3 + $0xb88] sm:$0xff] }
 0x435   :  { %5711 = vmatprep.subr.bf16.mxu1 %v8753_v17  ;;  %v5802_v8 = vpack.c.bf16 %v3763_v12, %v3762_v29 }
 0x438   :  { %5713 = vmatpush3.bf16.msra.mxu1 %v5712_v18  ;;  %v3765_v18 = vld [vmem:[%s8738_s3 + $0xb98] sm:$0xff] }
 0x439   :  { %5714 = vmatprep.subr.bf16.mxu1 %v8753_v17  ;;  %v5805_v37 = vpack.c.bf16 %v3765_v18, %v3764_v1  ;;  %v3232_v1 = vld [vmem:[%s8739_s5 + $0x78] sm:$0xff] }
 0x43c   :  { %5716 = vmatpush3.bf16.msra.mxu1 %v5715_v50  ;;  %v3766_v50 = vld [vmem:[%s8738_s3 + $0xba0] sm:$0xff] }
 0x43d   :  { %5717 = vmatprep.subr.bf16.mxu1 %v8753_v17  ;;  %v5808_v38 = vpack.c.bf16 %v3767_v56, %v3766_v50  ;;  %v3314_v56 = vld [vmem:[%s8740_s7 + $0x18] sm:$0xff] }
 0x440   :  { %5719 = vmatpush3.bf16.msra.mxu1 %v5718_v30  ;;  %v5811_v30 = vpack.c.bf16 %v3769_v28, %v3768_v9  ;;  %v3315_v9 = vld [vmem:[%s8740_s7 + $0x20] sm:$0xff]  ;;  %v3316_v28 = vld [vmem:[%s8740_s7 + $0x28] sm:$0xff] }
 0x441   :  { %5720 = vmatprep.subr.bf16.mxu1 %v8753_v17 }
 0x442   :  { %v1883_v34 = vpop.f32.mrb[18].mxu1 }
 0x443   :  { %v1887_v61 = vadd.f32 %v1883_v34, %v1799_v5  ;;  %v4605_v26 = vpop.f32.mrb[19].mxu1  ;;  %v3741_v5 = vld [vmem:[%s8738_s3 + $0xad8] sm:$0xff]  ;;  %v5817_v34 = vpack.c.bf16 %v3773_v47, %v3772_v0  ;;  %v3319_v0 = vld [vmem:[%s8740_s7 + $0x40] sm:$0xff]  ;;  %v3320_v47 = vld [vmem:[%s8740_s7 + $0x48] sm:$0xff] }
 0x444   :  { %5722 = vmatpush3.bf16.msra.mxu1 %v5721_v33  ;;  %v5769_v4 = vpack.c.bf16 %v3741_v5, %v3740_v7  ;;  %v5814_v33 = vpack.c.bf16 %v3771_v11, %v3770_v44  ;;  %v3775_v26 = vld [vmem:[%s8738_s3 + $0xbe8] sm:$0xff]  ;;  %v3225_v5 = vld [vmem:[%s8739_s5 + $0x40] sm:$0xff]  ;;  %v3317_v44 = vld [vmem:[%s8740_s7 + $0x30] sm:$0xff] }
 0x445   :  { %5723 = vmatprep.subr.bf16.mxu1 %v8753_v17  ;;  %v3318_v11 = vld [vmem:[%s8740_s7 + $0x38] sm:$0xff] }
 0x448   :  { %5725 = vmatpush3.bf16.msra.mxu1 %v5724_v10 }
 0x449   :  { %5726 = vmatprep.subr.bf16.mxu1 %v8753_v17 }
 0x44c   :  { %5728 = vmatpush3.bf16.msra.mxu1 %v5727_v46 }
 0x44d   :  { %5753 = vmatprep.subr.bf16.mxu1 %v8753_v17 }
 0x44f   :  { %4954 = vmatmul.mubr.f32.vlgmr.msra.gmra.mrb[32].mxu1 %v8771_v31 }
 0x450   :  { %5755 = vmatpush3.bf16.msra.mxu1 %v5754_v49  ;;  %5023 = vmatprep.mubr.msk.f32.mxu1 %vm5902_vm0, %v8752_v55  ;;  %v5823_v49 = vpack.c.bf16 %v3777_v35, %v3776_v19 }
 0x451   :  { %5756 = vmatprep.subr.bf16.mxu1 %v8753_v17 }
 0x454   :  { %5758 = vmatpush3.bf16.msra.mxu1 %v5757_v58 }
 0x455   :  { %5759 = vmatprep.subr.bf16.mxu1 %v8753_v17 }
 0x458   :  { %5761 = vmatpush3.bf16.msra.mxu1 %v5760_v39  ;;  %v3217_v39 = vld [vmem:[%s8739_s5] sm:$0xff] }
 0x459   :  { %5762 = vmatprep.subr.bf16.mxu1 %v8753_v17  ;;  %v5850_v62 = vpack.c.bf16 %v3218_v16, %v3217_v39 }
 0x45c   :  { %5764 = vmatpush3.bf16.msra.mxu1 %v5763_v48  ;;  %v3221_v48 = vld [vmem:[%s8739_s5 + $0x20] sm:$0xff] }
 0x45d   :  { %5765 = vmatprep.subr.bf16.mxu1 %v8753_v17  ;;  %v5856_v22 = vpack.c.bf16 %v3222_v27, %v3221_v48 }
 0x460   :  { %5767 = vmatpush3.bf16.msra.mxu1 %v5766_v2  ;;  %v3224_v2 = vld [vmem:[%s8739_s5 + $0x38] sm:$0xff] }
 0x461   :  { %5768 = vmatprep.subr.bf16.mxu1 %v8753_v17 }
 0x462   :  { %v1971_v52 = vpop.f32.mrb[20].mxu1 }
 0x463   :  { %v1975_v63 = vadd.f32 %v1971_v52, %v1887_v61  ;;  %v4640_v42 = vpop.f32.mrb[21].mxu1  ;;  %v3774_v61 = vld [vmem:[%s8738_s3 + $0xbe0] sm:$0xff]  ;;  %v3228_v52 = vld [vmem:[%s8739_s5 + $0x58] sm:$0xff] }
 0x464   :  { %5770 = vmatpush3.bf16.msra.mxu1 %v5769_v4  ;;  %v5820_v46 = vpack.c.bf16 %v3775_v26, %v3774_v61  ;;  %v3226_v4 = vld [vmem:[%s8739_s5 + $0x48] sm:$0xff]  ;;  %v3229_v42 = vld [vmem:[%s8739_s5 + $0x60] sm:$0xff]  ;;  %v3321_v61 = vld [vmem:[%s8740_s7 + $0x50] sm:$0xff] }
 0x465   :  { %5771 = vmatprep.subr.bf16.mxu1 %v8753_v17  ;;  %v5862_v43 = vpack.c.bf16 %v3226_v4, %v3225_v5  ;;  %v3322_v26 = vld [vmem:[%s8740_s7 + $0x58] sm:$0xff]  ;;  %v3796_v5 = vld [vmem:[%s8743_s8] ss:$0 sm:$0xff] }
 0x468   :  { %5773 = vmatpush3.bf16.msra.mxu1 %v5772_v32  ;;  %v3230_v32 = vld [vmem:[%s8739_s5 + $0x68] sm:$0xff] }
 0x469   :  { %5774 = vmatprep.subr.bf16.mxu1 %v8753_v17  ;;  %v5868_v23 = vpack.c.bf16 %v3230_v32, %v3229_v42 }
 0x46c   :  { %5776 = vmatpush3.bf16.msra.mxu1 %v5775_v54 }
 0x46d   :  { %5801 = vmatprep.subr.bf16.mxu1 %v8753_v17 }
 0x46f   :  { %5024 = vmatmul.mubr.f32.vlgmr.msra.gmra.mrb[34].mxu1 %v8772_v41  ;;  %v3311_v41 = vld [vmem:[%s8740_s7] sm:$0xff] }
 0x470   :  { %5803 = vmatpush3.bf16.msra.mxu1 %v5802_v8  ;;  %5093 = vmatprep.mubr.msk.f32.mxu1 %vm5902_vm0, %v8752_v55  ;;  %v3231_v8 = vld [vmem:[%s8739_s5 + $0x70] sm:$0xff] }
 0x471   :  { %5804 = vmatprep.subr.bf16.mxu1 %v8753_v17  ;;  %v5871_v18 = vpack.c.bf16 %v3232_v1, %v3231_v8 }
 0x474   :  { %5806 = vmatpush3.bf16.msra.mxu1 %v5805_v37  ;;  %v3313_v37 = vld [vmem:[%s8740_s7 + $0x10] sm:$0xff] }
 0x475   :  { %5807 = vmatprep.subr.bf16.mxu1 %v8753_v17 }
 0x478   :  { %5809 = vmatpush3.bf16.msra.mxu1 %v5808_v38  ;;  %v5877_v38 = vpack.c.bf16 %v3314_v56, %v3313_v37 }
 0x479   :  { %5810 = vmatprep.subr.bf16.mxu1 %v8753_v17 }
 0x47c   :  { %5812 = vmatpush3.bf16.msra.mxu1 %v5811_v30  ;;  %v5880_v30 = vpack.c.bf16 %v3316_v28, %v3315_v9 }
 0x47d   :  { %5813 = vmatprep.subr.bf16.mxu1 %v8753_v17 }
 0x480   :  { %5815 = vmatpush3.bf16.msra.mxu1 %v5814_v33  ;;  %v5883_v33 = vpack.c.bf16 %v3318_v11, %v3317_v44 }
 0x481   :  { %5816 = vmatprep.subr.bf16.mxu1 %v8753_v17 }
 0x482   :  { %v2059_v10 = vpop.f32.mrb[22].mxu1 }
 0x483   :  { %v2063_v45 = vadd.f32 %v2059_v10, %v1975_v63  ;;  %v4675_v3 = vpop.f32.mrb[23].mxu1  ;;  %v5865_v63 = vpack.c.bf16 %v3228_v52, %v3227_v53  ;;  %v5889_v10 = vpack.c.bf16 %v3322_v26, %v3321_v61 }
 0x484   :  { %5818 = vmatpush3.bf16.msra.mxu1 %v5817_v34  ;;  %v5886_v34 = vpack.c.bf16 %v3320_v47, %v3319_v0  ;;  %v3324_v3 = vld [vmem:[%s8740_s7 + $0x68] sm:$0xff] }
 0x485   :  { %5819 = vmatprep.subr.bf16.mxu1 %v8753_v17 }
 0x488   :  { %5821 = vmatpush3.bf16.msra.mxu1 %v5820_v46 }
 0x489   :  { %5822 = vmatprep.subr.bf16.mxu1 %v8753_v17 }
 0x48c   :  { %5824 = vmatpush3.bf16.msra.mxu1 %v5823_v49 }
 0x48d   :  { %5849 = vmatprep.subr.bf16.mxu1 %v8753_v17 }
 0x48f   :  { %5094 = vmatmul.mubr.f32.vlgmr.msra.gmra.mrb[36].mxu1 %v1009_v36  ;;  %v3220_v36 = vld [vmem:[%s8739_s5 + $0x18] sm:$0xff] }
 0x490   :  { %5163 = vmatprep.mubr.msk.f32.mxu1 %vm5902_vm0, %v8752_v55  ;;  %5851 = vmatpush3.bf16.msra.mxu1 %v5850_v62  ;;  %v5853_v24 = vpack.c.bf16 %v3220_v36, %v3219_v59 }
 0x491   :  { %5852 = vmatprep.subr.bf16.mxu1 %v8753_v17 }
 0x494   :  { %5854 = vmatpush3.bf16.msra.mxu1 %v5853_v24 }
 0x495   :  { %5855 = vmatprep.subr.bf16.mxu1 %v8753_v17 }
 0x498   :  { %5857 = vmatpush3.bf16.msra.mxu1 %v5856_v22  ;;  %v3795_v22 = vld [vmem:[%s8742_s6] ss:$0 sm:$0xff] }
 0x499   :  { %5858 = vmatprep.subr.bf16.mxu1 %v8753_v17 }
 0x4a2   :  { %v2147_v6 = vpop.f32.mrb[24].mxu1 }
 0x4a3   :  { %v2151_v25 = vadd.f32 %v2147_v6, %v2063_v45  ;;  %v4710_v31 = vpop.f32.mrb[25].mxu1  ;;  %v3323_v45 = vld [vmem:[%s8740_s7 + $0x60] sm:$0xff] }
 0x4a4   :  { %v5892_v49 = vpack.c.bf16 %v3324_v3, %v3323_v45 }
 0x4c2   :  { %v2235_v58 = vpop.f32.mrb[26].mxu1 }
 0x4c3   :  { %v2239_v57 = vadd.f32 %v2235_v58, %v2151_v25  ;;  %v4745_v40 = vpop.f32.mrb[27].mxu1 }
 0x4c5   :  { %v2327_v55 = vadd.f32 %v8011_v60, %v2239_v57  ;;  %v3223_v60 = vld [vmem:[%s8739_s5 + $0x30] sm:$0xff] }
 0x4c6   :  { %v5859_v7 = vpack.c.bf16 %v3224_v2, %v3223_v60 }
 0x4c8   :  { %5860 = vmatpush3.bf16.msra.mxu1 %v5859_v7 }
 0x4c9   :  { %5861 = vmatprep.subr.bf16.mxu1 %v8753_v17 }
 0x4cc   :  { %5863 = vmatpush3.bf16.msra.mxu1 %v5862_v43 }
 0x4cd   :  { %5864 = vmatprep.subr.bf16.mxu1 %v8753_v17 }
 0x4d0   :  { %5866 = vmatpush3.bf16.msra.mxu1 %v5865_v63 }
 0x4d1   :  { %5867 = vmatprep.subr.bf16.mxu1 %v8753_v17 }
 0x4d4   :  { %5869 = vmatpush3.bf16.msra.mxu1 %v5868_v23 }
 0x4d5   :  { %5870 = vmatprep.subr.bf16.mxu1 %v8753_v17 }
 0x4d8   :  { %5872 = vmatpush3.bf16.msra.mxu1 %v5871_v18 }
 0x4e2   :  { %v2411_v14 = vpop.f32.mrb[28].mxu1 }
 0x4e3   :  { %v2415_v54 = vadd.f32 %v2411_v14, %v2327_v55  ;;  %v4815_v29 = vpop.f32.mrb[29].mxu1 }
 0x4e5   :  { %v2503_v12 = vadd.f32 %v8074_v13, %v2415_v54  ;;  %v3312_v13 = vld [vmem:[%s8740_s7 + $0x8] sm:$0xff] }
 0x4e6   :  { %v5874_v50 = vpack.c.bf16 %v3312_v13, %v3311_v41 }
 0x4e8   :  { %5875 = vmatpush3.bf16.msra.mxu0 %v5874_v50 }
 0x4e9   :  { %5876 = vmatprep.subr.bf16.mxu0 %v8753_v17 }
 0x4ec   :  { %5878 = vmatpush3.bf16.msra.mxu0 %v5877_v38 }
 0x4ed   :  { %5879 = vmatprep.subr.bf16.mxu0 %v8753_v17 }
 0x4f0   :  { %5881 = vmatpush3.bf16.msra.mxu0 %v5880_v30 }
 0x4f1   :  { %5882 = vmatprep.subr.bf16.mxu0 %v8753_v17 }
 0x4f4   :  { %5884 = vmatpush3.bf16.msra.mxu0 %v5883_v33 }
 0x4f5   :  { %5885 = vmatprep.subr.bf16.mxu0 %v8753_v17 }
 0x4f8   :  { %5887 = vmatpush3.bf16.msra.mxu0 %v5886_v34 }
 0x4f9   :  { %5888 = vmatprep.subr.bf16.mxu0 %v8753_v17 }
 0x4fc   :  { %5890 = vmatpush3.bf16.msra.mxu0 %v5889_v10 }
 0x4fd   :  { %5891 = vmatprep.subr.bf16.mxu0 %v8753_v17 }
 0x500   :  { %5893 = vmatpush3.bf16.msra.mxu0 %v5892_v49 }
 0x501   :  { %5894 = vmatprep.subr.bf16.mxu0 %v8753_v17 }
 0x502   :  { %v2587_v46 = vpop.f32.mrb[30].mxu1 }
 0x503   :  { %v2591_v19 = vadd.f32 %v2587_v46, %v2503_v12  ;;  %v4885_v35 = vpop.f32.mrb[31].mxu1 }
 0x505   :  { %v2679_v6 = vadd.f32 %v8137_v51, %v2591_v19  ;;  %v3794_v51 = vld [vmem:[%s8741_s4] ss:$0 sm:$0xff] }
 0x522   :  { %v2763_v25 = vpop.f32.mrb[32].mxu1 }
 0x523   :  { %v2767_v31 = vadd.f32 %v2763_v25, %v2679_v6  ;;  %v4955_v58 = vpop.f32.mrb[33].mxu1 }
 0x525   :  { %v2855_v57 = vadd.f32 %v8200_v21, %v2767_v31  ;;  %v3325_v21 = vld [vmem:[%s8740_s7 + $0x70] sm:$0xff] }
 0x542   :  { %v2939_v40 = vpop.f32.mrb[34].mxu1 }
 0x543   :  { %v2943_v39 = vadd.f32 %v2939_v40, %v2855_v57  ;;  %v5025_v16 = vpop.f32.mrb[35].mxu1 }
 0x545   :  { %v3031_v59 = vadd.f32 %v8263_v15, %v2943_v39  ;;  %v3326_v15 = vld [vmem:[%s8740_s7 + $0x78] sm:$0xff] }
 0x546   :  { %v5895_v27 = vpack.c.bf16 %v3326_v15, %v3325_v21 }
 0x548   :  { %5896 = vmatpush3.bf16.msra.mxu0 %v5895_v27 }
 0x562   :  { %v3115_v55 = vpop.f32.mrb[36].mxu1 }
 0x563   :  { %v3119_v62 = vadd.f32 %v3115_v55, %v3031_v59  ;;  %v5095_v36 = vpop.f32.mrb[37].mxu1 }
 0x565   :  { %v3207_v24 = vadd.f32 %v8326_v20, %v3119_v62 }
 0x567   :  { %v3215_v17 = vadd.f32 %v3794_v51, %v3207_v24 }
 0x569   :  { %v3216_v48 = vmax.f32 %v3215_v17, 0.0 }
 0x56b   :  { %5164 = vmatmul.mubr.f32.vlgmr.msra.gmra.mrb[38].mxu1 %v3216_v48 }
 0x63e   :  { %v3306_v60 = vpop.f32.mrb[38].mxu1 }
 0x63f   :  { %v3307_v2 = vadd.f32 %v3795_v22, %v3306_v60  ;;  %v5165_v20 = vpop.f32.mrb[39].mxu1 }
 0x641   :  { %v3310_v7 = vmax.f32 %v3307_v2, 0.0 }
 0x643   :  { %5199 = vmatmul.mubr.f32.vlgmr.msra.gmra.mrb[212].mxu0 %v3310_v7 }
 0x716   :  { %v3400_v4 = vpop.f32.mrb[212].mxu0 }
 0x717   :  { %v3401_v43 = vadd.f32 %v3796_v5, %v3400_v4  ;;  %v5200_v53 = vpop.f32.mrb[213].mxu0 }
 0x719   :  { %3404 = vst [vmem:[%s8744_s9] sm:$0xff] %v3401_v43 }

</bundles_post_ra>
